<compile_context>
chip_gen: v7x
topology: tpu7x:2x2x1
jax: 0.10.0
libtpu: 0.0.40
codegen_flags: <defaults>
</compile_context>

<pallas_src>
import jax
import jax.numpy as jnp
from jax.experimental import pallas as pl
from jax.experimental.pallas import tpu as pltpu


# ---------------------------------------------------------------------------
# Fused kernel: conv (tap-wise matmuls) + BN shift + ReLU + 3x3/s2 maxpool + concat
# ---------------------------------------------------------------------------
def mixed5a_kernel(taps_ref, w_ref, shift_ref, o_ref):
    """taps_ref : (9, TM, Cin)   f32  -- the 9 (kh,kw) taps of each output pixel
       w_ref    : (9, Cin, Cout) bf16 -- per-tap weights with BN scale folded in
       shift_ref: (1, Cout)      f32  -- BN shift (beta - mean*scale)
       o_ref    : (TM, Cout+Cin) f32  -- cols [0:Cout) conv branch, [Cout:) pool
    """
    kk, tm, cin = taps_ref.shape
    cout = w_ref.shape[2]

    def body(t, carry):
        acc, pmax = carry
        tap = taps_ref[t]                                      # (TM, Cin) f32
        acc = acc + jnp.dot(tap.astype(jnp.bfloat16), w_ref[t],
                            preferred_element_type=jnp.float32)
        pmax = jnp.maximum(pmax, tap)                          # exact f32 max
        return acc, pmax

    acc0 = jnp.zeros((tm, cout), jnp.float32)
    pmax0 = jnp.full((tm, cin), -jnp.inf, jnp.float32)
    acc, pmax = jax.lax.fori_loop(0, kk, body, (acc0, pmax0), unroll=True)

    conv = jnp.maximum(acc + shift_ref[...], 0.0)              # BN shift + ReLU
    o_ref[...] = jnp.concatenate([conv, pmax], axis=-1).astype(o_ref.dtype)


# ---------------------------------------------------------------------------
# Pallas wrapper
# ---------------------------------------------------------------------------
def _pick_tm(m):
    """Largest M tile (full M when small, else a multiple-of-8 divisor <= 512)."""
    if m <= 512:
        return m
    for tm in (512, 256, 128, 64, 32, 16, 8):
        if m % tm == 0:
            return tm
    return m


def mixed5a_fused(taps, w_bf16, shift):
    kk, m, cin = taps.shape
    cout = w_bf16.shape[2]
    tm = _pick_tm(m)
    return pl.pallas_call(
        mixed5a_kernel,
        out_shape=jax.ShapeDtypeStruct((m, cout + cin), jnp.float32),
        grid_spec=pltpu.PrefetchScalarGridSpec(
            num_scalar_prefetch=0,
            grid=(m // tm,),
            in_specs=[
                pl.BlockSpec((kk, tm, cin), lambda i: (0, i, 0)),
                pl.BlockSpec((kk, cin, cout), lambda i: (0, 0, 0)),
                pl.BlockSpec((1, cout), lambda i: (0, 0)),
            ],
            out_specs=pl.BlockSpec((tm, cout + cin), lambda i: (i, 0)),
        ),
        compiler_params=pltpu.CompilerParams(
            dimension_semantics=("parallel",)),
    )(taps, w_bf16, shift)


# ---------------------------------------------------------------------------
# Glue (patch extraction, parameter folding, NCHW <-> NHWC)
# ---------------------------------------------------------------------------
def extract_patches(x_nhwc, ksize, stride):
    """Return (ksize*ksize, N, Ho, Wo, C) of strided (kh,kw) taps."""
    n, h, w, c = x_nhwc.shape
    ho = (h - ksize) // stride + 1
    wo = (w - ksize) // stride + 1
    taps = []
    for di in range(ksize):
        for dj in range(ksize):
            taps.append(
                jax.lax.slice(
                    x_nhwc,
                    (0, di, dj, 0),
                    (n, di + stride * (ho - 1) + 1, dj + stride * (wo - 1) + 1, c),
                    (1, stride, stride, 1),
                ))
    return jnp.stack(taps, axis=0)


def mixed_5a(x_nchw, conv_w, gamma, beta, run_mean, run_var, eps=1e-3):
    n, cin, h, w = x_nchw.shape
    cout, _, kh, kw = conv_w.shape
    stride = 2
    ho = (h - kh) // stride + 1
    wo = (w - kw) // stride + 1
    m = n * ho * wo

    x = jnp.transpose(x_nchw, (0, 2, 3, 1))                           # NHWC
    taps = extract_patches(x, kh, stride).reshape(kh * kw, m, cin)    # (9, M, Cin)

    scale = gamma / jnp.sqrt(run_var + eps)
    shift = (beta - run_mean * scale)[None, :]

    # Per-tap weight matrices with BN scale folded in; bf16 for the MXU.
    w_mat = jnp.transpose(conv_w, (2, 3, 1, 0)).reshape(kh * kw, cin, cout)
    w_mat = (w_mat * scale[None, None, :]).astype(jnp.bfloat16)

    out = mixed5a_fused(taps, w_mat, shift)                           # (M, 384)

    out = out.reshape(n, ho, wo, cout + cin)
    return jnp.transpose(out, (0, 3, 1, 2))                           # NCHW


# ---------------------------------------------------------------------------
def _reference(x_nchw, conv_w, gamma, beta, run_mean, run_var, eps=1e-3):
    y = jax.lax.conv_general_dilated(
        x_nchw, conv_w, window_strides=(2, 2), padding="VALID",
        dimension_numbers=("NCHW", "OIHW", "NCHW"),
        precision=jax.lax.Precision.HIGHEST)
    scale = (gamma / jnp.sqrt(run_var + eps))[None, :, None, None]
    shift = (beta - run_mean * gamma / jnp.sqrt(run_var + eps))[None, :, None, None]
    x0 = jnp.maximum(y * scale + shift, 0.0)
    x1 = jax.lax.reduce_window(
        x_nchw, -jnp.inf, jax.lax.max,
        window_dimensions=(1, 1, 3, 3), window_strides=(1, 1, 2, 2),
        padding="VALID")
    return jnp.concatenate([x0, x1], axis=1)


if __name__ == "__main__":
    key = jax.random.PRNGKey(0)
    # Channels fixed by the module (192 -> 192); small spatial / batch.
    N, Cin, H, W = 2, 192, 17, 17
    Cout, KH, KW = 192, 3, 3

    k1, k2, k3, k4, k5, k6 = jax.random.split(key, 6)
    x = jax.random.normal(k1, (N, Cin, H, W), jnp.float32)
    conv_w = jax.random.normal(k2, (Cout, Cin, KH, KW), jnp.float32) * 0.05
    bn_gamma = 1.0 + 0.1 * jax.random.normal(k3, (Cout,), jnp.float32)
    bn_beta = 0.1 * jax.random.normal(k4, (Cout,), jnp.float32)
    bn_mean = 0.1 * jax.random.normal(k5, (Cout,), jnp.float32)
    bn_var = jax.random.uniform(k6, (Cout,), jnp.float32, minval=0.5, maxval=1.5)

    out = mixed_5a(x, conv_w, bn_gamma, bn_beta, bn_mean, bn_var)
    out = jax.block_until_ready(out)

    assert out.shape == (N, 2 * Cout, (H - 3) // 2 + 1, (W - 3) // 2 + 1), out.shape

    ref = _reference(x, conv_w, bn_gamma, bn_beta, bn_mean, bn_var)
    max_err = float(jnp.max(jnp.abs(out - ref)))
    assert max_err < 5e-2, f"max abs error {max_err}"

    print("KERNEL_OK")
</pallas_src>

<mosaic_0001>
module attributes {stable_mosaic.version = 11 : i64} {
  func.func @mixed5a_kernel(%arg0: i32, %arg1: memref<9x128x192xf32, #tpu.memory_space<vmem>>, %arg2: memref<9x192x192xbf16, #tpu.memory_space<vmem>>, %arg3: memref<1x192xf32, #tpu.memory_space<vmem>>, %arg4: memref<128x384xf32, #tpu.memory_space<vmem>>) attributes {dimension_semantics = [#tpu.dimension_semantics<parallel>], iteration_bounds = array<i64: 1>, scalar_prefetch = 0 : i64, scratch_operands = 0 : i64, tpu.core_type = #tpu.core_type<tc>, window_params = [{transform_indices = @transform_0, window_bounds = array<i64: 9, 128, 192>}, {pipeline_mode = #tpu.pipeline_mode<synchronous>, transform_indices = @transform_1, window_bounds = array<i64: 9, 192, 192>}, {pipeline_mode = #tpu.pipeline_mode<synchronous>, transform_indices = @transform_2, window_bounds = array<i64: 1, 192>}, {transform_indices = @transform_3, window_bounds = array<i64: 128, 384>}]} {
    %cst = arith.constant 0.000000e+00 : f32
    %0 = vector.broadcast %cst : f32 to vector<128x192xf32>
    %cst_0 = arith.constant 0xFF800000 : f32
    %1 = vector.broadcast %cst_0 : f32 to vector<128x192xf32>
    %c0_i32 = arith.constant 0 : i32
    %2 = arith.index_cast %c0_i32 : i32 to index
    %c0 = arith.constant 0 : index
    %c0_1 = arith.constant 0 : index
    %3 = vector.load %arg1[%2, %c0, %c0_1] : memref<9x128x192xf32, #tpu.memory_space<vmem>>, vector<1x128x192xf32>
    %4 = vector.shape_cast %3 : vector<1x128x192xf32> to vector<128x192xf32>
    %5 = arith.truncf %4 : vector<128x192xf32> to vector<128x192xbf16>
    %6 = arith.index_cast %c0_i32 : i32 to index
    %c0_2 = arith.constant 0 : index
    %c0_3 = arith.constant 0 : index
    %7 = vector.load %arg2[%6, %c0_2, %c0_3] : memref<9x192x192xbf16, #tpu.memory_space<vmem>>, vector<1x192x192xbf16>
    %8 = vector.shape_cast %7 : vector<1x192x192xbf16> to vector<192x192xbf16>
    %cst_4 = arith.constant dense<0.000000e+00> : vector<128x192xf32>
    %9 = tpu.matmul %5, %8, %cst_4 {dimension_numbers = #tpu.dot_dimension_numbers<[1], [0], [0], [1], [0, 0, 1, 1], [], []>} : vector<128x192xbf16>, vector<192x192xbf16>, vector<128x192xf32> -> vector<128x192xf32>
    %10 = arith.addf %0, %9 : vector<128x192xf32>
    %11 = arith.maximumf %1, %4 : vector<128x192xf32>
    %c1_i32 = arith.constant 1 : i32
    %12 = arith.index_cast %c1_i32 : i32 to index
    %c0_5 = arith.constant 0 : index
    %c0_6 = arith.constant 0 : index
    %13 = vector.load %arg1[%12, %c0_5, %c0_6] : memref<9x128x192xf32, #tpu.memory_space<vmem>>, vector<1x128x192xf32>
    %14 = vector.shape_cast %13 : vector<1x128x192xf32> to vector<128x192xf32>
    %15 = arith.truncf %14 : vector<128x192xf32> to vector<128x192xbf16>
    %16 = arith.index_cast %c1_i32 : i32 to index
    %c0_7 = arith.constant 0 : index
    %c0_8 = arith.constant 0 : index
    %17 = vector.load %arg2[%16, %c0_7, %c0_8] : memref<9x192x192xbf16, #tpu.memory_space<vmem>>, vector<1x192x192xbf16>
    %18 = vector.shape_cast %17 : vector<1x192x192xbf16> to vector<192x192xbf16>
    %cst_9 = arith.constant dense<0.000000e+00> : vector<128x192xf32>
    %19 = tpu.matmul %15, %18, %cst_9 {dimension_numbers = #tpu.dot_dimension_numbers<[1], [0], [0], [1], [0, 0, 1, 1], [], []>} : vector<128x192xbf16>, vector<192x192xbf16>, vector<128x192xf32> -> vector<128x192xf32>
    %20 = arith.addf %10, %19 : vector<128x192xf32>
    %21 = arith.maximumf %11, %14 : vector<128x192xf32>
    %c2_i32 = arith.constant 2 : i32
    %22 = arith.index_cast %c2_i32 : i32 to index
    %c0_10 = arith.constant 0 : index
    %c0_11 = arith.constant 0 : index
    %23 = vector.load %arg1[%22, %c0_10, %c0_11] : memref<9x128x192xf32, #tpu.memory_space<vmem>>, vector<1x128x192xf32>
    %24 = vector.shape_cast %23 : vector<1x128x192xf32> to vector<128x192xf32>
    %25 = arith.truncf %24 : vector<128x192xf32> to vector<128x192xbf16>
    %26 = arith.index_cast %c2_i32 : i32 to index
    %c0_12 = arith.constant 0 : index
    %c0_13 = arith.constant 0 : index
    %27 = vector.load %arg2[%26, %c0_12, %c0_13] : memref<9x192x192xbf16, #tpu.memory_space<vmem>>, vector<1x192x192xbf16>
    %28 = vector.shape_cast %27 : vector<1x192x192xbf16> to vector<192x192xbf16>
    %cst_14 = arith.constant dense<0.000000e+00> : vector<128x192xf32>
    %29 = tpu.matmul %25, %28, %cst_14 {dimension_numbers = #tpu.dot_dimension_numbers<[1], [0], [0], [1], [0, 0, 1, 1], [], []>} : vector<128x192xbf16>, vector<192x192xbf16>, vector<128x192xf32> -> vector<128x192xf32>
    %30 = arith.addf %20, %29 : vector<128x192xf32>
    %31 = arith.maximumf %21, %24 : vector<128x192xf32>
    %c3_i32 = arith.constant 3 : i32
    %32 = arith.index_cast %c3_i32 : i32 to index
    %c0_15 = arith.constant 0 : index
    %c0_16 = arith.constant 0 : index
    %33 = vector.load %arg1[%32, %c0_15, %c0_16] : memref<9x128x192xf32, #tpu.memory_space<vmem>>, vector<1x128x192xf32>
    %34 = vector.shape_cast %33 : vector<1x128x192xf32> to vector<128x192xf32>
    %35 = arith.truncf %34 : vector<128x192xf32> to vector<128x192xbf16>
    %36 = arith.index_cast %c3_i32 : i32 to index
    %c0_17 = arith.constant 0 : index
    %c0_18 = arith.constant 0 : index
    %37 = vector.load %arg2[%36, %c0_17, %c0_18] : memref<9x192x192xbf16, #tpu.memory_space<vmem>>, vector<1x192x192xbf16>
    %38 = vector.shape_cast %37 : vector<1x192x192xbf16> to vector<192x192xbf16>
    %cst_19 = arith.constant dense<0.000000e+00> : vector<128x192xf32>
    %39 = tpu.matmul %35, %38, %cst_19 {dimension_numbers = #tpu.dot_dimension_numbers<[1], [0], [0], [1], [0, 0, 1, 1], [], []>} : vector<128x192xbf16>, vector<192x192xbf16>, vector<128x192xf32> -> vector<128x192xf32>
    %40 = arith.addf %30, %39 : vector<128x192xf32>
    %41 = arith.maximumf %31, %34 : vector<128x192xf32>
    %c4_i32 = arith.constant 4 : i32
    %42 = arith.index_cast %c4_i32 : i32 to index
    %c0_20 = arith.constant 0 : index
    %c0_21 = arith.constant 0 : index
    %43 = vector.load %arg1[%42, %c0_20, %c0_21] : memref<9x128x192xf32, #tpu.memory_space<vmem>>, vector<1x128x192xf32>
    %44 = vector.shape_cast %43 : vector<1x128x192xf32> to vector<128x192xf32>
    %45 = arith.truncf %44 : vector<128x192xf32> to vector<128x192xbf16>
    %46 = arith.index_cast %c4_i32 : i32 to index
    %c0_22 = arith.constant 0 : index
    %c0_23 = arith.constant 0 : index
    %47 = vector.load %arg2[%46, %c0_22, %c0_23] : memref<9x192x192xbf16, #tpu.memory_space<vmem>>, vector<1x192x192xbf16>
    %48 = vector.shape_cast %47 : vector<1x192x192xbf16> to vector<192x192xbf16>
    %cst_24 = arith.constant dense<0.000000e+00> : vector<128x192xf32>
    %49 = tpu.matmul %45, %48, %cst_24 {dimension_numbers = #tpu.dot_dimension_numbers<[1], [0], [0], [1], [0, 0, 1, 1], [], []>} : vector<128x192xbf16>, vector<192x192xbf16>, vector<128x192xf32> -> vector<128x192xf32>
    %50 = arith.addf %40, %49 : vector<128x192xf32>
    %51 = arith.maximumf %41, %44 : vector<128x192xf32>
    %c5_i32 = arith.constant 5 : i32
    %52 = arith.index_cast %c5_i32 : i32 to index
    %c0_25 = arith.constant 0 : index
    %c0_26 = arith.constant 0 : index
    %53 = vector.load %arg1[%52, %c0_25, %c0_26] : memref<9x128x192xf32, #tpu.memory_space<vmem>>, vector<1x128x192xf32>
    %54 = vector.shape_cast %53 : vector<1x128x192xf32> to vector<128x192xf32>
    %55 = arith.truncf %54 : vector<128x192xf32> to vector<128x192xbf16>
    %56 = arith.index_cast %c5_i32 : i32 to index
    %c0_27 = arith.constant 0 : index
    %c0_28 = arith.constant 0 : index
    %57 = vector.load %arg2[%56, %c0_27, %c0_28] : memref<9x192x192xbf16, #tpu.memory_space<vmem>>, vector<1x192x192xbf16>
    %58 = vector.shape_cast %57 : vector<1x192x192xbf16> to vector<192x192xbf16>
    %cst_29 = arith.constant dense<0.000000e+00> : vector<128x192xf32>
    %59 = tpu.matmul %55, %58, %cst_29 {dimension_numbers = #tpu.dot_dimension_numbers<[1], [0], [0], [1], [0, 0, 1, 1], [], []>} : vector<128x192xbf16>, vector<192x192xbf16>, vector<128x192xf32> -> vector<128x192xf32>
    %60 = arith.addf %50, %59 : vector<128x192xf32>
    %61 = arith.maximumf %51, %54 : vector<128x192xf32>
    %c6_i32 = arith.constant 6 : i32
    %62 = arith.index_cast %c6_i32 : i32 to index
    %c0_30 = arith.constant 0 : index
    %c0_31 = arith.constant 0 : index
    %63 = vector.load %arg1[%62, %c0_30, %c0_31] : memref<9x128x192xf32, #tpu.memory_space<vmem>>, vector<1x128x192xf32>
    %64 = vector.shape_cast %63 : vector<1x128x192xf32> to vector<128x192xf32>
    %65 = arith.truncf %64 : vector<128x192xf32> to vector<128x192xbf16>
    %66 = arith.index_cast %c6_i32 : i32 to index
    %c0_32 = arith.constant 0 : index
    %c0_33 = arith.constant 0 : index
    %67 = vector.load %arg2[%66, %c0_32, %c0_33] : memref<9x192x192xbf16, #tpu.memory_space<vmem>>, vector<1x192x192xbf16>
    %68 = vector.shape_cast %67 : vector<1x192x192xbf16> to vector<192x192xbf16>
    %cst_34 = arith.constant dense<0.000000e+00> : vector<128x192xf32>
    %69 = tpu.matmul %65, %68, %cst_34 {dimension_numbers = #tpu.dot_dimension_numbers<[1], [0], [0], [1], [0, 0, 1, 1], [], []>} : vector<128x192xbf16>, vector<192x192xbf16>, vector<128x192xf32> -> vector<128x192xf32>
    %70 = arith.addf %60, %69 : vector<128x192xf32>
    %71 = arith.maximumf %61, %64 : vector<128x192xf32>
    %c7_i32 = arith.constant 7 : i32
    %72 = arith.index_cast %c7_i32 : i32 to index
    %c0_35 = arith.constant 0 : index
    %c0_36 = arith.constant 0 : index
    %73 = vector.load %arg1[%72, %c0_35, %c0_36] : memref<9x128x192xf32, #tpu.memory_space<vmem>>, vector<1x128x192xf32>
    %74 = vector.shape_cast %73 : vector<1x128x192xf32> to vector<128x192xf32>
    %75 = arith.truncf %74 : vector<128x192xf32> to vector<128x192xbf16>
    %76 = arith.index_cast %c7_i32 : i32 to index
    %c0_37 = arith.constant 0 : index
    %c0_38 = arith.constant 0 : index
    %77 = vector.load %arg2[%76, %c0_37, %c0_38] : memref<9x192x192xbf16, #tpu.memory_space<vmem>>, vector<1x192x192xbf16>
    %78 = vector.shape_cast %77 : vector<1x192x192xbf16> to vector<192x192xbf16>
    %cst_39 = arith.constant dense<0.000000e+00> : vector<128x192xf32>
    %79 = tpu.matmul %75, %78, %cst_39 {dimension_numbers = #tpu.dot_dimension_numbers<[1], [0], [0], [1], [0, 0, 1, 1], [], []>} : vector<128x192xbf16>, vector<192x192xbf16>, vector<128x192xf32> -> vector<128x192xf32>
    %80 = arith.addf %70, %79 : vector<128x192xf32>
    %81 = arith.maximumf %71, %74 : vector<128x192xf32>
    %c8_i32 = arith.constant 8 : i32
    %82 = arith.index_cast %c8_i32 : i32 to index
    %c0_40 = arith.constant 0 : index
    %c0_41 = arith.constant 0 : index
    %83 = vector.load %arg1[%82, %c0_40, %c0_41] : memref<9x128x192xf32, #tpu.memory_space<vmem>>, vector<1x128x192xf32>
    %84 = vector.shape_cast %83 : vector<1x128x192xf32> to vector<128x192xf32>
    %85 = arith.truncf %84 : vector<128x192xf32> to vector<128x192xbf16>
    %86 = arith.index_cast %c8_i32 : i32 to index
    %c0_42 = arith.constant 0 : index
    %c0_43 = arith.constant 0 : index
    %87 = vector.load %arg2[%86, %c0_42, %c0_43] : memref<9x192x192xbf16, #tpu.memory_space<vmem>>, vector<1x192x192xbf16>
    %88 = vector.shape_cast %87 : vector<1x192x192xbf16> to vector<192x192xbf16>
    %cst_44 = arith.constant dense<0.000000e+00> : vector<128x192xf32>
    %89 = tpu.matmul %85, %88, %cst_44 {dimension_numbers = #tpu.dot_dimension_numbers<[1], [0], [0], [1], [0, 0, 1, 1], [], []>} : vector<128x192xbf16>, vector<192x192xbf16>, vector<128x192xf32> -> vector<128x192xf32>
    %90 = arith.addf %80, %89 : vector<128x192xf32>
    %91 = arith.maximumf %81, %84 : vector<128x192xf32>
    %c9_i32 = arith.constant 9 : i32
    %c0_45 = arith.constant 0 : index
    %c0_46 = arith.constant 0 : index
    %92 = vector.load %arg3[%c0_45, %c0_46] : memref<1x192xf32, #tpu.memory_space<vmem>>, vector<1x192xf32>
    %93 = vector.broadcast %92 : vector<1x192xf32> to vector<128x192xf32>
    %94 = arith.addf %90, %93 : vector<128x192xf32>
    %cst_47 = arith.constant 0.000000e+00 : f32
    %95 = vector.broadcast %cst_47 : f32 to vector<128x192xf32>
    %96 = arith.maximumf %94, %95 : vector<128x192xf32>
    %97 = tpu.concatenate %96, %91 in 1 : vector<128x192xf32>, vector<128x192xf32> -> vector<128x384xf32>
    %c0_48 = arith.constant 0 : index
    %c0_49 = arith.constant 0 : index
    %98 = vector.load %arg4[%c0_48, %c0_49] : memref<128x384xf32, #tpu.memory_space<vmem>>, vector<128x384xf32>
    tpu.vector_store %arg4[%c0_48, %c0_49], %97 {strides = array<i32>} : memref<128x384xf32, #tpu.memory_space<vmem>>, vector<128x384xf32>,
    return
  }
  func.func @transform_0(%arg0: i32) -> (i32, i32, i32) {
    %c0_i32 = arith.constant 0 : i32
    %c0_i32_0 = arith.constant 0 : i32
    %c0_i32_1 = arith.constant 0 : i32
    return %c0_i32, %arg0, %c0_i32_0 : i32, i32, i32
  }
  func.func @transform_1(%arg0: i32) -> (i32, i32, i32) {
    %c0_i32 = arith.constant 0 : i32
    %c0_i32_0 = arith.constant 0 : i32
    %c0_i32_1 = arith.constant 0 : i32
    %c0_i32_2 = arith.constant 0 : i32
    return %c0_i32, %c0_i32_0, %c0_i32_1 : i32, i32, i32
  }
  func.func @transform_2(%arg0: i32) -> (i32, i32) {
    %c0_i32 = arith.constant 0 : i32
    %c0_i32_0 = arith.constant 0 : i32
    %c0_i32_1 = arith.constant 0 : i32
    return %c0_i32, %c0_i32_0 : i32, i32
  }
  func.func @transform_3(%arg0: i32) -> (i32, i32) {
    %c0_i32 = arith.constant 0 : i32
    %c0_i32_0 = arith.constant 0 : i32
    return %arg0, %c0_i32 : i32, i32
  }
}

</mosaic_0001>

<bundles_post_ra>
// kernel: tpu_custom_call.1
= control target key start
LH: loop header
LB: loop body
LE: loop exit
PB: predicated region body
PF: predicated region fallthrough
CT: control target
= control target key end

     0   :  { %vm282_vm0 = vcmask 523264   ;;  %s5157_s20 = smov 64   ;;  %s8439_s0 = inlined_call_operand.vmem [shape: f32[9,128,192], index: 0, kind: input, shape index: {}]   ;;  %s8440_s1 = inlined_call_operand.vmem [shape: bf16[9,192,192], index: 1, kind: input, shape index: {}]   ;;  %s8441_s2 = inlined_call_operand.vmem [shape: f32[1,192], index: 2, kind: input, shape index: {}]   ;;  %s8442_s3 = inlined_call_operand.hbm [shape: f32[128,384], index: 3, kind: output, shape index: {}]  }
   0x1   :  { %v4794_v0 = vld [vmem:[%s8440_s1 + $0xc4] ss:$8 sps:$4 sm:$0xff]   ;;  %v4798_v2 = vld [vmem:[%s8440_s1 + $0xc0] ss:$8 sps:$4 sm:$0xff]   ;;  %v4800_v4 = vld [vmem:[%s8440_s1 + $0xd4] ss:$8 sps:$4 sm:$0xff]  }
   0x2   :  { %v4796_v1 = vld [vmem:[%s8440_s1 + $0x304] ss:$8 sps:$4 sm:$0xff]   ;;  %307 = vmatprep.subr.bf16.mxu1 %v4794_v0  ;;  %v4799_v3 = vld [vmem:[%s8440_s1 + $0x300] ss:$8 sps:$4 sm:$0xff]   ;;  %v4802_v5 = vld [vmem:[%s8440_s1 + $0x314] ss:$8 sps:$4 sm:$0xff]  }
   0x3   :  { %1717 = vmatprep.subr.bf16.mxu0 %v4796_v1  ;;  %308 = vmatpush1.bf16.msra.mxu1 %v4798_v2  ;;  %v4804_v6 = vld [vmem:[%s8440_s1 + $0xd0] ss:$8 sps:$4 sm:$0xff]   ;;  %v4806_v8 = vld [vmem:[%s8440_s1 + $0xe4] ss:$8 sps:$4 sm:$0xff]   ;;  %v4810_v10 = vld [vmem:[%s8440_s1 + $0xe0] ss:$8 sps:$4 sm:$0xff]  }
   0x4   :  { %1718 = vmatpush1.bf16.msra.mxu0 %v4799_v3  ;;  %309 = vmatprep.subr.bf16.mxu1 %v4800_v4  ;;  %v4805_v7 = vld [vmem:[%s8440_s1 + $0x310] ss:$8 sps:$4 sm:$0xff]   ;;  %v4808_v9 = vld [vmem:[%s8440_s1 + $0x324] ss:$8 sps:$4 sm:$0xff]   ;;  %v4811_v11 = vld [vmem:[%s8440_s1 + $0x320] ss:$8 sps:$4 sm:$0xff]  }
   0x5   :  { %1719 = vmatprep.subr.bf16.mxu0 %v4802_v5  ;;  %v4812_v12 = vld [vmem:[%s8440_s1 + $0xf4] ss:$8 sps:$4 sm:$0xff]   ;;  %v4816_v14 = vld [vmem:[%s8440_s1 + $0xf0] ss:$8 sps:$4 sm:$0xff]   ;;  %v4818_v16 = vld [vmem:[%s8440_s1 + $0x104] ss:$8 sps:$4 sm:$0xff]  }
   0x6   :  { %v4814_v13 = vld [vmem:[%s8440_s1 + $0x334] ss:$8 sps:$4 sm:$0xff]   ;;  %v4817_v15 = vld [vmem:[%s8440_s1 + $0x330] ss:$8 sps:$4 sm:$0xff]   ;;  %v4820_v17 = vld [vmem:[%s8440_s1 + $0x344] ss:$8 sps:$4 sm:$0xff]  }
   0x7   :  { %310 = vmatpush1.bf16.msra.mxu1 %v4804_v6  ;;  %v4822_v18 = vld [vmem:[%s8440_s1 + $0x100] ss:$8 sps:$4 sm:$0xff]   ;;  %v4824_v20 = vld [vmem:[%s8440_s1 + $0x114] ss:$8 sps:$4 sm:$0xff]   ;;  %v4828_v22 = vld [vmem:[%s8440_s1 + $0x110] ss:$8 sps:$4 sm:$0xff]  }
   0x8   :  { %1720 = vmatpush1.bf16.msra.mxu0 %v4805_v7  ;;  %311 = vmatprep.subr.bf16.mxu1 %v4806_v8  ;;  %v4823_v19 = vld [vmem:[%s8440_s1 + $0x340] ss:$8 sps:$4 sm:$0xff]   ;;  %v4826_v21 = vld [vmem:[%s8440_s1 + $0x354] ss:$8 sps:$4 sm:$0xff]   ;;  %v4829_v23 = vld [vmem:[%s8440_s1 + $0x350] ss:$8 sps:$4 sm:$0xff]  }
   0x9   :  { %1721 = vmatprep.subr.bf16.mxu0 %v4808_v9  ;;  %v4830_v24 = vld [vmem:[%s8440_s1 + $0x124] ss:$8 sps:$4 sm:$0xff]   ;;  %v4834_v26 = vld [vmem:[%s8440_s1 + $0x120] ss:$8 sps:$4 sm:$0xff]   ;;  %v4836_v28 = vld [vmem:[%s8440_s1 + $0x134] ss:$8 sps:$4 sm:$0xff]  }
   0xa   :  { %v4832_v25 = vld [vmem:[%s8440_s1 + $0x364] ss:$8 sps:$4 sm:$0xff]   ;;  %v4835_v27 = vld [vmem:[%s8440_s1 + $0x360] ss:$8 sps:$4 sm:$0xff]   ;;  %v4838_v29 = vld [vmem:[%s8440_s1 + $0x374] ss:$8 sps:$4 sm:$0xff]  }
   0xb   :  { %312 = vmatpush1.bf16.msra.mxu1 %v4810_v10  ;;  %v4840_v30 = vld [vmem:[%s8440_s1 + $0x130] ss:$8 sps:$4 sm:$0xff]   ;;  %v4842_v32 = vld [vmem:[%s8440_s1 + $0x144] ss:$8 sps:$4 sm:$0xff]   ;;  %v4846_v34 = vld [vmem:[%s8440_s1 + $0x140] ss:$8 sps:$4 sm:$0xff]  }
   0xc   :  { %1722 = vmatpush1.bf16.msra.mxu0 %v4811_v11  ;;  %313 = vmatprep.subr.bf16.mxu1 %v4812_v12  ;;  %v4841_v31 = vld [vmem:[%s8440_s1 + $0x370] ss:$8 sps:$4 sm:$0xff]   ;;  %v4844_v33 = vld [vmem:[%s8440_s1 + $0x384] ss:$8 sps:$4 sm:$0xff]   ;;  %v4847_v35 = vld [vmem:[%s8440_s1 + $0x380] ss:$8 sps:$4 sm:$0xff]  }
   0xd   :  { %1723 = vmatprep.subr.bf16.mxu0 %v4814_v13  ;;  %v4848_v36 = vld [vmem:[%s8440_s1 + $0x154] ss:$8 sps:$4 sm:$0xff]   ;;  %v5295_v37 = vld [vmem:[%s8439_s0 + $0x8] sm:$0xff]  ;;  %v4852_v43 = vld [vmem:[%s8440_s1 + $0x150] ss:$8 sps:$4 sm:$0xff]  }
   0xe   :  { %v3775_v38 = vld [vmem:[%s8439_s0 + $0x108] sm:$0xff]  ;;  %v4850_v39 = vld [vmem:[%s8440_s1 + $0x394] ss:$8 sps:$4 sm:$0xff]   ;;  %v4853_v48 = vld [vmem:[%s8440_s1 + $0x390] ss:$8 sps:$4 sm:$0xff]  }
   0xf   :  { %314 = vmatpush1.bf16.msra.mxu1 %v4816_v14  ;;  %v5306_v40 = vld [vmem:[%s8439_s0 + $0x18] sm:$0xff]  ;;  %v678_v42 = vmax.f32 %v5295_v37, %v3775_v38  ;;  %v3895_v46 = vld [vmem:[%s8439_s0 + $0x208] sm:$0xff]  ;;  %v5346_v59 = vld [vmem:[%s8439_s0] sm:$0xff] }
  0x10   :  { %1724 = vmatpush1.bf16.msra.mxu0 %v4817_v15  ;;  %315 = vmatprep.subr.bf16.mxu1 %v4818_v16  ;;  %v3777_v41 = vld [vmem:[%s8439_s0 + $0x118] sm:$0xff]  ;;  %v4071_v47 = vld [vmem:[%s8439_s0 + $0x408] sm:$0xff]  ;;  %v5351_v60 = vld [vmem:[%s8439_s0 + $0x10] sm:$0xff] }
  0x11   :  { %1725 = vmatprep.subr.bf16.mxu0 %v4820_v17  ;;  %v122_v44 = vpack.c.bf16 %v3777_v41, %v3775_v38  ;;  %v680_v45 = vmax.f32 %v5306_v40, %v3777_v41  ;;  %v3897_v49 = vld [vmem:[%s8439_s0 + $0x218] sm:$0xff]  ;;  %v1073_v50 = vmax.f32 %v678_v42, %v3895_v46  ;;  %v4854_v52 = vld [vmem:[%s8440_s1 + $0x164] ss:$8 sps:$4 sm:$0xff]   ;;  %v4858_v61 = vld [vmem:[%s8440_s1 + $0x160] ss:$8 sps:$4 sm:$0xff]  }
  0x12   :  { %v4073_v51 = vld [vmem:[%s8439_s0 + $0x418] sm:$0xff]  ;;  %v4856_v53 = vld [vmem:[%s8440_s1 + $0x3a4] ss:$8 sps:$4 sm:$0xff]   ;;  %v4859_v62 = vld [vmem:[%s8440_s1 + $0x3a0] ss:$8 sps:$4 sm:$0xff]  }
  0x13   :  { %316 = vmatpush1.bf16.msra.mxu1 %v4822_v18  ;;  %v1075_v54 = vmax.f32 %v680_v45, %v3897_v49  ;;  %v3983_v55 = vld [vmem:[%s8439_s0 + $0x308] sm:$0xff]  ;;  %v1533_v56 = vpack.c.bf16 %v4073_v51, %v4071_v47  ;;  %v3985_v57 = vld [vmem:[%s8439_s0 + $0x318] sm:$0xff]  ;;  %3854 = vmatprep.mubr.msk.bf16.mxu1 %vm282_vm0, %v122_v44  ;;  %v3774_v0 = vld [vmem:[%s8439_s0 + $0x100] sm:$0xff] }
  0x14   :  { %1726 = vmatpush1.bf16.msra.mxu0 %v4823_v19  ;;  %317 = vmatprep.subr.bf16.mxu1 %v4824_v20  ;;  %v1468_v58 = vmax.f32 %v1073_v50, %v3983_v55  ;;  %v3776_v1 = vld [vmem:[%s8439_s0 + $0x110] sm:$0xff]  ;;  %v677_v5 = vmax.f32 %v5346_v59, %v3774_v0  ;;  %v5380_v8 = vld [vmem:[%s8439_s0 + $0x508] sm:$0xff]  ;;  %v3894_v9 = vld [vmem:[%s8439_s0 + $0x200] sm:$0xff] }
  0x15   :  { %1727 = vmatprep.subr.bf16.mxu0 %v4826_v21  ;;  %v1470_v63 = vmax.f32 %v1075_v54, %v3985_v57  ;;  %4150 = vmatprep.mubr.msk.bf16.mxu0 %vm282_vm0, %v1533_v56  ;;  %v4860_v2 = vld [vmem:[%s8440_s1 + $0x174] ss:$8 sps:$4 sm:$0xff]   ;;  %v679_v6 = vmax.f32 %v5351_v60, %v3776_v1  ;;  %8517 = vst [vmem:[#allocation6_spill] sm:$0xff] %v5380_v8  ;;  %v4864_v15 = vld [vmem:[%s8440_s1 + $0x170] ss:$8 sps:$4 sm:$0xff]   ;;  %v3982_v18 = vld [vmem:[%s8439_s0 + $0x300] sm:$0xff] }
  0x16   :  { %v4862_v3 = vld [vmem:[%s8440_s1 + $0x3b4] ss:$8 sps:$4 sm:$0xff]   ;;  %v5373_v4 = vmax.f32 %v1468_v58, %v4071_v47  ;;  %v1072_v13 = vmax.f32 %v677_v5, %v3894_v9  ;;  %v4865_v16 = vld [vmem:[%s8440_s1 + $0x3b0] ss:$8 sps:$4 sm:$0xff]   ;;  %v4869_v38 = vld [vmem:[%s8440_s1 + $0x3c0] ss:$8 sps:$4 sm:$0xff]  }
  0x17   :  { %318 = vmatpush1.bf16.msra.mxu1 %v4828_v22  ;;  %v1865_v7 = vmax.f32 %v1470_v63, %v4073_v51  ;;  %v3896_v10 = vld [vmem:[%s8439_s0 + $0x210] sm:$0xff]  ;;  %v5391_v11 = vld [vmem:[%s8439_s0 + $0x518] sm:$0xff]  ;;  %v5490_v51 = vld [vmem:[%s8439_s0 + $0x148] sm:$0xff] }
  0x18   :  { %1728 = vmatpush1.bf16.msra.mxu0 %v4829_v23  ;;  %319 = vmatprep.subr.bf16.mxu1 %v4830_v24  ;;  %8516 = vst [vmem:[#allocation5_spill] sm:$0xff] %v5373_v4  ;;  %v1074_v14 = vmax.f32 %v679_v6, %v3896_v10  ;;  %v3984_v19 = vld [vmem:[%s8439_s0 + $0x310] sm:$0xff]  ;;  %v4249_v20 = vld [vmem:[%s8439_s0 + $0x618] sm:$0xff]  ;;  %v1467_v21 = vmax.f32 %v1072_v13, %v3982_v18  ;;  %v4070_v23 = vld [vmem:[%s8439_s0 + $0x400] sm:$0xff] }
  0x19   :  { %1729 = vmatprep.subr.bf16.mxu0 %v4832_v25  ;;  %v2260_v17 = vmax.f32 %v1865_v7, %v5391_v11  ;;  %v4072_v25 = vld [vmem:[%s8439_s0 + $0x410] sm:$0xff]  ;;  %v5505_v54 = vld [vmem:[%s8439_s0 + $0x458] sm:$0xff]  ;;  %v5510_v55 = vld [vmem:[%s8439_s0 + $0x120] sm:$0xff] }
  0x1a   :  { %v1469_v22 = vmax.f32 %v1074_v14, %v3984_v19  ;;  %v5462_v42 = vld [vmem:[%s8439_s0 + $0x130] sm:$0xff]  ;;  %8521 = vst [vmem:[#allocation10_spill] sm:$0xff] %v5510_v55  ;;  %v4074_v56 = vld [vmem:[%s8439_s0 + $0x420] sm:$0xff]  ;;  %v5575_v18 = vld [vmem:[%s8439_s0 + $0x168] sm:$0xff] }
  0x1b   :  { %320 = vmatpush1.bf16.msra.mxu1 %v4834_v26  ;;  %v5414_v24 = vmax.f32 %v2260_v17, %v4249_v20  ;;  %v4868_v26 = vld [vmem:[%s8440_s1 + $0x4] ss:$8 sps:$4 sm:$0xff]   ;;  %v4874_v44 = vld [vmem:[%s8440_s1 + $0x14] ss:$8 sps:$4 sm:$0xff]   ;;  %v4872_v47 = vld [vmem:[%s8440_s1 + $0x10] ss:$8 sps:$4 sm:$0xff]  }
  0x1c   :  { %1730 = vmatpush1.bf16.msra.mxu0 %v4835_v27  ;;  %321 = vmatprep.subr.bf16.mxu1 %v4836_v28  ;;  %v5422_v27 = vmax.f32 %v1467_v21, %v4070_v23  ;;  %v5424_v28 = vmax.f32 %v1469_v22, %v4072_v25  ;;  %v4877_v46 = vld [vmem:[%s8440_s1 + $0x3d4] ss:$8 sps:$4 sm:$0xff]   ;;  %v4881_v6 = vld [vmem:[%s8440_s1 + $0x3e0] ss:$8 sps:$4 sm:$0xff]   ;;  %v4884_v14 = vld [vmem:[%s8440_s1 + $0x30] ss:$8 sps:$4 sm:$0xff]  }
  0x1d   :  { %1731 = vmatprep.subr.bf16.mxu0 %v4838_v29  ;;  %8518 = vst [vmem:[#allocation7_spill] sm:$0xff] %v5414_v24  ;;  %v4871_v29 = vld [vmem:[%s8440_s1 + $0x3c4] ss:$8 sps:$4 sm:$0xff]   ;;  %v5530_v63 = vld [vmem:[%s8439_s0 + $0x150] sm:$0xff]  ;;  %v5586_v21 = vld [vmem:[%s8439_s0 + $0x178] sm:$0xff] }
  0x1e   :  { %8519 = vst [vmem:[#allocation8_spill] sm:$0xff] %v5422_v27  ;;  %8520 = vst [vmem:[#allocation9_spill] sm:$0xff] %v5424_v28  ;;  %v4886_v10 = vld [vmem:[%s8440_s1 + $0x34] ss:$8 sps:$4 sm:$0xff]   ;;  %v5558_v13 = vld [vmem:[%s8439_s0 + $0x140] sm:$0xff] }
  0x1f   :  { %322 = vmatpush1.bf16.msra.mxu1 %v4840_v30  ;;  %v5432_v30 = vld [vmem:[%s8439_s0 + $0x128] sm:$0xff]  ;;  %8522 = vst [vmem:[#allocation11_spill] sm:$0xff] %v5558_v13  ;;  %v4889_v17 = vld [vmem:[%s8440_s1 + $0x3f4] ss:$8 sps:$4 sm:$0xff]   ;;  %v4908_v5 = vld [vmem:[%s8440_s1 + $0x70] ss:$8 sps:$4 sm:$0xff]  }
  0x20   :  { %1732 = vmatpush1.bf16.msra.mxu0 %v4841_v31  ;;  %323 = vmatprep.subr.bf16.mxu1 %v4842_v32  ;;  %v4866_v31 = vld [vmem:[%s8440_s1] ss:$8 sps:$4 sm:$0xff]   ;;  %v5440_v32 = vld [vmem:[%s8439_s0 + $0x138] sm:$0xff]  ;;  %v4892_v19 = vld [vmem:[%s8440_s1 + $0x44] ss:$8 sps:$4 sm:$0xff]  }
  0x21   :  { %1733 = vmatprep.subr.bf16.mxu0 %v4844_v33  ;;  %v5445_v33 = vld [vmem:[%s8439_s0 + $0x428] sm:$0xff]  ;;  %v124_v49 = vpack.c.bf16 %v5440_v32, %v5432_v30  ;;  %v4911_v58 = vld [vmem:[%s8440_s1 + $0x430] ss:$8 sps:$4 sm:$0xff]   ;;  %v5832_v24 = vld [vmem:[%s8439_s0 + $0x1c0] sm:$0xff] }
  0x22   :  { %v4895_v20 = vld [vmem:[%s8440_s1 + $0x404] ss:$8 sps:$4 sm:$0xff]   ;;  %v5837_v4 = vld [vmem:[%s8439_s0 + $0x1d0] sm:$0xff] }
  0x23   :  { %324 = vmatpush1.bf16.msra.mxu1 %v4846_v34  ;;  %v5450_v34 = vld [vmem:[%s8439_s0 + $0x438] sm:$0xff]  ;;  %v5591_v22 = vld [vmem:[%s8439_s0 + $0x468] sm:$0xff]  ;;  %v5842_v45 = vld [vmem:[%s8439_s0 + $0x4c0] sm:$0xff] }
  0x24   :  { %1734 = vmatpush1.bf16.msra.mxu0 %v4847_v35  ;;  %325 = vmatprep.subr.bf16.mxu1 %v4848_v36  ;;  %v121_v35 = vpack.c.bf16 %v3776_v1, %v3774_v0  ;;  %v1532_v36 = vpack.c.bf16 %v4072_v25, %v4070_v23  ;;  %v1535_v50 = vpack.c.bf16 %v5450_v34, %v5445_v33  ;;  %v5535_v0 = vld [vmem:[%s8439_s0 + $0x450] sm:$0xff]  ;;  %v5596_v23 = vld [vmem:[%s8439_s0 + $0x478] sm:$0xff] }
  0x25   :  { %1735 = vmatprep.subr.bf16.mxu0 %v4850_v39  ;;  %v123_v1 = vpack.c.bf16 %v5462_v42, %v5510_v55  ;;  %v5759_v25 = vld [vmem:[%s8439_s0 + $0x1b0] sm:$0xff] }
  0x26   :  { %8528 = vst [vmem:[#allocation17_spill] sm:$0xff] %v5759_v25  ;;  %v5849_v27 = vld [vmem:[%s8439_s0 + $0x4d0] sm:$0xff] }
  0x27   :  { %326 = vmatpush1.bf16.msra.mxu1 %v4852_v43  ;;  %v5467_v43 = vld [vmem:[%s8439_s0 + $0x430] sm:$0xff] }
  0x28   :  { %1736 = vmatpush1.bf16.msra.mxu0 %v4853_v48  ;;  %327 = vmatprep.subr.bf16.mxu1 %v4854_v52  ;;  %v4875_v48 = vld [vmem:[%s8440_s1 + $0x3d0] ss:$8 sps:$4 sm:$0xff]   ;;  %v4922_v28 = vld [vmem:[%s8440_s1 + $0x94] ss:$8 sps:$4 sm:$0xff]  }
  0x29   :  { %1737 = vmatprep.subr.bf16.mxu0 %v4856_v53  ;;  %v5495_v52 = vld [vmem:[%s8439_s0 + $0x158] sm:$0xff]  ;;  %v5500_v53 = vld [vmem:[%s8439_s0 + $0x448] sm:$0xff] }
  0x2a   :  { %v126_v7 = vpack.c.bf16 %v5495_v52, %v5490_v51  ;;  %v1537_v9 = vpack.c.bf16 %v5505_v54, %v5500_v53 }
  0x2b   :  { %328 = vmatpush1.bf16.msra.mxu1 %v4858_v61  ;;  %v4880_v61 = vld [vmem:[%s8440_s1 + $0x24] ss:$8 sps:$4 sm:$0xff]  }
  0x2c   :  { %1738 = vmatpush1.bf16.msra.mxu0 %v4859_v62  ;;  %329 = vmatprep.subr.bf16.mxu1 %v4860_v2  ;;  %v4883_v62 = vld [vmem:[%s8440_s1 + $0x3e4] ss:$8 sps:$4 sm:$0xff]   ;;  %v1534_v2 = vpack.c.bf16 %v5467_v43, %v4074_v56  ;;  %v4898_v56 = vld [vmem:[%s8440_s1 + $0x54] ss:$8 sps:$4 sm:$0xff]  }
  0x2d   :  { %1739 = vmatprep.subr.bf16.mxu0 %v4862_v3  ;;  %v4878_v3 = vld [vmem:[%s8440_s1 + $0x20] ss:$8 sps:$4 sm:$0xff]  }
  0x2f   :  { %330 = vmatpush1.bf16.msra.mxu1 %v4864_v15  ;;  %v4078_v15 = vld [vmem:[%s8439_s0 + $0x440] sm:$0xff] }
  0x30   :  { %1740 = vmatpush1.bf16.msra.mxu0 %v4865_v16  ;;  %564 = vmatprep.subr.bf16.mxu1 %v4868_v26  ;;  %v4887_v16 = vld [vmem:[%s8440_s1 + $0x3f0] ss:$8 sps:$4 sm:$0xff]   ;;  %v5754_v26 = vld [vmem:[%s8439_s0 + $0x1a0] sm:$0xff] }
  0x31   :  { %2112 = vmatprep.subr.bf16.mxu0 %v4871_v29  ;;  %v5605_v29 = vld [vmem:[%s8439_s0 + $0x160] sm:$0xff]  ;;  %8527 = vst [vmem:[#allocation16_spill] sm:$0xff] %v5754_v26 }
  0x32   :  { %340 = vmatmul.mubr.bf16.vlgmr.msra.gmra.mrb[0].mxu1 %v121_v35  ;;  %v5615_v35 = vld [vmem:[%s8439_s0 + $0x460] sm:$0xff] }
  0x33   :  { %1750 = vmatmul.mubr.bf16.vlgmr.msra.gmra.mrb[0].mxu0 %v1532_v36  ;;  %565 = vmatpush1.bf16.msra.mxu1 %v4866_v31  ;;  %v5610_v31 = vld [vmem:[%s8439_s0 + $0x170] sm:$0xff]  ;;  %v5749_v36 = vld [vmem:[%s8439_s0 + $0x4b8] sm:$0xff] }
  0x34   :  { %2113 = vmatpush1.bf16.msra.mxu0 %v4869_v38  ;;  %566 = vmatprep.subr.bf16.mxu1 %v4874_v44  ;;  %v5624_v38 = vld [vmem:[%s8439_s0 + $0x470] sm:$0xff]  ;;  %8526 = vst [vmem:[#allocation15_spill] sm:$0xff] %v5749_v36 }
  0x35   :  { %2114 = vmatprep.subr.bf16.mxu0 %v4877_v46  ;;  %3855 = vmatprep.mubr.msk.bf16.mxu1 %vm282_vm0, %v124_v49  ;;  %v125_v46 = vpack.c.bf16 %v5530_v63, %v5558_v13  ;;  %v4893_v49 = vld [vmem:[%s8440_s1 + $0x400] ss:$8 sps:$4 sm:$0xff]   ;;  %v1538_v12 = vpack.c.bf16 %v5624_v38, %v5615_v35  ;;  %v5771_v44 = vld [vmem:[%s8439_s0 + $0x4b0] sm:$0xff]  ;;  %v8547_v13 = vmax.f32 %v5596_v23, %v5586_v21 }
  0x36   :  { %4151 = vmatprep.mubr.msk.bf16.mxu0 %vm282_vm0, %v1535_v50  ;;  %v128_v50 = vpack.c.bf16 %v5586_v21, %v5575_v18  ;;  %8530 = vst [vmem:[#allocation19_spill] sm:$0xff] %v5771_v44  ;;  %v8549_v21 = vmax.f32 %v5615_v35, %v5605_v29  ;;  %v4947_v35 = vld [vmem:[%s8440_s1 + $0x490] ss:$8 sps:$4 sm:$0xff]  }
  0x37   :  { %567 = vmatpush1.bf16.msra.mxu1 %v4872_v47  ;;  %v1536_v47 = vpack.c.bf16 %v5535_v0, %v4078_v15  ;;  %v5682_v15 = vld [vmem:[%s8439_s0 + $0x190] sm:$0xff] }
  0x38   :  { %2115 = vmatpush1.bf16.msra.mxu0 %v4875_v48  ;;  %568 = vmatprep.subr.bf16.mxu1 %v4880_v61  ;;  %v4890_v48 = vld [vmem:[%s8440_s1 + $0x40] ss:$8 sps:$4 sm:$0xff]  }
  0x39   :  { %2116 = vmatprep.subr.bf16.mxu0 %v4883_v62  ;;  %v5645_v61 = vld [vmem:[%s8439_s0 + $0x188] sm:$0xff] }
  0x3a   :  { %350 = vmatmul.mubr.bf16.gmra.mrb[4].mxu1 %v123_v1  ;;  %v5650_v62 = vld [vmem:[%s8439_s0 + $0x488] sm:$0xff]  ;;  %v1539_v1 = vpack.c.bf16 %v5596_v23, %v5591_v22  ;;  %v8551_v23 = vmax.f32 %v5624_v38, %v5610_v31 }
  0x3b   :  { %1760 = vmatmul.mubr.bf16.gmra.mrb[4].mxu0 %v1534_v2  ;;  %569 = vmatpush1.bf16.msra.mxu1 %v4878_v3  ;;  %v4901_v2 = vld [vmem:[%s8440_s1 + $0x414] ss:$8 sps:$4 sm:$0xff]  }
  0x3c   :  { %2117 = vmatpush1.bf16.msra.mxu0 %v4881_v6  ;;  %3856 = vmatprep.mubr.msk.bf16.mxu1 %vm282_vm0, %v126_v7  ;;  %v5660_v3 = vld [vmem:[%s8439_s0 + $0x198] sm:$0xff]  ;;  %v5742_v6 = vld [vmem:[%s8439_s0 + $0x4a8] sm:$0xff] }
  0x3d   :  { %4152 = vmatprep.mubr.msk.bf16.mxu0 %vm282_vm0, %v1537_v9  ;;  %570 = vmatprep.subr.bf16.mxu1 %v4886_v10  ;;  %v5667_v7 = vld [vmem:[%s8439_s0 + $0x498] sm:$0xff]  ;;  %v5732_v10 = vld [vmem:[%s8439_s0 + $0x1a8] sm:$0xff]  ;;  %8525 = vst [vmem:[#allocation14_spill] sm:$0xff] %v5742_v6  ;;  %v1543_v39 = vpack.c.bf16 %v5749_v36, %v5742_v6  ;;  %v5909_v36 = vld [vmem:[%s8439_s0 + $0x1f0] sm:$0xff] }
  0x3e   :  { %2118 = vmatprep.subr.bf16.mxu0 %v4889_v17  ;;  %v4896_v9 = vld [vmem:[%s8440_s1 + $0x50] ss:$8 sps:$4 sm:$0xff]   ;;  %8523 = vst [vmem:[#allocation12_spill] sm:$0xff] %v5732_v10  ;;  %v4929_v6 = vld [vmem:[%s8440_s1 + $0x460] ss:$8 sps:$4 sm:$0xff]  }
  0x3f   :  { %571 = vmatpush1.bf16.msra.mxu1 %v4884_v14  ;;  %v5677_v14 = vld [vmem:[%s8439_s0 + $0x180] sm:$0xff]  ;;  %v5692_v17 = vld [vmem:[%s8439_s0 + $0x490] sm:$0xff] }
  0x40   :  { %2119 = vmatpush1.bf16.msra.mxu0 %v4887_v16  ;;  %572 = vmatprep.subr.bf16.mxu1 %v4892_v19  ;;  %v5687_v16 = vld [vmem:[%s8439_s0 + $0x480] sm:$0xff]  ;;  %v4899_v19 = vld [vmem:[%s8440_s1 + $0x410] ss:$8 sps:$4 sm:$0xff]  }
  0x41   :  { %2120 = vmatprep.subr.bf16.mxu0 %v4895_v20  ;;  %v4913_v20 = vld [vmem:[%s8440_s1 + $0x434] ss:$8 sps:$4 sm:$0xff]  }
  0x42   :  { %360 = vmatmul.mubr.bf16.gmra.mrb[8].mxu1 %v125_v46  ;;  %v4910_v46 = vld [vmem:[%s8440_s1 + $0x74] ss:$8 sps:$4 sm:$0xff]  }
  0x43   :  { %1770 = vmatmul.mubr.bf16.gmra.mrb[8].mxu0 %v1536_v47  ;;  %3857 = vmatprep.mubr.msk.bf16.mxu1 %vm282_vm0, %v128_v50  ;;  %v4904_v47 = vld [vmem:[%s8440_s1 + $0x64] ss:$8 sps:$4 sm:$0xff]   ;;  %v127_v50 = vpack.c.bf16 %v5610_v31, %v5605_v29  ;;  %v6183_v29 = vld [vmem:[%s8439_s0 + $0x570] sm:$0xff] }
  0x44   :  { %573 = vmatpush1.bf16.msra.mxu1 %v4890_v48  ;;  %4153 = vmatprep.mubr.msk.bf16.mxu0 %vm282_vm0, %v1539_v1  ;;  %v4907_v48 = vld [vmem:[%s8440_s1 + $0x424] ss:$8 sps:$4 sm:$0xff]   ;;  %v4905_v1 = vld [vmem:[%s8440_s1 + $0x420] ss:$8 sps:$4 sm:$0xff]   ;;  %v4944_v31 = vld [vmem:[%s8440_s1 + $0x190] ss:$8 sps:$4 sm:$0xff]  }
  0x45   :  { %2121 = vmatpush1.bf16.msra.mxu0 %v4893_v49  ;;  %574 = vmatprep.subr.bf16.mxu1 %v4898_v56  ;;  %v4902_v49 = vld [vmem:[%s8440_s1 + $0x60] ss:$8 sps:$4 sm:$0xff]   ;;  %v130_v56 = vpack.c.bf16 %v5660_v3, %v5645_v61 }
  0x46   :  { %2122 = vmatprep.subr.bf16.mxu0 %v4901_v2  ;;  %v1541_v2 = vpack.c.bf16 %v5667_v7, %v5650_v62 }
  0x48   :  { %575 = vmatpush1.bf16.msra.mxu1 %v4896_v9  ;;  %v5737_v9 = vld [vmem:[%s8439_s0 + $0x1b8] sm:$0xff] }
  0x49   :  { %8524 = vst [vmem:[#allocation13_spill] sm:$0xff] %v5737_v9  ;;  %2123 = vmatpush1.bf16.msra.mxu0 %v4899_v19  ;;  %576 = vmatprep.subr.bf16.mxu1 %v4904_v47  ;;  %v5766_v47 = vld [vmem:[%s8439_s0 + $0x4a0] sm:$0xff]  ;;  %v129_v19 = vpack.c.bf16 %v5682_v15, %v5677_v14  ;;  %v132_v41 = vpack.c.bf16 %v5737_v9, %v5732_v10 }
  0x4a   :  { %2124 = vmatprep.subr.bf16.mxu0 %v4907_v48  ;;  %8529 = vst [vmem:[#allocation18_spill] sm:$0xff] %v5766_v47  ;;  %370 = vmatmul.mubr.bf16.gmra.mrb[12].mxu1 %v127_v50  ;;  %v4919_v50 = vld [vmem:[%s8440_s1 + $0x444] ss:$8 sps:$4 sm:$0xff]   ;;  %v4917_v48 = vld [vmem:[%s8440_s1 + $0x440] ss:$8 sps:$4 sm:$0xff]   ;;  %v131_v9 = vpack.c.bf16 %v5759_v25, %v5754_v26  ;;  %v5919_v25 = vld [vmem:[%s8439_s0 + $0x4f0] sm:$0xff] }
  0x4b   :  { %1780 = vmatmul.mubr.bf16.gmra.mrb[12].mxu0 %v1538_v12  ;;  %3858 = vmatprep.mubr.msk.bf16.mxu1 %vm282_vm0, %v130_v56  ;;  %v4916_v12 = vld [vmem:[%s8440_s1 + $0x84] ss:$8 sps:$4 sm:$0xff]  }
  0x4c   :  { %4154 = vmatprep.mubr.msk.bf16.mxu0 %vm282_vm0, %v1541_v2  ;;  %577 = vmatpush1.bf16.msra.mxu1 %v4902_v49  ;;  %v5794_v56 = vld [vmem:[%s8439_s0 + $0x1c8] sm:$0xff]  ;;  %v5799_v49 = vld [vmem:[%s8439_s0 + $0x1d8] sm:$0xff]  ;;  %v5914_v10 = vld [vmem:[%s8439_s0 + $0x4e0] sm:$0xff] }
  0x4d   :  { %2125 = vmatpush1.bf16.msra.mxu0 %v4905_v1  ;;  %578 = vmatprep.subr.bf16.mxu1 %v4910_v46  ;;  %8531 = vst [vmem:[#allocation20_spill] sm:$0xff] %v5799_v49  ;;  %v5804_v1 = vld [vmem:[%s8439_s0 + $0x4c8] sm:$0xff]  ;;  %v5809_v2 = vld [vmem:[%s8439_s0 + $0x4d8] sm:$0xff] }
  0x4e   :  { %2126 = vmatprep.subr.bf16.mxu0 %v4913_v20  ;;  %8532 = vst [vmem:[#allocation21_spill] sm:$0xff] %v5809_v2  ;;  %v1540_v20 = vpack.c.bf16 %v5692_v17, %v5687_v16  ;;  %v4914_v46 = vld [vmem:[%s8440_s1 + $0x80] ss:$8 sps:$4 sm:$0xff]   ;;  %v1545_v57 = vpack.c.bf16 %v5809_v2, %v5804_v1  ;;  %v4937_v2 = vld [vmem:[%s8440_s1 + $0x474] ss:$8 sps:$4 sm:$0xff]  }
  0x50   :  { %579 = vmatpush1.bf16.msra.mxu1 %v4908_v5  ;;  %v4920_v5 = vld [vmem:[%s8440_s1 + $0x90] ss:$8 sps:$4 sm:$0xff]  }
  0x51   :  { %2127 = vmatpush1.bf16.msra.mxu0 %v4911_v58  ;;  %580 = vmatprep.subr.bf16.mxu1 %v4916_v12  ;;  %v4925_v58 = vld [vmem:[%s8440_s1 + $0x454] ss:$8 sps:$4 sm:$0xff]   ;;  %v4923_v12 = vld [vmem:[%s8440_s1 + $0x450] ss:$8 sps:$4 sm:$0xff]  }
  0x52   :  { %2128 = vmatprep.subr.bf16.mxu0 %v4919_v50  ;;  %380 = vmatmul.mubr.bf16.gmra.mrb[16].mxu1 %v129_v19  ;;  %v4928_v50 = vld [vmem:[%s8440_s1 + $0xa4] ss:$8 sps:$4 sm:$0xff]  }
  0x53   :  { %1790 = vmatmul.mubr.bf16.gmra.mrb[16].mxu0 %v1540_v20  ;;  %3859 = vmatprep.mubr.msk.bf16.mxu1 %vm282_vm0, %v132_v41  ;;  %v4931_v19 = vld [vmem:[%s8440_s1 + $0x464] ss:$8 sps:$4 sm:$0xff]   ;;  %v5881_v41 = vld [vmem:[%s8439_s0 + $0x1f8] sm:$0xff] }
  0x54   :  { %4155 = vmatprep.mubr.msk.bf16.mxu0 %vm282_vm0, %v1543_v39  ;;  %581 = vmatpush1.bf16.msra.mxu1 %v4914_v46  ;;  %v5876_v20 = vld [vmem:[%s8439_s0 + $0x1e8] sm:$0xff]  ;;  %v5896_v46 = vld [vmem:[%s8439_s0 + $0x1e0] sm:$0xff] }
  0x55   :  { %2129 = vmatpush1.bf16.msra.mxu0 %v4917_v48  ;;  %582 = vmatprep.subr.bf16.mxu1 %v4922_v28  ;;  %v5886_v39 = vld [vmem:[%s8439_s0 + $0x4e8] sm:$0xff]  ;;  %v5891_v48 = vld [vmem:[%s8439_s0 + $0x4f8] sm:$0xff]  ;;  %v1542_v28 = vpack.c.bf16 %v5771_v44, %v5766_v47  ;;  %v8534_v47 = vmax.f32 %v5450_v34, %v5440_v32  ;;  %v6005_v34 = vld [vmem:[%s8439_s0 + $0x20] sm:$0xff] }
  0x56   :  { %2130 = vmatprep.subr.bf16.mxu0 %v4925_v58  ;;  %v134_v58 = vpack.c.bf16 %v5799_v49, %v5794_v56  ;;  %v4926_v44 = vld [vmem:[%s8440_s1 + $0xa0] ss:$8 sps:$4 sm:$0xff]   ;;  %v4934_v49 = vld [vmem:[%s8440_s1 + $0xb4] ss:$8 sps:$4 sm:$0xff]   ;;  %8535 = vst [vmem:[#allocation22_spill] sm:$0xff] %v6005_v34 }
  0x57   :  { %v6060_v32 = vld [vmem:[%s8439_s0 + $0x40] sm:$0xff] }
  0x58   :  { %583 = vmatpush1.bf16.msra.mxu1 %v4920_v5  ;;  %v4932_v5 = vld [vmem:[%s8440_s1 + $0xb0] ss:$8 sps:$4 sm:$0xff]   ;;  %8542 = vst [vmem:[#allocation26_spill] sm:$0xff] %v6060_v32 }
  0x59   :  { %2131 = vmatpush1.bf16.msra.mxu0 %v4923_v12  ;;  %584 = vmatprep.subr.bf16.mxu1 %v4928_v50  ;;  %v4935_v12 = vld [vmem:[%s8440_s1 + $0x470] ss:$8 sps:$4 sm:$0xff]   ;;  %v4940_v50 = vld [vmem:[%s8440_s1 + $0x184] ss:$8 sps:$4 sm:$0xff]  }
  0x5a   :  { %2132 = vmatprep.subr.bf16.mxu0 %v4931_v19  ;;  %390 = vmatmul.mubr.bf16.gmra.mrb[20].mxu1 %v131_v9  ;;  %v133_v9 = vpack.c.bf16 %v5837_v4, %v5832_v24  ;;  %v1547_v19 = vpack.c.bf16 %v5891_v48, %v5886_v39 }
  0x5b   :  { %1800 = vmatmul.mubr.bf16.gmra.mrb[20].mxu0 %v1542_v28  ;;  %3860 = vmatprep.mubr.msk.bf16.mxu1 %vm282_vm0, %v134_v58  ;;  %v5977_v58 = vld [vmem:[%s8439_s0 + $0x38] sm:$0xff] }
  0x5c   :  { %4156 = vmatprep.mubr.msk.bf16.mxu0 %vm282_vm0, %v1545_v57  ;;  %585 = vmatpush1.bf16.msra.mxu1 %v4926_v44  ;;  %v4943_v57 = vld [vmem:[%s8440_s1 + $0x484] ss:$8 sps:$4 sm:$0xff]   ;;  %v1544_v44 = vpack.c.bf16 %v5849_v27, %v5842_v45  ;;  %v5983_v26 = vmax.f32 %v8534_v47, %v5977_v58  ;;  %v8536_v47 = vmax.f32 %v5467_v43, %v5462_v42 }
  0x5d   :  { %2133 = vmatpush1.bf16.msra.mxu0 %v4929_v6  ;;  %586 = vmatprep.subr.bf16.mxu1 %v4934_v49  ;;  %v136_v6 = vpack.c.bf16 %v5881_v41, %v5876_v20  ;;  %v5966_v49 = vld [vmem:[%s8439_s0 + $0x28] sm:$0xff]  ;;  %v8540_v42 = vmax.f32 %v5505_v54, %v5495_v52  ;;  %v49_v52 = vpack.c.bf16 %v5306_v40, %v5295_v37  ;;  %v6074_v54 = vld [vmem:[%s8439_s0 + $0x558] sm:$0xff] }
  0x5e   :  { %2134 = vmatprep.subr.bf16.mxu0 %v4937_v2  ;;  %v8533_v2 = vmax.f32 %v5445_v33, %v5432_v30  ;;  %v5993_v30 = vld [vmem:[%s8439_s0 + $0x538] sm:$0xff]  ;;  %v5998_v33 = vld [vmem:[%s8439_s0 + $0x30] sm:$0xff]  ;;  %v6029_v43 = vld [vmem:[%s8439_s0 + $0x48] sm:$0xff]  ;;  %v8545_v37 = vmax.f32 %v5591_v22, %v5575_v18  ;;  %v51_v38 = vpack.c.bf16 %v5977_v58, %v5966_v49 }
  0x5f   :  { %v4949_v40 = vld [vmem:[%s8440_s1 + $0x494] ss:$8 sps:$4 sm:$0xff]   ;;  %v6152_v18 = vld [vmem:[%s8439_s0 + $0x568] sm:$0xff] }
  0x60   :  { %587 = vmatpush1.bf16.msra.mxu1 %v4932_v5  ;;  %v5972_v28 = vmax.f32 %v8533_v2, %v5966_v49  ;;  %v5988_v5 = vld [vmem:[%s8439_s0 + $0x528] sm:$0xff]  ;;  %v8539_v2 = vmax.f32 %v5500_v53, %v5490_v51  ;;  %v6065_v51 = vld [vmem:[%s8439_s0 + $0x50] sm:$0xff]  ;;  %v1928_v53 = vpack.c.bf16 %v5391_v11, %v5380_v8 }
  0x61   :  { %2135 = vmatpush1.bf16.msra.mxu0 %v4935_v12  ;;  %927 = vmatprep.subr.bf16.mxu1 %v4940_v50  ;;  %v6011_v12 = vmax.f32 %v8536_v47, %v5998_v33  ;;  %v6055_v50 = vld [vmem:[%s8439_s0 + $0x548] sm:$0xff]  ;;  %v6091_v11 = vld [vmem:[%s8439_s0 + $0x550] sm:$0xff] }
  0x62   :  { %2507 = vmatprep.subr.bf16.mxu0 %v4943_v57  ;;  %400 = vmatmul.mubr.bf16.gmra.mrb[24].mxu1 %v133_v9  ;;  %v6022_v9 = vld [vmem:[%s8439_s0 + $0x530] sm:$0xff]  ;;  %v6044_v47 = vmax.f32 %v8539_v2, %v6029_v43  ;;  %v4955_v49 = vld [vmem:[%s8440_s1 + $0x4a4] ss:$8 sps:$4 sm:$0xff]  }
  0x63   :  { %1810 = vmatmul.mubr.bf16.gmra.mrb[24].mxu0 %v1544_v44  ;;  %8537 = vst [vmem:[#allocation23_spill] sm:$0xff] %v6011_v12  ;;  %3861 = vmatprep.mubr.msk.bf16.mxu1 %vm282_vm0, %v136_v6  ;;  %8538 = vst [vmem:[#allocation24_spill] sm:$0xff] %v6022_v9  ;;  %v6034_v44 = vld [vmem:[%s8439_s0 + $0x58] sm:$0xff]  ;;  %v135_v6 = vpack.c.bf16 %v5909_v36, %v5896_v46  ;;  %v6211_v58 = vld [vmem:[%s8439_s0 + $0x88] sm:$0xff] }
  0x64   :  { %4157 = vmatprep.mubr.msk.bf16.mxu0 %vm282_vm0, %v1547_v19  ;;  %v1546_v19 = vpack.c.bf16 %v5919_v25, %v5914_v10  ;;  %v6050_v57 = vmax.f32 %v8540_v42, %v6034_v44  ;;  %v8543_v42 = vmax.f32 %v5535_v0, %v5530_v63  ;;  %v4158_v63 = vld [vmem:[%s8439_s0 + $0x500] sm:$0xff]  ;;  %v4160_v0 = vld [vmem:[%s8439_s0 + $0x510] sm:$0xff] }
  0x65   :  { %v1927_v12 = vpack.c.bf16 %v4160_v0, %v4158_v63  ;;  %v4946_v8 = vld [vmem:[%s8440_s1 + $0x194] ss:$8 sps:$4 sm:$0xff]   ;;  %v8555_v0 = vmax.f32 %v5667_v7, %v5660_v3 }
  0x66   :  { %8541 = vst [vmem:[#allocation25_spill] sm:$0xff] %v6050_v57  ;;  %v6080_v2 = vmax.f32 %v8543_v42, %v6065_v51  ;;  %v4938_v42 = vld [vmem:[%s8440_s1 + $0x180] ss:$8 sps:$4 sm:$0xff]   ;;  %v6147_v63 = vld [vmem:[%s8439_s0 + $0x70] sm:$0xff] }
  0x67   :  { %v6178_v57 = vld [vmem:[%s8439_s0 + $0x560] sm:$0xff]  ;;  %v6254_v7 = vld [vmem:[%s8439_s0 + $0x90] sm:$0xff] }
  0x68   :  { %8544 = vst [vmem:[#allocation27_spill] sm:$0xff] %v6080_v2  ;;  %v6216_v2 = vld [vmem:[%s8439_s0 + $0x98] sm:$0xff] }
  0x6a   :  { %410 = vmatmul.mubr.bf16.gmra.mrb[28].mxu1 %v135_v6  ;;  %v4941_v6 = vld [vmem:[%s8440_s1 + $0x480] ss:$8 sps:$4 sm:$0xff]  }
  0x6b   :  { %1820 = vmatmul.mubr.bf16.gmra.mrb[28].mxu0 %v1546_v19  ;;  %3886 = vmatprep.mubr.msk.bf16.mxu1 %vm282_vm0, %v49_v52  ;;  %v6112_v19 = vld [vmem:[%s8439_s0 + $0x68] sm:$0xff]  ;;  %v6117_v52 = vld [vmem:[%s8439_s0 + $0x78] sm:$0xff] }
  0x6c   :  { %4238 = vmatprep.mubr.msk.bf16.mxu0 %vm282_vm0, %v1928_v53  ;;  %v48_v53 = vpack.c.bf16 %v5351_v60, %v5346_v59  ;;  %v6131_v55 = vmax.f32 %v8545_v37, %v6112_v19  ;;  %v6137_v59 = vmax.f32 %v8547_v13, %v6117_v52  ;;  %v6142_v60 = vld [vmem:[%s8439_s0 + $0x60] sm:$0xff]  ;;  %v6157_v13 = vld [vmem:[%s8439_s0 + $0x578] sm:$0xff]  ;;  %v6169_v37 = vmax.f32 %v8551_v23, %v6147_v63 }
  0x6d   :  { %v6163_v22 = vmax.f32 %v8549_v21, %v6142_v60  ;;  %v1930_v21 = vpack.c.bf16 %v5993_v30, %v5988_v5  ;;  %v4162_v23 = vld [vmem:[%s8439_s0 + $0x520] sm:$0xff] }
  0x6e   :  { %8546 = vst [vmem:[#allocation28_spill] sm:$0xff] %v6131_v55  ;;  %8548 = vst [vmem:[#allocation29_spill] sm:$0xff] %v6137_v59  ;;  %v4952_v59 = vld [vmem:[%s8440_s1 + $0x1a4] ss:$8 sps:$4 sm:$0xff]  }
  0x6f   :  { %8550 = vst [vmem:[#allocation30_spill] sm:$0xff] %v6163_v22  ;;  %8552 = vst [vmem:[#allocation31_spill] sm:$0xff] %v6169_v37  ;;  %v6228_v37 = vmax.f32 %v8555_v0, %v6216_v2  ;;  %v6233_v22 = vld [vmem:[%s8439_s0 + $0x588] sm:$0xff]  ;;  %v50_v0 = vpack.c.bf16 %v5998_v33, %v6005_v34  ;;  %v8565_v34 = vld [vmem:[#allocation13_spill] sm:$0xff] }
  0x70   :  { %v8561_v33 = vld [vmem:[#allocation14_spill] sm:$0xff] }
  0x71   :  { %8556 = vst [vmem:[#allocation33_spill] sm:$0xff] %v6228_v37  ;;  %v6392_v37 = vld [vmem:[%s8439_s0 + $0x5b0] sm:$0xff] }
  0x72   :  { %597 = vmatmul.mubr.bf16.vlgmr.msra.gmra.mrb[0].mxu1 %v48_v53 }
  0x73   :  { %2145 = vmatmul.mubr.bf16.vlgmr.msra.gmra.mrb[0].mxu0 %v1927_v12  ;;  %928 = vmatpush1.bf16.msra.mxu1 %v4938_v42  ;;  %v8553_v12 = vmax.f32 %v5650_v62, %v5645_v61  ;;  %v6238_v42 = vld [vmem:[%s8439_s0 + $0x598] sm:$0xff]  ;;  %v6243_v61 = vld [vmem:[%s8439_s0 + $0x80] sm:$0xff]  ;;  %v8557_v62 = vmax.f32 %v5687_v16, %v5677_v14  ;;  %v8559_v14 = vmax.f32 %v5692_v17, %v5682_v15 }
  0x74   :  { %2508 = vmatpush1.bf16.msra.mxu0 %v4941_v6  ;;  %929 = vmatprep.subr.bf16.mxu1 %v4946_v8  ;;  %v4950_v15 = vld [vmem:[%s8440_s1 + $0x1a0] ss:$8 sps:$4 sm:$0xff]  }
  0x75   :  { %v6222_v53 = vmax.f32 %v8553_v12, %v6211_v58  ;;  %2509 = vmatprep.subr.bf16.mxu0 %v4949_v40  ;;  %v6249_v3 = vmax.f32 %v8557_v62, %v6243_v61  ;;  %3887 = vmatprep.mubr.msk.bf16.mxu1 %vm282_vm0, %v51_v38  ;;  %v6266_v16 = vmax.f32 %v8559_v14, %v6254_v7  ;;  %v6271_v40 = vld [vmem:[%s8439_s0 + $0x580] sm:$0xff]  ;;  %v6281_v12 = vld [vmem:[%s8439_s0 + $0x590] sm:$0xff] }
  0x76   :  { %4239 = vmatprep.mubr.msk.bf16.mxu0 %vm282_vm0, %v1930_v21  ;;  %v1929_v38 = vpack.c.bf16 %v6022_v9, %v4162_v23  ;;  %v4953_v17 = vld [vmem:[%s8440_s1 + $0x4a0] ss:$8 sps:$4 sm:$0xff]   ;;  %v53_v23 = vpack.c.bf16 %v6034_v44, %v6029_v43  ;;  %v4956_v62 = vld [vmem:[%s8440_s1 + $0x1b0] ss:$8 sps:$4 sm:$0xff]  }
  0x77   :  { %8554 = vst [vmem:[#allocation32_spill] sm:$0xff] %v6222_v53  ;;  %8558 = vst [vmem:[#allocation34_spill] sm:$0xff] %v6249_v3  ;;  %930 = vmatpush1.bf16.msra.mxu1 %v4944_v31  ;;  %v1932_v31 = vpack.c.bf16 %v6074_v54, %v6055_v50  ;;  %v4166_v14 = vld [vmem:[%s8439_s0 + $0x540] sm:$0xff]  ;;  %v4959_v43 = vld [vmem:[%s8440_s1 + $0x4b0] ss:$8 sps:$4 sm:$0xff]  }
  0x78   :  { %8560 = vst [vmem:[#allocation35_spill] sm:$0xff] %v6266_v16  ;;  %2510 = vmatpush1.bf16.msra.mxu0 %v4947_v35  ;;  %931 = vmatprep.subr.bf16.mxu1 %v4952_v59  ;;  %v4958_v35 = vld [vmem:[%s8440_s1 + $0x1b4] ss:$8 sps:$4 sm:$0xff]   ;;  %v6313_v44 = vld [vmem:[%s8439_s0 + $0xa8] sm:$0xff]  ;;  %v1931_v55 = vpack.c.bf16 %v6091_v11, %v4166_v14 }
  0x79   :  { %2511 = vmatprep.subr.bf16.mxu0 %v4955_v49  ;;  %v4961_v59 = vld [vmem:[%s8440_s1 + $0x4b4] ss:$8 sps:$4 sm:$0xff]  }
  0x7a   :  { %607 = vmatmul.mubr.bf16.gmra.mrb[4].mxu1 %v50_v0  ;;  %v6318_v49 = vld [vmem:[%s8439_s0 + $0xb8] sm:$0xff]  ;;  %v4964_v0 = vld [vmem:[%s8440_s1 + $0x1c4] ss:$8 sps:$4 sm:$0xff]   ;;  %v8564_v9 = vld [vmem:[#allocation15_spill] sm:$0xff] }
  0x7b   :  { %2155 = vmatmul.mubr.bf16.gmra.mrb[4].mxu0 %v1929_v38  ;;  %932 = vmatpush1.bf16.msra.mxu1 %v4950_v15  ;;  %v4967_v38 = vld [vmem:[%s8440_s1 + $0x4c4] ss:$8 sps:$4 sm:$0xff]   ;;  %v8562_v21 = vld [vmem:[#allocation12_spill] sm:$0xff]  ;;  %v8566_v16 = vmax.f32 %v8564_v9, %v8565_v34 }
  0x7c   :  { %2512 = vmatpush1.bf16.msra.mxu0 %v4953_v17  ;;  %v8563_v8 = vmax.f32 %v8561_v33, %v8562_v21  ;;  %v6341_v17 = vld [vmem:[%s8439_s0 + $0xa0] sm:$0xff]  ;;  %3888 = vmatprep.mubr.msk.bf16.mxu1 %vm282_vm0, %v53_v23  ;;  %v6353_v34 = vld [vmem:[%s8439_s0 + $0x5b8] sm:$0xff]  ;;  %v8567_v9 = vld [vmem:[#allocation18_spill] sm:$0xff] }
  0x7d   :  { %v6336_v15 = vmax.f32 %v8566_v16, %v6318_v49  ;;  %4240 = vmatprep.mubr.msk.bf16.mxu0 %vm282_vm0, %v1932_v31  ;;  %v8568_v16 = vld [vmem:[#allocation16_spill] sm:$0xff]  ;;  %v6364_v23 = vld [vmem:[%s8439_s0 + $0xb0] sm:$0xff]  ;;  %933 = vmatprep.subr.bf16.mxu1 %v4958_v35  ;;  %v4962_v31 = vld [vmem:[%s8440_s1 + $0x1c0] ss:$8 sps:$4 sm:$0xff]  }
  0x7e   :  { %v6330_v6 = vmax.f32 %v8563_v8, %v6313_v44  ;;  %v6348_v8 = vld [vmem:[%s8439_s0 + $0x5a8] sm:$0xff]  ;;  %v8569_v21 = vmax.f32 %v8567_v9, %v8568_v16  ;;  %2513 = vmatprep.subr.bf16.mxu0 %v4961_v59  ;;  %v8571_v9 = vld [vmem:[#allocation19_spill] sm:$0xff]  ;;  %v8572_v16 = vld [vmem:[#allocation17_spill] sm:$0xff]  ;;  %v52_v59 = vpack.c.bf16 %v6065_v51, %v6060_v32 }
  0x7f   :  { %v6382_v35 = vld [vmem:[%s8439_s0 + $0x5a0] sm:$0xff]  ;;  %934 = vmatpush1.bf16.msra.mxu1 %v4956_v62  ;;  %v4970_v51 = vld [vmem:[%s8440_s1 + $0x1d4] ss:$8 sps:$4 sm:$0xff]   ;;  %v1934_v62 = vpack.c.bf16 %v6157_v13, %v6152_v18 }
  0x80   :  { %v6359_v33 = vmax.f32 %v8569_v21, %v6341_v17  ;;  %v8573_v21 = vmax.f32 %v8571_v9, %v8572_v16  ;;  %2514 = vmatpush1.bf16.msra.mxu0 %v4959_v43  ;;  %v4965_v9 = vld [vmem:[%s8440_s1 + $0x4c0] ss:$8 sps:$4 sm:$0xff]   ;;  %v55_v16 = vpack.c.bf16 %v6117_v52, %v6112_v19  ;;  %935 = vmatprep.subr.bf16.mxu1 %v4964_v0  ;;  %v4973_v19 = vld [vmem:[%s8440_s1 + $0x4d4] ss:$8 sps:$4 sm:$0xff]  }
  0x81   :  { %2515 = vmatprep.subr.bf16.mxu0 %v4967_v38  ;;  %v8575_v52 = vmax.f32 %v5804_v1, %v5794_v56  ;;  %v6423_v14 = vld [vmem:[%s8439_s0 + $0xd8] sm:$0xff]  ;;  %v6428_v0 = vld [vmem:[%s8439_s0 + $0x5c8] sm:$0xff]  ;;  %v8577_v38 = vld [vmem:[#allocation21_spill] sm:$0xff] }
  0x82   :  { %8570 = vst [vmem:[#allocation14_spill] sm:$0xff] %v6359_v33  ;;  %v6377_v53 = vmax.f32 %v8573_v21, %v6364_v23  ;;  %v6407_v21 = vld [vmem:[%s8439_s0 + $0xc8] sm:$0xff]  ;;  %v8578_v3 = vld [vmem:[#allocation20_spill] sm:$0xff]  ;;  %v6439_v56 = vld [vmem:[%s8439_s0 + $0xc0] sm:$0xff]  ;;  %617 = vmatmul.mubr.bf16.gmra.mrb[8].mxu1 %v52_v59 }
  0x83   :  { %v6418_v43 = vmax.f32 %v8575_v52, %v6407_v21  ;;  %v8579_v32 = vmax.f32 %v8577_v38, %v8578_v3  ;;  %v6444_v1 = vld [vmem:[%s8439_s0 + $0xd0] sm:$0xff]  ;;  %2165 = vmatmul.mubr.bf16.gmra.mrb[8].mxu0 %v1931_v55  ;;  %v6454_v3 = vld [vmem:[%s8439_s0 + $0x5d8] sm:$0xff]  ;;  %v8580_v38 = vmax.f32 %v5842_v45, %v5832_v24  ;;  %v8581_v55 = vmax.f32 %v5849_v27, %v5837_v4  ;;  %v4976_v27 = vld [vmem:[%s8440_s1 + $0x1e4] ss:$8 sps:$4 sm:$0xff]  }
  0x84   :  { %8574 = vst [vmem:[#allocation12_spill] sm:$0xff] %v6377_v53  ;;  %v4968_v52 = vld [vmem:[%s8440_s1 + $0x1d0] ss:$8 sps:$4 sm:$0xff]   ;;  %3889 = vmatprep.mubr.msk.bf16.mxu1 %vm282_vm0, %v55_v16  ;;  %936 = vmatpush1.bf16.msra.mxu1 %v4962_v31  ;;  %v54_v16 = vpack.c.bf16 %v6147_v63, %v6142_v60  ;;  %v6512_v60 = vld [vmem:[%s8439_s0 + $0xe8] sm:$0xff]  ;;  %v4985_v63 = vld [vmem:[%s8440_s1 + $0x4f4] ss:$8 sps:$4 sm:$0xff]  }
  0x85   :  { %8576 = vst [vmem:[#allocation15_spill] sm:$0xff] %v6418_v43  ;;  %v6434_v53 = vmax.f32 %v8579_v32, %v6423_v14  ;;  %v6460_v33 = vmax.f32 %v8580_v38, %v6439_v56  ;;  %v6466_v59 = vmax.f32 %v8581_v55, %v6444_v1  ;;  %v6474_v43 = vld [vmem:[%s8439_s0 + $0x5c0] sm:$0xff]  ;;  %v6479_v24 = vld [vmem:[%s8439_s0 + $0x5d0] sm:$0xff]  ;;  %4241 = vmatprep.mubr.msk.bf16.mxu0 %vm282_vm0, %v1934_v62  ;;  %v6529_v31 = vld [vmem:[%s8439_s0 + $0xf8] sm:$0xff] }
  0x86   :  { %2516 = vmatpush1.bf16.msra.mxu0 %v4965_v9  ;;  %v4971_v4 = vld [vmem:[%s8440_s1 + $0x4d0] ss:$8 sps:$4 sm:$0xff]   ;;  %937 = vmatprep.subr.bf16.mxu1 %v4970_v51  ;;  %v4979_v9 = vld [vmem:[%s8440_s1 + $0x4e4] ss:$8 sps:$4 sm:$0xff]   ;;  %v1933_v62 = vpack.c.bf16 %v6183_v29, %v6178_v57  ;;  %v57_v38 = vpack.c.bf16 %v6216_v2, %v6211_v58  ;;  %v1936_v55 = vpack.c.bf16 %v6238_v42, %v6233_v22  ;;  %v4974_v51 = vld [vmem:[%s8440_s1 + $0x1e0] ss:$8 sps:$4 sm:$0xff]  }
  0x87   :  { %2517 = vmatprep.subr.bf16.mxu0 %v4973_v19  ;;  %v4977_v19 = vld [vmem:[%s8440_s1 + $0x4e0] ss:$8 sps:$4 sm:$0xff]   ;;  %v4982_v2 = vld [vmem:[%s8440_s1 + $0x1f4] ss:$8 sps:$4 sm:$0xff]   ;;  %v8582_v58 = vmax.f32 %v5886_v39, %v5876_v20 }
  0x88   :  { %938 = vmatpush1.bf16.msra.mxu1 %v4968_v52  ;;  %v6540_v45 = vld [vmem:[%s8439_s0 + $0x5e8] sm:$0xff]  ;;  %v6545_v20 = vld [vmem:[%s8439_s0 + $0xe0] sm:$0xff]  ;;  %v6550_v39 = vld [vmem:[%s8439_s0 + $0xf0] sm:$0xff] }
  0x89   :  { %939 = vmatprep.subr.bf16.mxu1 %v4976_v27  ;;  %v6524_v52 = vmax.f32 %v8582_v58, %v6512_v60  ;;  %v8584_v58 = vmax.f32 %v5914_v10, %v5896_v46  ;;  %v6581_v32 = vld [vmem:[%s8439_s0 + $0x5e0] sm:$0xff]  ;;  %v6586_v10 = vld [vmem:[%s8439_s0 + $0x5f0] sm:$0xff]  ;;  %v6869_v46 = vld [vmem:[%s8439_s0 + $0x688] sm:$0xff] }
  0x8a   :  { %2518 = vmatpush1.bf16.msra.mxu0 %v4971_v4  ;;  %v8583_v4 = vmax.f32 %v5891_v48, %v5881_v41  ;;  %627 = vmatmul.mubr.bf16.gmra.mrb[12].mxu1 %v54_v16  ;;  %v4980_v41 = vld [vmem:[%s8440_s1 + $0x1f0] ss:$8 sps:$4 sm:$0xff]   ;;  %v8585_v16 = vmax.f32 %v5919_v25, %v5909_v36  ;;  %v4988_v36 = vld [vmem:[%s8440_s1 + $0x204] ss:$8 sps:$4 sm:$0xff]  }
  0x8b   :  { %2519 = vmatprep.subr.bf16.mxu0 %v4979_v9  ;;  %2175 = vmatmul.mubr.bf16.gmra.mrb[12].mxu0 %v1933_v62  ;;  %v6560_v9 = vld [vmem:[%s8439_s0 + $0x5f8] sm:$0xff]  ;;  %v8616_v48 = vld [vmem:[#allocation33_spill] sm:$0xff] }
  0x8c   :  { %v6535_v27 = vmax.f32 %v8583_v4, %v6529_v31  ;;  %v6566_v4 = vmax.f32 %v8584_v58, %v6545_v20  ;;  %v6572_v62 = vmax.f32 %v8585_v16, %v6550_v39  ;;  %3890 = vmatprep.mubr.msk.bf16.mxu1 %vm282_vm0, %v57_v38  ;;  %4242 = vmatprep.mubr.msk.bf16.mxu0 %vm282_vm0, %v1936_v55  ;;  %v4983_v25 = vld [vmem:[%s8440_s1 + $0x4f0] ss:$8 sps:$4 sm:$0xff]   ;;  %v4991_v55 = vld [vmem:[%s8440_s1 + $0x504] ss:$8 sps:$4 sm:$0xff]  }
  0x8d   :  { %940 = vmatpush1.bf16.msra.mxu1 %v4974_v51  ;;  %v56_v51 = vpack.c.bf16 %v6254_v7, %v6243_v61  ;;  %v59_v58 = vpack.c.bf16 %v6318_v49, %v6313_v44  ;;  %v1938_v16 = vpack.c.bf16 %v6353_v34, %v6348_v8  ;;  %v4994_v61 = vld [vmem:[%s8440_s1 + $0x214] ss:$8 sps:$4 sm:$0xff]   ;;  %v4992_v44 = vld [vmem:[%s8440_s1 + $0x210] ss:$8 sps:$4 sm:$0xff]   ;;  %v6629_v49 = vld [vmem:[%s8439_s0 + $0x228] sm:$0xff] }
  0x8e   :  { %2520 = vmatpush1.bf16.msra.mxu0 %v4977_v19  ;;  %941 = vmatprep.subr.bf16.mxu1 %v4982_v2  ;;  %v1935_v19 = vpack.c.bf16 %v6281_v12, %v6271_v40  ;;  %v4986_v2 = vld [vmem:[%s8440_s1 + $0x200] ss:$8 sps:$4 sm:$0xff]   ;;  %v4997_v7 = vld [vmem:[%s8440_s1 + $0x514] ss:$8 sps:$4 sm:$0xff]  }
  0x8f   :  { %2521 = vmatprep.subr.bf16.mxu0 %v4985_v63  ;;  %v4989_v63 = vld [vmem:[%s8440_s1 + $0x500] ss:$8 sps:$4 sm:$0xff]  }
  0x91   :  { %942 = vmatpush1.bf16.msra.mxu1 %v4980_v41  ;;  %v6634_v41 = vld [vmem:[%s8439_s0 + $0x238] sm:$0xff] }
  0x92   :  { %2522 = vmatpush1.bf16.msra.mxu0 %v4983_v25  ;;  %943 = vmatprep.subr.bf16.mxu1 %v4988_v36  ;;  %v4995_v25 = vld [vmem:[%s8440_s1 + $0x510] ss:$8 sps:$4 sm:$0xff]   ;;  %v5000_v36 = vld [vmem:[%s8440_s1 + $0x224] ss:$8 sps:$4 sm:$0xff]  }
  0x93   :  { %2523 = vmatprep.subr.bf16.mxu0 %v4991_v55  ;;  %637 = vmatmul.mubr.bf16.gmra.mrb[16].mxu1 %v56_v51  ;;  %v5003_v55 = vld [vmem:[%s8440_s1 + $0x524] ss:$8 sps:$4 sm:$0xff]   ;;  %v8586_v51 = vmax.f32 %v5972_v28, %v5988_v5  ;;  %v58_v28 = vpack.c.bf16 %v6364_v23, %v6341_v17  ;;  %v4998_v5 = vld [vmem:[%s8440_s1 + $0x220] ss:$8 sps:$4 sm:$0xff]   ;;  %v5006_v23 = vld [vmem:[%s8440_s1 + $0x234] ss:$8 sps:$4 sm:$0xff]  }
  0x94   :  { %2185 = vmatmul.mubr.bf16.gmra.mrb[16].mxu0 %v1935_v19  ;;  %3891 = vmatprep.mubr.msk.bf16.mxu1 %vm282_vm0, %v59_v58  ;;  %v8588_v58 = vmax.f32 %v5983_v26, %v5993_v30  ;;  %v1937_v26 = vpack.c.bf16 %v6392_v37, %v6382_v35  ;;  %v5001_v17 = vld [vmem:[%s8440_s1 + $0x520] ss:$8 sps:$4 sm:$0xff]  }
  0x95   :  { %4243 = vmatprep.mubr.msk.bf16.mxu0 %vm282_vm0, %v1938_v16  ;;  %944 = vmatpush1.bf16.msra.mxu1 %v4986_v2  ;;  %v6649_v19 = vmax.f32 %v8586_v51, %v6629_v49  ;;  %v6660_v2 = vld [vmem:[%s8439_s0 + $0x628] sm:$0xff]  ;;  %v1940_v51 = vpack.c.bf16 %v6454_v3, %v6428_v0 }
  0x96   :  { %2524 = vmatpush1.bf16.msra.mxu0 %v4989_v63  ;;  %v6655_v16 = vmax.f32 %v8588_v58, %v6634_v41  ;;  %945 = vmatprep.subr.bf16.mxu1 %v4994_v61  ;;  %8590 = vst [vmem:[#allocation16_spill] sm:$0xff] %v6660_v2  ;;  %v6665_v63 = vld [vmem:[%s8439_s0 + $0x638] sm:$0xff]  ;;  %v6691_v58 = vld [vmem:[%s8439_s0 + $0x248] sm:$0xff]  ;;  %v8594_v61 = vld [vmem:[#allocation25_spill] sm:$0xff] }
  0x97   :  { %8587 = vst [vmem:[#allocation13_spill] sm:$0xff] %v6649_v19  ;;  %2525 = vmatprep.subr.bf16.mxu0 %v4997_v7  ;;  %8591 = vst [vmem:[#allocation19_spill] sm:$0xff] %v6665_v63  ;;  %v61_v7 = vpack.c.bf16 %v6423_v14, %v6407_v21  ;;  %v6696_v14 = vld [vmem:[%s8439_s0 + $0x258] sm:$0xff]  ;;  %v8595_v30 = vmax.f32 %v8594_v61, %v6074_v54 }
  0x98   :  { %8589 = vst [vmem:[#allocation18_spill] sm:$0xff] %v6655_v16  ;;  %v5009_v21 = vld [vmem:[%s8440_s1 + $0x534] ss:$8 sps:$4 sm:$0xff]   ;;  %v5007_v54 = vld [vmem:[%s8440_s1 + $0x530] ss:$8 sps:$4 sm:$0xff]   ;;  %v6989_v16 = vld [vmem:[%s8439_s0 + $0x6a8] sm:$0xff] }
  0x99   :  { %946 = vmatpush1.bf16.msra.mxu1 %v4992_v44  ;;  %v8592_v44 = vmax.f32 %v6044_v47, %v6055_v50  ;;  %v6711_v38 = vmax.f32 %v8595_v30, %v6696_v14  ;;  %v6726_v50 = vld [vmem:[%s8439_s0 + $0x250] sm:$0xff]  ;;  %8631 = vst [vmem:[#allocation39_spill] sm:$0xff] %v6989_v16  ;;  %v745_v16 = vpack.c.bf16 %v6634_v41, %v6629_v49  ;;  %v7050_v41 = vld [vmem:[%s8439_s0 + $0x6a0] sm:$0xff] }
  0x9a   :  { %2526 = vmatpush1.bf16.msra.mxu0 %v4995_v25  ;;  %947 = vmatprep.subr.bf16.mxu1 %v5000_v36  ;;  %v6716_v36 = vld [vmem:[%s8439_s0 + $0x648] sm:$0xff]  ;;  %v5004_v47 = vld [vmem:[%s8440_s1 + $0x230] ss:$8 sps:$4 sm:$0xff]  }
  0x9b   :  { %2527 = vmatprep.subr.bf16.mxu0 %v5003_v55  ;;  %v6705_v25 = vmax.f32 %v8592_v44, %v6691_v58  ;;  %8596 = vst [vmem:[#allocation21_spill] sm:$0xff] %v6711_v38  ;;  %v6721_v55 = vld [vmem:[%s8439_s0 + $0x658] sm:$0xff]  ;;  %647 = vmatmul.mubr.bf16.gmra.mrb[20].mxu1 %v58_v28  ;;  %v8597_v30 = vld [vmem:[#allocation27_spill] sm:$0xff]  ;;  %v5012_v44 = vld [vmem:[%s8440_s1 + $0x244] ss:$8 sps:$4 sm:$0xff]  }
  0x9c   :  { %2195 = vmatmul.mubr.bf16.gmra.mrb[20].mxu0 %v1937_v26  ;;  %3892 = vmatprep.mubr.msk.bf16.mxu1 %vm282_vm0, %v61_v7  ;;  %v8598_v61 = vmax.f32 %v8597_v30, %v6091_v11  ;;  %v5015_v26 = vld [vmem:[%s8440_s1 + $0x544] ss:$8 sps:$4 sm:$0xff]   ;;  %v8622_v38 = vld [vmem:[#allocation35_spill] sm:$0xff] }
  0x9d   :  { %8593 = vst [vmem:[#allocation17_spill] sm:$0xff] %v6705_v25  ;;  %4244 = vmatprep.mubr.msk.bf16.mxu0 %vm282_vm0, %v1940_v51  ;;  %948 = vmatpush1.bf16.msra.mxu1 %v4998_v5  ;;  %v6749_v51 = vld [vmem:[%s8439_s0 + $0x650] sm:$0xff]  ;;  %v60_v5 = vpack.c.bf16 %v6444_v1, %v6439_v56  ;;  %v6770_v30 = vld [vmem:[%s8439_s0 + $0x268] sm:$0xff]  ;;  %v6775_v56 = vld [vmem:[%s8439_s0 + $0x278] sm:$0xff] }
  0x9e   :  { %v6744_v7 = vmax.f32 %v8598_v61, %v6726_v50  ;;  %2528 = vmatpush1.bf16.msra.mxu0 %v5001_v17  ;;  %949 = vmatprep.subr.bf16.mxu1 %v5006_v23  ;;  %v1939_v17 = vpack.c.bf16 %v6479_v24, %v6474_v43  ;;  %v63_v23 = vpack.c.bf16 %v6529_v31, %v6512_v60  ;;  %v8600_v1 = vld [vmem:[#allocation28_spill] sm:$0xff]  ;;  %v6792_v28 = vld [vmem:[%s8439_s0 + $0x260] sm:$0xff] }
  0x9f   :  { %2529 = vmatprep.subr.bf16.mxu0 %v5009_v21  ;;  %v1942_v21 = vpack.c.bf16 %v6560_v9, %v6540_v45  ;;  %v8601_v31 = vmax.f32 %v8600_v1, %v6152_v18  ;;  %v6802_v18 = vld [vmem:[%s8439_s0 + $0x668] sm:$0xff] }
  0xa0   :  { %8599 = vst [vmem:[#allocation20_spill] sm:$0xff] %v6744_v7  ;;  %v5024_v49 = vld [vmem:[%s8440_s1 + $0x264] ss:$8 sps:$4 sm:$0xff]  }
  0xa1   :  { %950 = vmatpush1.bf16.msra.mxu1 %v5004_v47  ;;  %v6781_v60 = vmax.f32 %v8601_v31, %v6770_v30  ;;  %v8603_v47 = vld [vmem:[#allocation29_spill] sm:$0xff] }
  0xa2   :  { %2530 = vmatpush1.bf16.msra.mxu0 %v5007_v54  ;;  %1322 = vmatprep.subr.bf16.mxu1 %v5012_v44  ;;  %v8604_v54 = vmax.f32 %v8603_v47, %v6157_v13  ;;  %v6807_v13 = vld [vmem:[%s8439_s0 + $0x678] sm:$0xff]  ;;  %v8607_v44 = vld [vmem:[#allocation30_spill] sm:$0xff] }
  0xa3   :  { %2902 = vmatprep.subr.bf16.mxu0 %v5015_v26  ;;  %8602 = vst [vmem:[#allocation25_spill] sm:$0xff] %v6781_v60  ;;  %v6797_v26 = vld [vmem:[%s8439_s0 + $0x608] sm:$0xff]  ;;  %657 = vmatmul.mubr.bf16.gmra.mrb[24].mxu1 %v60_v5  ;;  %v8608_v1 = vmax.f32 %v8607_v44, %v6178_v57  ;;  %v6818_v5 = vld [vmem:[%s8439_s0 + $0x270] sm:$0xff]  ;;  %v6864_v47 = vld [vmem:[%s8439_s0 + $0x298] sm:$0xff] }
  0xa4   :  { %v6787_v61 = vmax.f32 %v8604_v54, %v6775_v56  ;;  %8606 = vst [vmem:[#allocation28_spill] sm:$0xff] %v6797_v26  ;;  %2205 = vmatmul.mubr.bf16.gmra.mrb[24].mxu0 %v1939_v17  ;;  %3893 = vmatprep.mubr.msk.bf16.mxu1 %vm282_vm0, %v63_v23  ;;  %v8610_v54 = vld [vmem:[#allocation31_spill] sm:$0xff]  ;;  %v8613_v17 = vld [vmem:[#allocation32_spill] sm:$0xff] }
  0xa5   :  { %v6813_v31 = vmax.f32 %v8608_v1, %v6792_v28  ;;  %4245 = vmatprep.mubr.msk.bf16.mxu0 %vm282_vm0, %v1942_v21  ;;  %v8611_v57 = vmax.f32 %v8610_v54, %v6183_v29  ;;  %v6835_v1 = vld [vmem:[%s8439_s0 + $0x660] sm:$0xff]  ;;  %v6842_v21 = vld [vmem:[%s8439_s0 + $0x670] sm:$0xff]  ;;  %v6849_v29 = vld [vmem:[%s8439_s0 + $0x288] sm:$0xff]  ;;  %v62_v54 = vpack.c.bf16 %v6550_v39, %v6545_v20  ;;  %v8614_v23 = vmax.f32 %v8613_v17, %v6233_v22 }
  0xa6   :  { %8605 = vst [vmem:[#allocation27_spill] sm:$0xff] %v6787_v61  ;;  %v5118_v20 = vld [vmem:[%s8439_s0 + $0x208] sm:$0xff]  ;;  %v5119_v22 = vld [vmem:[%s8439_s0 + $0x218] sm:$0xff]  ;;  %v8617_v61 = vmax.f32 %v8616_v48, %v6238_v42 }
  0xa7   :  { %8609 = vst [vmem:[#allocation29_spill] sm:$0xff] %v6813_v31  ;;  %v6830_v44 = vmax.f32 %v8611_v57, %v6818_v5  ;;  %v1941_v57 = vpack.c.bf16 %v6586_v10, %v6581_v32  ;;  %v6859_v11 = vmax.f32 %v8614_v23, %v6849_v29  ;;  %v743_v39 = vpack.c.bf16 %v5119_v22, %v5118_v20  ;;  %v5120_v17 = vld [vmem:[%s8439_s0 + $0x618] sm:$0xff]  ;;  %v6895_v20 = vld [vmem:[%s8439_s0 + $0x290] sm:$0xff]  ;;  %v8619_v42 = vld [vmem:[#allocation34_spill] sm:$0xff] }
  0xa8   :  { %v2323_v23 = vpack.c.bf16 %v5120_v17, %v6797_v26  ;;  %v6885_v60 = vmax.f32 %v8617_v61, %v6864_v47  ;;  %v6902_v17 = vld [vmem:[%s8439_s0 + $0x698] sm:$0xff]  ;;  %v8620_v48 = vmax.f32 %v8619_v42, %v6271_v40  ;;  %v8623_v31 = vmax.f32 %v8622_v38, %v6281_v12  ;;  %v6926_v40 = vld [vmem:[%s8439_s0 + $0x690] sm:$0xff]  ;;  %v6931_v12 = vld [vmem:[%s8439_s0 + $0x600] sm:$0xff] }
  0xa9   :  { %8612 = vst [vmem:[#allocation30_spill] sm:$0xff] %v6830_v44  ;;  %8615 = vst [vmem:[#allocation31_spill] sm:$0xff] %v6859_v11  ;;  %v6890_v44 = vld [vmem:[%s8439_s0 + $0x280] sm:$0xff]  ;;  %v5018_v38 = vld [vmem:[%s8440_s1 + $0x254] ss:$8 sps:$4 sm:$0xff]  }
  0xaa   :  { %8618 = vst [vmem:[#allocation32_spill] sm:$0xff] %v6885_v60  ;;  %v6908_v61 = vmax.f32 %v8620_v48, %v6890_v44  ;;  %v6914_v25 = vmax.f32 %v8623_v31, %v6895_v20  ;;  %v6921_v11 = vld [vmem:[%s8439_s0 + $0x680] sm:$0xff]  ;;  %8625 = vst [vmem:[#allocation35_spill] sm:$0xff] %v6931_v12  ;;  %v6953_v48 = vld [vmem:[%s8439_s0 + $0x2a8] sm:$0xff] }
  0xab   :  { %667 = vmatmul.mubr.bf16.gmra.mrb[28].mxu1 %v62_v54  ;;  %v6942_v54 = vld [vmem:[%s8439_s0 + $0x610] sm:$0xff]  ;;  %v5013_v42 = vld [vmem:[%s8440_s1 + $0x540] ss:$8 sps:$4 sm:$0xff]   ;;  %v8635_v26 = vld [vmem:[#allocation12_spill] sm:$0xff] }
  0xac   :  { %8621 = vst [vmem:[#allocation33_spill] sm:$0xff] %v6908_v61  ;;  %8624 = vst [vmem:[#allocation34_spill] sm:$0xff] %v6914_v25  ;;  %2215 = vmatmul.mubr.bf16.gmra.mrb[28].mxu0 %v1941_v57  ;;  %3974 = vmatprep.mubr.msk.bf16.mxu1 %vm282_vm0, %v743_v39  ;;  %v5010_v57 = vld [vmem:[%s8440_s1 + $0x240] ss:$8 sps:$4 sm:$0xff]   ;;  %v2322_v31 = vpack.c.bf16 %v6942_v54, %v6931_v12  ;;  %v5021_v60 = vld [vmem:[%s8440_s1 + $0x554] ss:$8 sps:$4 sm:$0xff]   ;;  %v8626_v25 = vmax.f32 %v6330_v6, %v6348_v8 }
  0xad   :  { %4326 = vmatprep.mubr.msk.bf16.mxu0 %vm282_vm0, %v2323_v23  ;;  %v5121_v39 = vld [vmem:[%s8439_s0 + $0x200] sm:$0xff]  ;;  %v5122_v23 = vld [vmem:[%s8439_s0 + $0x210] sm:$0xff]  ;;  %v8636_v12 = vmax.f32 %v8635_v26, %v6392_v37 }
  0xae   :  { %v742_v22 = vpack.c.bf16 %v5122_v23, %v5121_v39  ;;  %v6973_v61 = vmax.f32 %v8626_v25, %v6953_v48  ;;  %v6978_v39 = vld [vmem:[%s8439_s0 + $0x2b8] sm:$0xff]  ;;  %v8629_v23 = vmax.f32 %v6336_v15, %v6353_v34  ;;  %v6994_v6 = vld [vmem:[%s8439_s0 + $0x2a0] sm:$0xff]  ;;  %v6999_v8 = vld [vmem:[%s8439_s0 + $0x2b0] sm:$0xff] }
  0xaf   :  { %8628 = vst [vmem:[#allocation37_spill] sm:$0xff] %v6978_v39  ;;  %v7006_v34 = vld [vmem:[%s8439_s0 + $0x6b8] sm:$0xff]  ;;  %v8632_v25 = vld [vmem:[#allocation14_spill] sm:$0xff]  ;;  %v7033_v37 = vld [vmem:[%s8439_s0 + $0x220] sm:$0xff] }
  0xb0   :  { %8627 = vst [vmem:[#allocation36_spill] sm:$0xff] %v6973_v61  ;;  %v6984_v7 = vmax.f32 %v8629_v23, %v6978_v39  ;;  %v8633_v23 = vmax.f32 %v8632_v25, %v6382_v35  ;;  %v7018_v39 = vmax.f32 %v8636_v12, %v6999_v8  ;;  %v5016_v15 = vld [vmem:[%s8440_s1 + $0x250] ss:$8 sps:$4 sm:$0xff]   ;;  %v2325_v35 = vpack.c.bf16 %v6665_v63, %v6660_v2  ;;  %v7043_v12 = vld [vmem:[%s8439_s0 + $0x620] sm:$0xff] }
  0xb1   :  { %v5019_v61 = vld [vmem:[%s8440_s1 + $0x550] ss:$8 sps:$4 sm:$0xff]  }
  0xb2   :  { %8630 = vst [vmem:[#allocation38_spill] sm:$0xff] %v6984_v7  ;;  %v7012_v19 = vmax.f32 %v8633_v23, %v6994_v6  ;;  %8637 = vst [vmem:[#allocation12_spill] sm:$0xff] %v7018_v39  ;;  %v7038_v26 = vld [vmem:[%s8439_s0 + $0x230] sm:$0xff]  ;;  %v7080_v2 = vld [vmem:[%s8439_s0 + $0x2d8] sm:$0xff]  ;;  %v8641_v7 = vmax.f32 %v6434_v53, %v6454_v3  ;;  %v8643_v3 = vmax.f32 %v6460_v33, %v6474_v43 }
  0xb3   :  { %v7055_v25 = vld [vmem:[%s8439_s0 + $0x6b0] sm:$0xff]  ;;  %960 = vmatmul.mubr.bf16.vlgmr.msra.gmra.mrb[0].mxu1 %v742_v22  ;;  %v5027_v22 = vld [vmem:[%s8440_s1 + $0x564] ss:$8 sps:$4 sm:$0xff]   ;;  %v7114_v53 = vld [vmem:[%s8439_s0 + $0x6d8] sm:$0xff]  ;;  %v747_v33 = vpack.c.bf16 %v6696_v14, %v6691_v58 }
  0xb4   :  { %8634 = vst [vmem:[#allocation14_spill] sm:$0xff] %v7012_v19  ;;  %2540 = vmatmul.mubr.bf16.vlgmr.msra.gmra.mrb[0].mxu0 %v2322_v31  ;;  %v7060_v23 = vld [vmem:[%s8439_s0 + $0x630] sm:$0xff]  ;;  %1323 = vmatpush1.bf16.msra.mxu1 %v5010_v57  ;;  %v7075_v31 = vld [vmem:[%s8439_s0 + $0x2c8] sm:$0xff]  ;;  %v7092_v39 = vmax.f32 %v8641_v7, %v7080_v2  ;;  %v8645_v7 = vmax.f32 %v6466_v59, %v6479_v24  ;;  %v7142_v59 = vld [vmem:[%s8439_s0 + $0x6c0] sm:$0xff] }
  0xb5   :  { %2903 = vmatpush1.bf16.msra.mxu0 %v5013_v42  ;;  %1324 = vmatprep.subr.bf16.mxu1 %v5018_v38  ;;  %v8638_v63 = vld [vmem:[#allocation15_spill] sm:$0xff]  ;;  %v7097_v19 = vld [vmem:[%s8439_s0 + $0x6c8] sm:$0xff]  ;;  %v7177_v14 = vld [vmem:[%s8439_s0 + $0x640] sm:$0xff] }
  0xb6   :  { %2904 = vmatprep.subr.bf16.mxu0 %v5021_v60  ;;  %v8639_v57 = vmax.f32 %v8638_v63, %v6428_v0  ;;  %8642 = vst [vmem:[#allocation40_spill] sm:$0xff] %v7092_v39  ;;  %v7102_v60 = vld [vmem:[%s8439_s0 + $0x2c0] sm:$0xff]  ;;  %v7107_v0 = vld [vmem:[%s8439_s0 + $0x2d0] sm:$0xff]  ;;  %3975 = vmatprep.mubr.msk.bf16.mxu1 %vm282_vm0, %v745_v16  ;;  %v744_v16 = vpack.c.bf16 %v7038_v26, %v7033_v37 }
  0xb7   :  { %4327 = vmatprep.mubr.msk.bf16.mxu0 %vm282_vm0, %v2325_v35  ;;  %v7120_v63 = vmax.f32 %v8643_v3, %v7102_v60  ;;  %v7126_v38 = vmax.f32 %v8645_v7, %v7107_v0  ;;  %v2324_v35 = vpack.c.bf16 %v7060_v23, %v7043_v12  ;;  %v7147_v24 = vld [vmem:[%s8439_s0 + $0x6d0] sm:$0xff]  ;;  %v5025_v3 = vld [vmem:[%s8440_s1 + $0x560] ss:$8 sps:$4 sm:$0xff]   ;;  %v2327_v39 = vpack.c.bf16 %v6721_v55, %v6716_v36  ;;  %v5036_v43 = vld [vmem:[%s8440_s1 + $0x284] ss:$8 sps:$4 sm:$0xff]  }
  0xb8   :  { %v7086_v42 = vmax.f32 %v8639_v57, %v7075_v31  ;;  %v5022_v57 = vld [vmem:[%s8440_s1 + $0x260] ss:$8 sps:$4 sm:$0xff]   ;;  %1325 = vmatpush1.bf16.msra.mxu1 %v5016_v15  ;;  %v5028_v15 = vld [vmem:[%s8440_s1 + $0x270] ss:$8 sps:$4 sm:$0xff]   ;;  %v5033_v58 = vld [vmem:[%s8440_s1 + $0x574] ss:$8 sps:$4 sm:$0xff]  }
  0xb9   :  { %8644 = vst [vmem:[#allocation41_spill] sm:$0xff] %v7120_v63  ;;  %8646 = vst [vmem:[#allocation42_spill] sm:$0xff] %v7126_v38  ;;  %2905 = vmatpush1.bf16.msra.mxu0 %v5019_v61  ;;  %1326 = vmatprep.subr.bf16.mxu1 %v5024_v49  ;;  %v7163_v61 = vld [vmem:[%s8439_s0 + $0x240] sm:$0xff]  ;;  %v5030_v49 = vld [vmem:[%s8440_s1 + $0x274] ss:$8 sps:$4 sm:$0xff]  }
  0xba   :  { %8640 = vst [vmem:[#allocation15_spill] sm:$0xff] %v7086_v42  ;;  %2906 = vmatprep.subr.bf16.mxu0 %v5027_v22  ;;  %v5031_v22 = vld [vmem:[%s8440_s1 + $0x570] ss:$8 sps:$4 sm:$0xff]   ;;  %v8649_v42 = vmax.f32 %v6535_v27, %v6560_v9  ;;  %v8653_v27 = vmax.f32 %v6566_v4, %v6581_v32  ;;  %v7255_v4 = vld [vmem:[%s8439_s0 + $0x6e0] sm:$0xff] }
  0xbb   :  { %970 = vmatmul.mubr.bf16.gmra.mrb[4].mxu1 %v744_v16  ;;  %v7188_v16 = vld [vmem:[%s8439_s0 + $0x2e8] sm:$0xff] }
  0xbc   :  { %2550 = vmatmul.mubr.bf16.gmra.mrb[4].mxu0 %v2324_v35  ;;  %1327 = vmatpush1.bf16.msra.mxu1 %v5022_v57  ;;  %v7193_v35 = vld [vmem:[%s8439_s0 + $0x2f8] sm:$0xff]  ;;  %v5039_v57 = vld [vmem:[%s8440_s1 + $0x584] ss:$8 sps:$4 sm:$0xff]   ;;  %v5037_v32 = vld [vmem:[%s8440_s1 + $0x580] ss:$8 sps:$4 sm:$0xff]  }
  0xbd   :  { %2907 = vmatpush1.bf16.msra.mxu0 %v5025_v3  ;;  %3976 = vmatprep.mubr.msk.bf16.mxu1 %vm282_vm0, %v747_v33  ;;  %v8647_v3 = vmax.f32 %v6524_v52, %v6540_v45  ;;  %v7210_v38 = vmax.f32 %v8649_v42, %v7193_v35  ;;  %v7220_v33 = vld [vmem:[%s8439_s0 + $0x2f0] sm:$0xff]  ;;  %v7225_v45 = vld [vmem:[%s8439_s0 + $0x6e8] sm:$0xff]  ;;  %v7230_v52 = vld [vmem:[%s8439_s0 + $0x6f8] sm:$0xff]  ;;  %v8654_v42 = vmax.f32 %v6572_v62, %v6586_v10 }
  0xbe   :  { %4328 = vmatprep.mubr.msk.bf16.mxu0 %vm282_vm0, %v2327_v39  ;;  %v7215_v39 = vld [vmem:[%s8439_s0 + $0x2e0] sm:$0xff]  ;;  %1328 = vmatprep.subr.bf16.mxu1 %v5030_v49  ;;  %8651 = vst [vmem:[#allocation45_spill] sm:$0xff] %v7225_v45  ;;  %8652 = vst [vmem:[#allocation46_spill] sm:$0xff] %v7230_v52  ;;  %v7260_v62 = vld [vmem:[%s8439_s0 + $0x6f0] sm:$0xff] }
  0xbf   :  { %v7204_v7 = vmax.f32 %v8647_v3, %v7188_v16  ;;  %8650 = vst [vmem:[#allocation44_spill] sm:$0xff] %v7210_v38  ;;  %2908 = vmatprep.subr.bf16.mxu0 %v5033_v58  ;;  %v7236_v9 = vmax.f32 %v8653_v27, %v7215_v39  ;;  %v7242_v49 = vmax.f32 %v8654_v42, %v7220_v33  ;;  %v5034_v10 = vld [vmem:[%s8440_s1 + $0x280] ss:$8 sps:$4 sm:$0xff]  }
  0xc0   :  { %v746_v58 = vpack.c.bf16 %v6726_v50, %v7163_v61  ;;  %v2326_v3 = vpack.c.bf16 %v6749_v51, %v7177_v14  ;;  %1329 = vmatpush1.bf16.msra.mxu1 %v5028_v15  ;;  %v749_v50 = vpack.c.bf16 %v6775_v56, %v6770_v30  ;;  %v2329_v15 = vpack.c.bf16 %v6807_v13, %v6802_v18  ;;  %v5045_v30 = vld [vmem:[%s8440_s1 + $0x594] ss:$8 sps:$4 sm:$0xff]   ;;  %v5040_v56 = vld [vmem:[%s8440_s1 + $0x290] ss:$8 sps:$4 sm:$0xff]  }
  0xc1   :  { %8648 = vst [vmem:[#allocation43_spill] sm:$0xff] %v7204_v7  ;;  %2909 = vmatpush1.bf16.msra.mxu0 %v5031_v22  ;;  %1330 = vmatprep.subr.bf16.mxu1 %v5036_v43  ;;  %v5042_v22 = vld [vmem:[%s8440_s1 + $0x294] ss:$8 sps:$4 sm:$0xff]   ;;  %v5043_v43 = vld [vmem:[%s8440_s1 + $0x590] ss:$8 sps:$4 sm:$0xff]  }
  0xc2   :  { %2910 = vmatprep.subr.bf16.mxu0 %v5039_v57  ;;  %v5048_v57 = vld [vmem:[%s8440_s1 + $0x2a4] ss:$8 sps:$4 sm:$0xff]  }
  0xc3   :  { %980 = vmatmul.mubr.bf16.gmra.mrb[8].mxu1 %v746_v58  ;;  %v5051_v58 = vld [vmem:[%s8440_s1 + $0x5a4] ss:$8 sps:$4 sm:$0xff]  }
  0xc4   :  { %2560 = vmatmul.mubr.bf16.gmra.mrb[8].mxu0 %v2326_v3  ;;  %3977 = vmatprep.mubr.msk.bf16.mxu1 %vm282_vm0, %v749_v50  ;;  %v748_v3 = vpack.c.bf16 %v6818_v5, %v6792_v28  ;;  %v2331_v50 = vpack.c.bf16 %v6902_v17, %v6869_v46  ;;  %v5049_v28 = vld [vmem:[%s8440_s1 + $0x5a0] ss:$8 sps:$4 sm:$0xff]   ;;  %v5054_v5 = vld [vmem:[%s8440_s1 + $0x2b4] ss:$8 sps:$4 sm:$0xff]  }
  0xc5   :  { %1331 = vmatpush1.bf16.msra.mxu1 %v5034_v10  ;;  %4329 = vmatprep.mubr.msk.bf16.mxu0 %vm282_vm0, %v2329_v15  ;;  %v751_v10 = vpack.c.bf16 %v6864_v47, %v6849_v29  ;;  %v5046_v15 = vld [vmem:[%s8440_s1 + $0x2a0] ss:$8 sps:$4 sm:$0xff]   ;;  %v5057_v47 = vld [vmem:[%s8440_s1 + $0x5b4] ss:$8 sps:$4 sm:$0xff]  }
  0xc6   :  { %2911 = vmatpush1.bf16.msra.mxu0 %v5037_v32  ;;  %1332 = vmatprep.subr.bf16.mxu1 %v5042_v22  ;;  %v2328_v32 = vpack.c.bf16 %v6842_v21, %v6835_v1  ;;  %v5123_v29 = vld [vmem:[%s8439_s0 + $0x510] sm:$0xff]  ;;  %v8655_v22 = vld [vmem:[#allocation9_spill] sm:$0xff] }
  0xc7   :  { %2912 = vmatprep.subr.bf16.mxu0 %v5045_v30  ;;  %v2259_v30 = vmax.f32 %v8655_v22, %v5123_v29  ;;  %v8658_v29 = vld [vmem:[#allocation26_spill] sm:$0xff] }
  0xc9   :  { %1333 = vmatpush1.bf16.msra.mxu1 %v5040_v56  ;;  %v5052_v56 = vld [vmem:[%s8440_s1 + $0x2b0] ss:$8 sps:$4 sm:$0xff]  }
  0xca   :  { %2913 = vmatpush1.bf16.msra.mxu0 %v5043_v43  ;;  %1334 = vmatprep.subr.bf16.mxu1 %v5048_v57  ;;  %v5055_v43 = vld [vmem:[%s8440_s1 + $0x5b0] ss:$8 sps:$4 sm:$0xff]   ;;  %v5060_v57 = vld [vmem:[%s8440_s1 + $0x2c4] ss:$8 sps:$4 sm:$0xff]  }
  0xcb   :  { %2914 = vmatprep.subr.bf16.mxu0 %v5051_v58  ;;  %990 = vmatmul.mubr.bf16.gmra.mrb[12].mxu1 %v748_v3  ;;  %v5063_v58 = vld [vmem:[%s8440_s1 + $0x5c4] ss:$8 sps:$4 sm:$0xff]   ;;  %v7335_v3 = vmax.f32 %v2259_v30, %v6942_v54  ;;  %v8659_v54 = vld [vmem:[#allocation11_spill] sm:$0xff] }
  0xcc   :  { %2570 = vmatmul.mubr.bf16.gmra.mrb[12].mxu0 %v2328_v32  ;;  %3978 = vmatprep.mubr.msk.bf16.mxu1 %vm282_vm0, %v751_v10  ;;  %v750_v32 = vpack.c.bf16 %v6895_v20, %v6890_v44  ;;  %v2330_v10 = vpack.c.bf16 %v6926_v40, %v6921_v11  ;;  %v8660_v22 = vmax.f32 %v8658_v29, %v8659_v54  ;;  %v5061_v44 = vld [vmem:[%s8440_s1 + $0x5c0] ss:$8 sps:$4 sm:$0xff]   ;;  %v5066_v20 = vld [vmem:[%s8440_s1 + $0x2d4] ss:$8 sps:$4 sm:$0xff]  }
  0xcd   :  { %4330 = vmatprep.mubr.msk.bf16.mxu0 %vm282_vm0, %v2331_v50  ;;  %1335 = vmatpush1.bf16.msra.mxu1 %v5046_v15  ;;  %v8656_v50 = vld [vmem:[#allocation37_spill] sm:$0xff]  ;;  %v8661_v54 = vld [vmem:[#allocation22_spill] sm:$0xff] }
  0xce   :  { %2915 = vmatpush1.bf16.msra.mxu0 %v5049_v28  ;;  %1336 = vmatprep.subr.bf16.mxu1 %v5054_v5  ;;  %v753_v15 = vpack.c.bf16 %v8656_v50, %v6953_v48  ;;  %v8657_v28 = vld [vmem:[#allocation39_spill] sm:$0xff]  ;;  %v1080_v30 = vmax.f32 %v8660_v22, %v7163_v61  ;;  %v2332_v50 = vpack.c.bf16 %v7055_v25, %v7050_v41  ;;  %v5073_v29 = vld [vmem:[%s8440_s1 + $0x5e0] ss:$8 sps:$4 sm:$0xff]  }
  0xcf   :  { %2916 = vmatprep.subr.bf16.mxu0 %v5057_v47  ;;  %v2333_v5 = vpack.c.bf16 %v7006_v34, %v8657_v28  ;;  %v5058_v47 = vld [vmem:[%s8440_s1 + $0x2c0] ss:$8 sps:$4 sm:$0xff]   ;;  %v5069_v48 = vld [vmem:[%s8440_s1 + $0x5d4] ss:$8 sps:$4 sm:$0xff]   ;;  %v5064_v61 = vld [vmem:[%s8440_s1 + $0x2d0] ss:$8 sps:$4 sm:$0xff]  }
  0xd0   :  { %v8662_v22 = vld [vmem:[#allocation10_spill] sm:$0xff] }
  0xd1   :  { %1337 = vmatpush1.bf16.msra.mxu1 %v5052_v56  ;;  %v7369_v56 = vld [vmem:[%s8439_s0 + $0x340] sm:$0xff] }
  0xd2   :  { %2917 = vmatpush1.bf16.msra.mxu0 %v5055_v43  ;;  %1338 = vmatprep.subr.bf16.mxu1 %v5060_v57  ;;  %v5067_v43 = vld [vmem:[%s8440_s1 + $0x5d0] ss:$8 sps:$4 sm:$0xff]   ;;  %v1475_v57 = vmax.f32 %v1080_v30, %v7369_v56  ;;  %v8663_v30 = vmax.f32 %v8661_v54, %v8662_v22  ;;  %v8668_v54 = vld [vmem:[#allocation6_spill] sm:$0xff] }
  0xd3   :  { %2918 = vmatprep.subr.bf16.mxu0 %v5063_v58  ;;  %1000 = vmatmul.mubr.bf16.gmra.mrb[16].mxu1 %v750_v32  ;;  %v5072_v58 = vld [vmem:[%s8440_s1 + $0x2e4] ss:$8 sps:$4 sm:$0xff]  }
  0xd4   :  { %2580 = vmatmul.mubr.bf16.gmra.mrb[16].mxu0 %v2330_v10  ;;  %3979 = vmatprep.mubr.msk.bf16.mxu1 %vm282_vm0, %v753_v15  ;;  %v5075_v32 = vld [vmem:[%s8440_s1 + $0x5e4] ss:$8 sps:$4 sm:$0xff]   ;;  %v752_v10 = vpack.c.bf16 %v6999_v8, %v6994_v6  ;;  %v755_v15 = vpack.c.bf16 %v7080_v2, %v7075_v31  ;;  %v5078_v2 = vld [vmem:[%s8440_s1 + $0x2f4] ss:$8 sps:$4 sm:$0xff]  }
  0xd5   :  { %4331 = vmatprep.mubr.msk.bf16.mxu0 %vm282_vm0, %v2333_v5  ;;  %1339 = vmatpush1.bf16.msra.mxu1 %v5058_v47  ;;  %v2335_v5 = vpack.c.bf16 %v7114_v53, %v7097_v19  ;;  %v5070_v47 = vld [vmem:[%s8440_s1 + $0x2e0] ss:$8 sps:$4 sm:$0xff]   ;;  %v5081_v31 = vld [vmem:[%s8440_s1 + $0x5f4] ss:$8 sps:$4 sm:$0xff]  }
  0xd6   :  { %2919 = vmatpush1.bf16.msra.mxu0 %v5061_v44  ;;  %1340 = vmatprep.subr.bf16.mxu1 %v5066_v20  ;;  %v5124_v6 = vld [vmem:[%s8439_s0 + $0x440] sm:$0xff]  ;;  %v1076_v44 = vmax.f32 %v8663_v30, %v7033_v37  ;;  %v5079_v37 = vld [vmem:[%s8440_s1 + $0x5f0] ss:$8 sps:$4 sm:$0xff]  }
  0xd7   :  { %2920 = vmatprep.subr.bf16.mxu0 %v5069_v48  ;;  %v1870_v8 = vmax.f32 %v1475_v57, %v5124_v6  ;;  %v5125_v20 = vld [vmem:[%s8439_s0 + $0x500] sm:$0xff]  ;;  %v8664_v48 = vld [vmem:[#allocation8_spill] sm:$0xff]  ;;  %v757_v6 = vpack.c.bf16 %v7193_v35, %v7188_v16 }
  0xd8   :  { %v5126_v57 = vld [vmem:[%s8439_s0 + $0x540] sm:$0xff] }
  0xd9   :  { %1341 = vmatpush1.bf16.msra.mxu1 %v5064_v61  ;;  %v2257_v61 = vmax.f32 %v8664_v48, %v5125_v20  ;;  %v5127_v16 = vld [vmem:[%s8439_s0 + $0x420] sm:$0xff]  ;;  %v7462_v20 = vld [vmem:[%s8439_s0 + $0x718] sm:$0xff] }
  0xda   :  { %2921 = vmatpush1.bf16.msra.mxu0 %v5067_v43  ;;  %1342 = vmatprep.subr.bf16.mxu1 %v5072_v58  ;;  %v5076_v43 = vld [vmem:[%s8440_s1 + $0x2f0] ss:$8 sps:$4 sm:$0xff]   ;;  %v2265_v58 = vmax.f32 %v1870_v8, %v5126_v57  ;;  %v2337_v8 = vpack.c.bf16 %v7230_v52, %v7225_v45 }
  0xdb   :  { %2922 = vmatprep.subr.bf16.mxu0 %v5075_v32  ;;  %1010 = vmatmul.mubr.bf16.gmra.mrb[20].mxu1 %v752_v10  ;;  %v5084_v32 = vld [vmem:[%s8440_s1 + $0x604] ss:$8 sps:$4 sm:$0xff]  }
  0xdc   :  { %2590 = vmatmul.mubr.bf16.gmra.mrb[20].mxu0 %v2332_v50  ;;  %3980 = vmatprep.mubr.msk.bf16.mxu1 %vm282_vm0, %v755_v15  ;;  %v7429_v10 = vld [vmem:[%s8439_s0 + $0x320] sm:$0xff]  ;;  %v754_v50 = vpack.c.bf16 %v7107_v0, %v7102_v60  ;;  %v2334_v15 = vpack.c.bf16 %v7147_v24, %v7142_v59  ;;  %v7446_v60 = vmax.f32 %v2265_v58, %v7177_v14  ;;  %v4335_v14 = vld [vmem:[%s8439_s0 + $0x708] sm:$0xff] }
  0xdd   :  { %4332 = vmatprep.mubr.msk.bf16.mxu0 %vm282_vm0, %v2335_v5  ;;  %1343 = vmatpush1.bf16.msra.mxu1 %v5070_v47  ;;  %v1471_v5 = vmax.f32 %v1076_v44, %v7429_v10  ;;  %v8665_v47 = vld [vmem:[#allocation35_spill] sm:$0xff]  ;;  %v4334_v0 = vld [vmem:[%s8439_s0 + $0x700] sm:$0xff] }
  0xde   :  { %2923 = vmatpush1.bf16.msra.mxu0 %v5073_v29  ;;  %1344 = vmatprep.subr.bf16.mxu1 %v5078_v2  ;;  %v2652_v29 = vmax.f32 %v2257_v61, %v8665_v47  ;;  %v8666_v2 = vld [vmem:[#allocation28_spill] sm:$0xff]  ;;  %v7467_v61 = vld [vmem:[%s8439_s0 + $0x800] sm:$0xff] }
  0xdf   :  { %2924 = vmatprep.subr.bf16.mxu0 %v5081_v31  ;;  %v8667_v31 = vld [vmem:[#allocation5_spill] sm:$0xff]  ;;  %v1866_v35 = vmax.f32 %v1471_v5, %v5127_v16 }
  0xe0   :  { %v8669_v22 = vmax.f32 %v8667_v31, %v8668_v54  ;;  %v3047_v44 = vmax.f32 %v2652_v29, %v4334_v0  ;;  %v5128_v58 = vld [vmem:[%s8439_s0 + $0x520] sm:$0xff]  ;;  %v8670_v29 = vld [vmem:[#allocation23_spill] sm:$0xff] }
  0xe1   :  { %1345 = vmatpush1.bf16.msra.mxu1 %v5076_v43  ;;  %v756_v43 = vpack.c.bf16 %v7220_v33, %v7215_v39  ;;  %v2718_v39 = vpack.c.bf16 %v7462_v20, %v4335_v14  ;;  %v7487_v33 = vld [vmem:[%s8439_s0 + $0x808] sm:$0xff]  ;;  %v4336_v54 = vld [vmem:[%s8439_s0 + $0x710] sm:$0xff]  ;;  %v4338_v16 = vld [vmem:[%s8439_s0 + $0x720] sm:$0xff] }
  0xe2   :  { %v2653_v30 = vmax.f32 %v8669_v22, %v8666_v2  ;;  %2925 = vmatpush1.bf16.msra.mxu0 %v5079_v37  ;;  %4510 = vmatprep.subr.bf16.mxu1 %v5084_v32  ;;  %v2336_v37 = vpack.c.bf16 %v7260_v62, %v7255_v4  ;;  %v3442_v57 = vmax.f32 %v3047_v44, %v7467_v61  ;;  %v5131_v22 = vld [vmem:[%s8439_s0 + $0x300] sm:$0xff] }
  0xe3   :  { %3297 = vmatprep.subr.bf16.mxu0 %v5084_v32  ;;  %1020 = vmatmul.mubr.bf16.gmra.mrb[24].mxu1 %v754_v50  ;;  %v2261_v32 = vmax.f32 %v1866_v35, %v5128_v58  ;;  %v5129_v50 = vld [vmem:[%s8439_s0 + $0x308] sm:$0xff]  ;;  %v2717_v44 = vpack.c.bf16 %v4336_v54, %v4334_v0 }
  0xe4   :  { %2600 = vmatmul.mubr.bf16.gmra.mrb[24].mxu0 %v2334_v15  ;;  %3981 = vmatprep.mubr.msk.bf16.mxu1 %vm282_vm0, %v757_v6  ;;  %v3048_v48 = vmax.f32 %v2653_v30, %v4335_v14  ;;  %v5130_v15 = vld [vmem:[%s8439_s0 + $0x318] sm:$0xff] }
  0xe5   :  { %4333 = vmatprep.mubr.msk.bf16.mxu0 %vm282_vm0, %v2337_v8  ;;  %v1138_v5 = vpack.c.bf16 %v5130_v15, %v5129_v50  ;;  %3582 = vrot.lane.b32.xlu0 %v3442_v57, %s5157_s20  ;;  %v8671_v6 = vld [vmem:[#allocation24_spill] sm:$0xff]  ;;  %v2656_v31 = vmax.f32 %v2261_v32, %v7043_v12  ;;  %v3987_v12 = vld [vmem:[%s8439_s0 + $0x328] sm:$0xff] }
  0xe6   :  { %v3443_v47 = vmax.f32 %v3048_v48, %v7487_v33  ;;  %v8672_v8 = vmax.f32 %v8670_v29, %v8671_v6  ;;  %v7518_v14 = vld [vmem:[%s8439_s0 + $0x338] sm:$0xff]  ;;  %v7523_v48 = vld [vmem:[%s8439_s0 + $0x728] sm:$0xff] }
  0xe7   :  { %v3051_v57 = vmax.f32 %v2656_v31, %v4338_v16 }
  0xe8   :  { %v1868_v2 = vmax.f32 %v8672_v8, %v7038_v26  ;;  %v5132_v26 = vld [vmem:[%s8439_s0 + $0x310] sm:$0xff] }
  0xe9   :  { %3584 = vrot.lane.b32.xlu0 %v3443_v47, %s5157_s20  ;;  %v1137_v30 = vpack.c.bf16 %v5132_v26, %v5131_v22 }
  0xea   :  { %v2263_v35 = vmax.f32 %v1868_v2, %v7060_v23  ;;  %v5082_v23 = vld [vmem:[%s8440_s1 + $0x600] ss:$8 sps:$4 sm:$0xff]  }
  0xeb   :  { %1030 = vmatmul.mubr.bf16.gmra.mrb[28].mxu1 %v756_v43  ;;  %v7528_v43 = vld [vmem:[%s8439_s0 + $0x738] sm:$0xff] }
  0xec   :  { %2610 = vmatmul.mubr.bf16.gmra.mrb[28].mxu0 %v2336_v37  ;;  %4062 = vmatprep.mubr.msk.bf16.mxu1 %vm282_vm0, %v1138_v5  ;;  %v3049_v37 = vmax.f32 %v7335_v3, %v4336_v54 }
  0xed   :  { %4414 = vmatprep.mubr.msk.bf16.mxu0 %vm282_vm0, %v2718_v39 }
  0xee   :  { %8 = vsyncpa [#allocation3], 0  ;;  %v5087_v0 = vld [vmem:[%s8440_s1 + $0x614] ss:$8 sps:$4 sm:$0xff]   ;;  %v1140_v58 = vpack.c.bf16 %v7518_v14, %v3987_v12  ;;  %v2720_v32 = vpack.c.bf16 %v7528_v43, %v7523_v48  ;;  %v7551_v15 = vld [vmem:[%s8439_s0 + $0x820] sm:$0xff] }
  0xef   :  { %v3988_v50 = vld [vmem:[%s8439_s0 + $0x330] sm:$0xff]  ;;  %8673 = vst [vmem:[#allocation9_spill] sm:$0xff] %v7551_v15  ;;  %v3446_v47 = vmax.f32 %v3051_v57, %v7551_v15  ;;  %v5090_v8 = vld [vmem:[%s8440_s1 + $0x624] ss:$8 sps:$4 sm:$0xff]   ;;  %v7575_v54 = vld [vmem:[%s8439_s0 + $0x358] sm:$0xff] }
  0xf0   :  { %v7546_v3 = vld [vmem:[%s8439_s0 + $0x810] sm:$0xff]  ;;  %v2658_v5 = vmax.f32 %v2263_v35, %v3988_v50  ;;  %v7567_v2 = vld [vmem:[%s8439_s0 + $0x348] sm:$0xff]  ;;  %v1139_v31 = vpack.c.bf16 %v3988_v50, %v7429_v10  ;;  %v7585_v26 = vld [vmem:[%s8439_s0 + $0x758] sm:$0xff] }
  0xf1   :  { %v3444_v39 = vmax.f32 %v3049_v37, %v7546_v3  ;;  %v5085_v29 = vld [vmem:[%s8440_s1 + $0x610] ss:$8 sps:$4 sm:$0xff]   ;;  %v7580_v22 = vld [vmem:[%s8439_s0 + $0x748] sm:$0xff]  ;;  %3590 = vrot.lane.b32.xlu0 %v3446_v47, %s5157_s20  ;;  %v1142_v57 = vpack.c.bf16 %v7575_v54, %v7567_v2  ;;  %v8698_v7 = vld [vmem:[#allocation33_spill] sm:$0xff] }
  0xf2   :  { %v4340_v6 = vld [vmem:[%s8439_s0 + $0x730] sm:$0xff]  ;;  %v5088_v37 = vld [vmem:[%s8440_s1 + $0x620] ss:$8 sps:$4 sm:$0xff]   ;;  %v7607_v50 = vld [vmem:[%s8439_s0 + $0x818] sm:$0xff] }
  0xf3   :  { %1355 = vmatmul.mubr.bf16.vlgmr.msra.gmra.mrb[0].mxu1 %v1137_v30  ;;  %v3053_v30 = vmax.f32 %v2658_v5, %v4340_v6  ;;  %v2719_v35 = vpack.c.bf16 %v4340_v6, %v4338_v16  ;;  %3586 = vrot.lane.b32.xlu1 %v3444_v39, %s5157_s20  ;;  %v8674_v10 = vld [vmem:[#allocation7_spill] sm:$0xff]  ;;  %v2722_v16 = vpack.c.bf16 %v7585_v26, %v7580_v22  ;;  %v4342_v39 = vld [vmem:[%s8439_s0 + $0x740] sm:$0xff]  ;;  %v8694_v45 = vld [vmem:[#allocation30_spill] sm:$0xff] }
  0xf4   :  { %2935 = vmatmul.mubr.bf16.vlgmr.msra.gmra.mrb[0].mxu0 %v2717_v44  ;;  %4522 = vmatpush1.bf16.msra.mxu1 %v5082_v23  ;;  %v3050_v44 = vmax.f32 %v8674_v10, %v7462_v20  ;;  %v7612_v5 = vld [vmem:[%s8439_s0 + $0x830] sm:$0xff]  ;;  %v7648_v10 = vld [vmem:[%s8439_s0 + $0x768] sm:$0xff] }
  0xf5   :  { %3298 = vmatpush1.bf16.msra.mxu0 %v5082_v23  ;;  %4511 = vmatprep.subr.bf16.mxu1 %v5087_v0  ;;  %v8675_v23 = vld [vmem:[#allocation13_spill] sm:$0xff]  ;;  %8678 = vst [vmem:[#allocation37_spill] sm:$0xff] %v7612_v5  ;;  %v7623_v47 = vld [vmem:[%s8439_s0 + $0x750] sm:$0xff] }
  0xf6   :  { %3299 = vmatprep.subr.bf16.mxu0 %v5087_v0  ;;  %4063 = vmatprep.mubr.msk.bf16.mxu1 %vm282_vm0, %v1140_v58  ;;  %v8676_v0 = vld [vmem:[#allocation16_spill] sm:$0xff]  ;;  %v3445_v6 = vmax.f32 %v3050_v44, %v7607_v50 }
  0xf7   :  { %4415 = vmatprep.mubr.msk.bf16.mxu0 %vm282_vm0, %v2720_v32  ;;  %v8677_v58 = vmax.f32 %v8675_v23, %v8676_v0  ;;  %v5093_v32 = vld [vmem:[%s8440_s1 + $0x634] ss:$8 sps:$4 sm:$0xff]   ;;  %v3055_v23 = vmax.f32 %v7446_v60, %v4342_v39 }
  0xf8   :  { %4523 = vmatpush1.bf16.msra.mxu1 %v5085_v29  ;;  %v7653_v44 = vld [vmem:[%s8439_s0 + $0x778] sm:$0xff]  ;;  %3588 = vrot.lane.b32.xlu1 %v3445_v6, %s5157_s20  ;;  %v7683_v6 = vld [vmem:[%s8439_s0 + $0x840] sm:$0xff] }
  0xf9   :  { %3300 = vmatpush1.bf16.msra.mxu0 %v5085_v29  ;;  %4512 = vmatprep.subr.bf16.mxu1 %v5090_v8  ;;  %v2657_v20 = vmax.f32 %v8677_v58, %v3987_v12  ;;  %v3992_v12 = vld [vmem:[%s8439_s0 + $0x350] sm:$0xff]  ;;  %v3448_v29 = vmax.f32 %v3053_v30, %v7612_v5  ;;  %v7643_v30 = vld [vmem:[%s8439_s0 + $0x378] sm:$0xff]  ;;  %v8679_v58 = vld [vmem:[#allocation18_spill] sm:$0xff]  ;;  %8682 = vst [vmem:[#allocation39_spill] sm:$0xff] %v7683_v6 }
  0xfa   :  { %3301 = vmatprep.subr.bf16.mxu0 %v5090_v8  ;;  %v5091_v8 = vld [vmem:[%s8440_s1 + $0x630] ss:$8 sps:$4 sm:$0xff]   ;;  %v5099_v60 = vld [vmem:[%s8440_s1 + $0x654] ss:$8 sps:$4 sm:$0xff]   ;;  %v8699_v5 = vmax.f32 %v8698_v7, %v6921_v11 }
  0xfb   :  { %1365 = vmatmul.mubr.bf16.gmra.mrb[4].mxu1 %v1139_v31  ;;  %v5096_v31 = vld [vmem:[%s8440_s1 + $0x644] ss:$8 sps:$4 sm:$0xff]   ;;  %3594 = vrot.lane.b32.xlu0 %v3448_v29, %s5157_s20  ;;  %v7940_v11 = vld [vmem:[%s8439_s0 + $0x870] sm:$0xff] }
  0xfc   :  { %2945 = vmatmul.mubr.bf16.gmra.mrb[4].mxu0 %v2719_v35  ;;  %4524 = vmatpush1.bf16.msra.mxu1 %v5088_v37  ;;  %v7636_v35 = vld [vmem:[%s8439_s0 + $0x368] sm:$0xff]  ;;  %8700 = vst [vmem:[#allocation10_spill] sm:$0xff] %v7940_v11  ;;  %v8701_v7 = vld [vmem:[#allocation27_spill] sm:$0xff] }
  0xfd   :  { %3302 = vmatpush1.bf16.msra.mxu0 %v5088_v37  ;;  %4064 = vmatprep.mubr.msk.bf16.mxu1 %vm282_vm0, %v1142_v57  ;;  %v3052_v37 = vmax.f32 %v2657_v20, %v7523_v48  ;;  %v1141_v57 = vpack.c.bf16 %v3992_v12, %v7369_v56  ;;  %v1144_v0 = vpack.c.bf16 %v7643_v30, %v7636_v35  ;;  %v5094_v56 = vld [vmem:[%s8440_s1 + $0x640] ss:$8 sps:$4 sm:$0xff]   ;;  %v8680_v20 = vld [vmem:[#allocation19_spill] sm:$0xff] }
  0xfe   :  { %4416 = vmatprep.mubr.msk.bf16.mxu0 %vm282_vm0, %v2722_v16  ;;  %3303 = vmatprep.subr.bf16.mxu0 %v5093_v32  ;;  %v2721_v16 = vpack.c.bf16 %v7623_v47, %v4342_v39  ;;  %v2724_v48 = vpack.c.bf16 %v7653_v44, %v7648_v10  ;;  %v7678_v39 = vld [vmem:[%s8439_s0 + $0x828] sm:$0xff] }
  0xff   :  { %4513 = vmatprep.subr.bf16.mxu1 %v5093_v32  ;;  %v8681_v32 = vmax.f32 %v8679_v58, %v8680_v20  ;;  %v7694_v58 = vld [vmem:[%s8439_s0 + $0x370] sm:$0xff]  ;;  %v7699_v20 = vld [vmem:[%s8439_s0 + $0x760] sm:$0xff] }
 0x100   :  { %4525 = vmatpush1.bf16.msra.mxu1 %v5091_v8 }
 0x101   :  { %3304 = vmatpush1.bf16.msra.mxu0 %v5091_v8  ;;  %4514 = vmatprep.subr.bf16.mxu1 %v5096_v31  ;;  %v2659_v29 = vmax.f32 %v8681_v32, %v7518_v14  ;;  %v8683_v8 = vld [vmem:[#allocation20_spill] sm:$0xff]  ;;  %v3994_v14 = vld [vmem:[%s8439_s0 + $0x360] sm:$0xff]  ;;  %v3447_v32 = vmax.f32 %v3052_v37, %v7678_v39 }
 0x102   :  { %3305 = vmatprep.subr.bf16.mxu0 %v5096_v31  ;;  %v8684_v31 = vmax.f32 %v8683_v8, %v6749_v51  ;;  %v3450_v51 = vmax.f32 %v3055_v23, %v7683_v6  ;;  %v7721_v37 = vld [vmem:[%s8439_s0 + $0x398] sm:$0xff]  ;;  %v7726_v23 = vld [vmem:[%s8439_s0 + $0x788] sm:$0xff]  ;;  %v8688_v6 = vld [vmem:[#allocation29_spill] sm:$0xff] }
 0x103   :  { %1375 = vmatmul.mubr.bf16.gmra.mrb[8].mxu1 %v1141_v57  ;;  %v5097_v57 = vld [vmem:[%s8440_s1 + $0x650] ss:$8 sps:$4 sm:$0xff]   ;;  %3592 = vrot.lane.b32.xlu1 %v3447_v32, %s5157_s20  ;;  %v5105_v32 = vld [vmem:[%s8440_s1 + $0x674] ss:$8 sps:$4 sm:$0xff]  }
 0x104   :  { %v2662_v63 = vmax.f32 %v8684_v31, %v3992_v12  ;;  %2955 = vmatmul.mubr.bf16.gmra.mrb[8].mxu0 %v2721_v16  ;;  %4065 = vmatprep.mubr.msk.bf16.mxu1 %vm282_vm0, %v1144_v0  ;;  %v7708_v12 = vld [vmem:[%s8439_s0 + $0x770] sm:$0xff]  ;;  %v7716_v16 = vld [vmem:[%s8439_s0 + $0x388] sm:$0xff]  ;;  %v7731_v0 = vld [vmem:[%s8439_s0 + $0x798] sm:$0xff]  ;;  %v1143_v31 = vpack.c.bf16 %v7694_v58, %v3994_v14 }
 0x105   :  { %4417 = vmatprep.mubr.msk.bf16.mxu0 %vm282_vm0, %v2724_v48  ;;  %3306 = vmatpush1.bf16.msra.mxu0 %v5094_v56  ;;  %v3054_v48 = vmax.f32 %v2659_v29, %v7528_v43  ;;  %v2723_v42 = vpack.c.bf16 %v7708_v12, %v7699_v20  ;;  %v1146_v43 = vpack.c.bf16 %v7721_v37, %v7716_v16 }
 0x106   :  { %4526 = vmatpush1.bf16.msra.mxu1 %v5094_v56  ;;  %3307 = vmatprep.subr.bf16.mxu0 %v5099_v60  ;;  %v5102_v56 = vld [vmem:[%s8440_s1 + $0x664] ss:$8 sps:$4 sm:$0xff]   ;;  %v3057_v8 = vmax.f32 %v2662_v63, %v7623_v47  ;;  %v2726_v29 = vpack.c.bf16 %v7731_v0, %v7726_v23  ;;  %v5100_v63 = vld [vmem:[%s8440_s1 + $0x660] ss:$8 sps:$4 sm:$0xff]  }
 0x107   :  { %4515 = vmatprep.subr.bf16.mxu1 %v5099_v60  ;;  %3598 = vrot.lane.b32.xlu0 %v3450_v51, %s5157_s20  ;;  %v8685_v47 = vld [vmem:[#allocation17_spill] sm:$0xff]  ;;  %v7760_v51 = vld [vmem:[%s8439_s0 + $0x838] sm:$0xff] }
 0x108   :  { %v8686_v60 = vmax.f32 %v8685_v47, %v6716_v36  ;;  %v8689_v36 = vmax.f32 %v8688_v6, %v6835_v1  ;;  %v7778_v47 = vld [vmem:[%s8439_s0 + $0x390] sm:$0xff]  ;;  %v3449_v1 = vmax.f32 %v3054_v48, %v7760_v51  ;;  %v7805_v48 = vld [vmem:[%s8439_s0 + $0x3b8] sm:$0xff] }
 0x109   :  { %3308 = vmatpush1.bf16.msra.mxu0 %v5097_v57 }
 0x10a   :  { %4527 = vmatpush1.bf16.msra.mxu1 %v5097_v57  ;;  %v2661_v27 = vmax.f32 %v8686_v60, %v7567_v2  ;;  %3309 = vmatprep.subr.bf16.mxu0 %v5102_v56  ;;  %v7765_v57 = vld [vmem:[%s8439_s0 + $0x850] sm:$0xff]  ;;  %v2664_v2 = vmax.f32 %v8689_v36, %v3994_v14  ;;  %v7783_v60 = vld [vmem:[%s8439_s0 + $0x780] sm:$0xff] }
 0x10b   :  { %4516 = vmatprep.subr.bf16.mxu1 %v5102_v56  ;;  %8687 = vst [vmem:[#allocation26_spill] sm:$0xff] %v7765_v57  ;;  %1385 = vmatmul.mubr.bf16.gmra.mrb[12].mxu1 %v1143_v31  ;;  %v7773_v56 = vld [vmem:[%s8439_s0 + $0x380] sm:$0xff]  ;;  %v3452_v6 = vmax.f32 %v3057_v8, %v7765_v57  ;;  %v5103_v14 = vld [vmem:[%s8440_s1 + $0x670] ss:$8 sps:$4 sm:$0xff]   ;;  %v7800_v31 = vld [vmem:[%s8439_s0 + $0x3a8] sm:$0xff] }
 0x10c   :  { %2965 = vmatmul.mubr.bf16.gmra.mrb[12].mxu0 %v2723_v42  ;;  %4066 = vmatprep.mubr.msk.bf16.mxu1 %vm282_vm0, %v1146_v43  ;;  %v7792_v42 = vld [vmem:[%s8439_s0 + $0x790] sm:$0xff]  ;;  %v7810_v8 = vld [vmem:[%s8439_s0 + $0x7a8] sm:$0xff]  ;;  %v7815_v43 = vld [vmem:[%s8439_s0 + $0x7b8] sm:$0xff]  ;;  %v3059_v36 = vmax.f32 %v2664_v2, %v7699_v20  ;;  %v1145_v57 = vpack.c.bf16 %v7778_v47, %v7773_v56  ;;  %v2668_v15 = vmax.f32 %v8699_v5, %v7773_v56 }
 0x10d   :  { %4418 = vmatprep.mubr.msk.bf16.mxu0 %vm282_vm0, %v2726_v29  ;;  %3310 = vmatpush1.bf16.msra.mxu0 %v5100_v63  ;;  %v3056_v29 = vmax.f32 %v2661_v27, %v7580_v22  ;;  %v2725_v52 = vpack.c.bf16 %v7792_v42, %v7783_v60  ;;  %v1148_v27 = vpack.c.bf16 %v7805_v48, %v7800_v31  ;;  %v5106_v20 = vld [vmem:[%s8440_s1 + $0x680] ss:$8 sps:$4 sm:$0xff]  }
 0x10e   :  { %4528 = vmatpush1.bf16.msra.mxu1 %v5100_v63  ;;  %3311 = vmatprep.subr.bf16.mxu0 %v5105_v32  ;;  %v5108_v63 = vld [vmem:[%s8440_s1 + $0x684] ss:$8 sps:$4 sm:$0xff]   ;;  %v2728_v22 = vpack.c.bf16 %v7815_v43, %v7810_v8  ;;  %v8702_v5 = vmax.f32 %v8701_v7, %v6807_v13  ;;  %v5115_v7 = vld [vmem:[%s8440_s1 + $0x6b0] ss:$8 sps:$4 sm:$0xff]  }
 0x10f   :  { %4517 = vmatprep.subr.bf16.mxu1 %v5105_v32  ;;  %3596 = vrot.lane.b32.xlu1 %v3449_v1, %s5157_s20  ;;  %v8690_v32 = vld [vmem:[#allocation21_spill] sm:$0xff]  ;;  %v5111_v1 = vld [vmem:[%s8440_s1 + $0x694] ss:$8 sps:$4 sm:$0xff]  }
 0x110   :  { %3602 = vrot.lane.b32.xlu0 %v3452_v6, %s5157_s20  ;;  %v8691_v2 = vmax.f32 %v8690_v32, %v6721_v55  ;;  %v7845_v6 = vld [vmem:[%s8439_s0 + $0x848] sm:$0xff]  ;;  %v8695_v55 = vmax.f32 %v8694_v45, %v6842_v21  ;;  %v7864_v32 = vld [vmem:[%s8439_s0 + $0x3b0] sm:$0xff]  ;;  %v7949_v56 = vld [vmem:[%s8439_s0 + $0x3c0] sm:$0xff] }
 0x111   :  { %3312 = vmatpush1.bf16.msra.mxu0 %v5103_v14  ;;  %8692 = vst [vmem:[#allocation11_spill] sm:$0xff] %v7845_v6  ;;  %v3451_v21 = vmax.f32 %v3056_v29, %v7845_v6  ;;  %v7893_v29 = vld [vmem:[%s8439_s0 + $0x7c8] sm:$0xff] }
 0x112   :  { %4529 = vmatpush1.bf16.msra.mxu1 %v5103_v14  ;;  %v2663_v38 = vmax.f32 %v8691_v2, %v7575_v54  ;;  %3313 = vmatprep.subr.bf16.mxu0 %v5108_v63  ;;  %v7850_v14 = vld [vmem:[%s8439_s0 + $0x860] sm:$0xff]  ;;  %v2666_v54 = vmax.f32 %v8695_v55, %v7694_v58  ;;  %v7883_v58 = vld [vmem:[%s8439_s0 + $0x3c8] sm:$0xff] }
 0x113   :  { %4518 = vmatprep.subr.bf16.mxu1 %v5108_v63  ;;  %8693 = vst [vmem:[#allocation22_spill] sm:$0xff] %v7850_v14  ;;  %1395 = vmatmul.mubr.bf16.gmra.mrb[16].mxu1 %v1145_v57  ;;  %v7859_v63 = vld [vmem:[%s8439_s0 + $0x3a0] sm:$0xff]  ;;  %v3454_v45 = vmax.f32 %v3059_v36, %v7850_v14  ;;  %v7888_v57 = vld [vmem:[%s8439_s0 + $0x3d8] sm:$0xff] }
 0x114   :  { %2975 = vmatmul.mubr.bf16.gmra.mrb[16].mxu0 %v2725_v52  ;;  %v7869_v2 = vld [vmem:[%s8439_s0 + $0x7a0] sm:$0xff]  ;;  %4067 = vmatprep.mubr.msk.bf16.mxu1 %vm282_vm0, %v1148_v27  ;;  %v7878_v52 = vld [vmem:[%s8439_s0 + $0x7b0] sm:$0xff]  ;;  %v7898_v36 = vld [vmem:[%s8439_s0 + $0x7d8] sm:$0xff]  ;;  %v3061_v55 = vmax.f32 %v2666_v54, %v7708_v12  ;;  %v1147_v14 = vpack.c.bf16 %v7864_v32, %v7859_v63 }
 0x115   :  { %4419 = vmatprep.mubr.msk.bf16.mxu0 %vm282_vm0, %v2728_v22  ;;  %3314 = vmatpush1.bf16.msra.mxu0 %v5106_v20  ;;  %v5109_v27 = vld [vmem:[%s8440_s1 + $0x690] ss:$8 sps:$4 sm:$0xff]   ;;  %v3058_v22 = vmax.f32 %v2663_v38, %v7585_v26  ;;  %v2727_v6 = vpack.c.bf16 %v7878_v52, %v7869_v2  ;;  %v1150_v38 = vpack.c.bf16 %v7888_v57, %v7883_v58 }
 0x116   :  { %4530 = vmatpush1.bf16.msra.mxu1 %v5106_v20  ;;  %3315 = vmatprep.subr.bf16.mxu0 %v5111_v1  ;;  %v5114_v20 = vld [vmem:[%s8440_s1 + $0x6a4] ss:$8 sps:$4 sm:$0xff]   ;;  %v2730_v26 = vpack.c.bf16 %v7898_v36, %v7893_v29 }
 0x117   :  { %4519 = vmatprep.subr.bf16.mxu1 %v5111_v1  ;;  %3600 = vrot.lane.b32.xlu1 %v3451_v21, %s5157_s20  ;;  %v8696_v1 = vld [vmem:[#allocation25_spill] sm:$0xff] }
 0x118   :  { %3606 = vrot.lane.b32.xlu0 %v3454_v45, %s5157_s20  ;;  %v8697_v12 = vmax.f32 %v8696_v1, %v6802_v18  ;;  %v5112_v21 = vld [vmem:[%s8440_s1 + $0x6a0] ss:$8 sps:$4 sm:$0xff]   ;;  %v5117_v45 = vld [vmem:[%s8440_s1 + $0x6b4] ss:$8 sps:$4 sm:$0xff]  }
 0x119   :  { %3316 = vmatpush1.bf16.msra.mxu0 %v5109_v27  ;;  %v7935_v18 = vld [vmem:[%s8439_s0 + $0x858] sm:$0xff] }
 0x11a   :  { %v2665_v54 = vmax.f32 %v8697_v12, %v7636_v35  ;;  %4531 = vmatpush1.bf16.msra.mxu1 %v5109_v27  ;;  %3317 = vmatprep.subr.bf16.mxu0 %v5114_v20  ;;  %v2667_v35 = vmax.f32 %v8702_v5, %v7643_v30  ;;  %v7954_v27 = vld [vmem:[%s8439_s0 + $0x3d0] sm:$0xff]  ;;  %v3453_v13 = vmax.f32 %v3058_v22, %v7935_v18  ;;  %v7977_v22 = vld [vmem:[%s8439_s0 + $0x3e8] sm:$0xff] }
 0x11b   :  { %4520 = vmatprep.subr.bf16.mxu1 %v5114_v20  ;;  %1405 = vmatmul.mubr.bf16.gmra.mrb[20].mxu1 %v1147_v14  ;;  %v7959_v20 = vld [vmem:[%s8439_s0 + $0x7c0] sm:$0xff]  ;;  %v3456_v30 = vmax.f32 %v3061_v55, %v7940_v11  ;;  %v7972_v12 = vld [vmem:[%s8439_s0 + $0x7d0] sm:$0xff]  ;;  %v7982_v55 = vld [vmem:[%s8439_s0 + $0x3f8] sm:$0xff] }
 0x11c   :  { %2985 = vmatmul.mubr.bf16.gmra.mrb[20].mxu0 %v2727_v6  ;;  %v8703_v6 = vld [vmem:[#allocation34_spill] sm:$0xff]  ;;  %4068 = vmatprep.mubr.msk.bf16.mxu1 %vm282_vm0, %v1150_v38  ;;  %v4010_v11 = vld [vmem:[%s8439_s0 + $0x3e0] sm:$0xff] }
 0x11d   :  { %v8704_v14 = vmax.f32 %v8703_v6, %v6926_v40  ;;  %4420 = vmatprep.mubr.msk.bf16.mxu0 %vm282_vm0, %v2730_v26  ;;  %v3060_v40 = vmax.f32 %v2665_v54, %v7648_v10  ;;  %v7989_v38 = vld [vmem:[%s8439_s0 + $0x7e8] sm:$0xff]  ;;  %v7994_v26 = vld [vmem:[%s8439_s0 + $0x7f8] sm:$0xff]  ;;  %3318 = vmatpush1.bf16.msra.mxu0 %v5112_v21  ;;  %v1149_v10 = vpack.c.bf16 %v7954_v27, %v7949_v56  ;;  %v8705_v54 = vld [vmem:[#allocation31_spill] sm:$0xff] }
 0x11e   :  { %4532 = vmatpush1.bf16.msra.mxu1 %v5112_v21  ;;  %3319 = vmatprep.subr.bf16.mxu0 %v5117_v45  ;;  %v8706_v21 = vmax.f32 %v8705_v54, %v6869_v46  ;;  %v8707_v46 = vld [vmem:[#allocation14_spill] sm:$0xff] }
 0x11f   :  { %v2670_v1 = vmax.f32 %v8704_v14, %v7778_v47  ;;  %v3063_v47 = vmax.f32 %v2668_v15, %v7783_v60  ;;  %4521 = vmatprep.subr.bf16.mxu1 %v5117_v45  ;;  %v3062_v15 = vmax.f32 %v2667_v35, %v7653_v44  ;;  %v2729_v60 = vpack.c.bf16 %v7972_v12, %v7959_v20  ;;  %v8018_v35 = vld [vmem:[%s8439_s0 + $0x880] sm:$0xff] }
 0x120   :  { %3604 = vrot.lane.b32.xlu1 %v3453_v13, %s5157_s20  ;;  %3610 = vrot.lane.b32.xlu0 %v3456_v30, %s5157_s20  ;;  %v2669_v5 = vmax.f32 %v8706_v21, %v7716_v16  ;;  %v1152_v44 = vpack.c.bf16 %v7982_v55, %v7977_v22  ;;  %v2732_v45 = vpack.c.bf16 %v7994_v26, %v7989_v38  ;;  %v8023_v13 = vld [vmem:[%s8439_s0 + $0x868] sm:$0xff] }
 0x121   :  { %v3065_v6 = vmax.f32 %v2670_v1, %v7792_v42  ;;  %v8708_v16 = vmax.f32 %v8707_v46, %v7050_v41  ;;  %3320 = vmatpush1.bf16.msra.mxu0 %v5115_v7  ;;  %v3458_v30 = vmax.f32 %v3063_v47, %v8018_v35  ;;  %v3455_v14 = vmax.f32 %v3060_v40, %v8023_v13  ;;  %v8709_v1 = vld [vmem:[#allocation32_spill] sm:$0xff]  ;;  %v4012_v41 = vld [vmem:[%s8439_s0 + $0x3f0] sm:$0xff] }
 0x122   :  { %4533 = vmatpush1.bf16.msra.mxu1 %v5115_v7  ;;  %v8710_v54 = vmax.f32 %v8709_v1, %v6902_v17  ;;  %v3064_v40 = vmax.f32 %v2669_v5, %v7726_v23  ;;  %v8711_v17 = vld [vmem:[#allocation12_spill] sm:$0xff]  ;;  %v8056_v7 = vld [vmem:[%s8439_s0 + $0x7f0] sm:$0xff]  ;;  %v1151_v46 = vpack.c.bf16 %v4012_v41, %v4010_v11 }
 0x123   :  { %v2672_v42 = vmax.f32 %v8708_v16, %v7859_v63  ;;  %1415 = vmatmul.mubr.bf16.gmra.mrb[24].mxu1 %v1149_v10  ;;  %v8044_v63 = vld [vmem:[%s8439_s0 + $0x7e0] sm:$0xff]  ;;  %v4440_v10 = vld [vmem:[%s8439_s0 + $0x890] sm:$0xff]  ;;  %v8064_v23 = vld [vmem:[%s8439_s0 + $0x878] sm:$0xff] }
 0x124   :  { %v2671_v21 = vmax.f32 %v8710_v54, %v7721_v37  ;;  %2995 = vmatmul.mubr.bf16.gmra.mrb[24].mxu0 %v2729_v60  ;;  %v8712_v37 = vmax.f32 %v8711_v17, %v7055_v25  ;;  %4069 = vmatprep.mubr.msk.bf16.mxu1 %vm282_vm0, %v1152_v44  ;;  %v4441_v60 = vld [vmem:[%s8439_s0 + $0x898] sm:$0xff]  ;;  %v3460_v5 = vmax.f32 %v3065_v6, %v4440_v10 }
 0x125   :  { %4421 = vmatprep.mubr.msk.bf16.mxu0 %vm282_vm0, %v2732_v45  ;;  %v3067_v25 = vmax.f32 %v2672_v42, %v7869_v2  ;;  %v3457_v44 = vmax.f32 %v3062_v15, %v8064_v23  ;;  %3608 = vrot.lane.b32.xlu1 %v3455_v14, %s5157_s20  ;;  %v2731_v2 = vpack.c.bf16 %v8056_v7, %v8044_v63  ;;  %v8713_v16 = vld [vmem:[#allocation36_spill] sm:$0xff] }
 0x126   :  { %v2674_v47 = vmax.f32 %v8712_v37, %v7864_v32  ;;  %v4439_v32 = vld [vmem:[%s8439_s0 + $0x888] sm:$0xff]  ;;  %3614 = vrot.lane.b32.xlu0 %v3458_v30, %s5157_s20  ;;  %v3066_v45 = vmax.f32 %v2671_v21, %v7731_v0  ;;  %v8714_v42 = vmax.f32 %v8713_v16, %v8657_v28  ;;  %v3113_v15 = vpack.c.bf16 %v7607_v50, %v7487_v33  ;;  %v4442_v30 = vld [vmem:[%s8439_s0 + $0x8a0] sm:$0xff] }
 0x127   :  { %v3121_v6 = vpack.c.bf16 %v4441_v60, %v4439_v32  ;;  %v8715_v0 = vld [vmem:[#allocation41_spill] sm:$0xff]  ;;  %v3459_v17 = vmax.f32 %v3064_v40, %v4439_v32  ;;  %v3462_v37 = vmax.f32 %v3067_v25, %v4442_v30  ;;  %v8717_v28 = vld [vmem:[#allocation38_spill] sm:$0xff]  ;;  %v4444_v40 = vld [vmem:[%s8439_s0 + $0x8b0] sm:$0xff]  ;;  %v3112_v25 = vpack.c.bf16 %v7546_v3, %v7467_v61 }
 0x128   :  { %v2673_v1 = vmax.f32 %v8714_v42, %v7800_v31  ;;  %v3069_v54 = vmax.f32 %v2674_v47, %v7878_v52  ;;  %v8716_v14 = vmax.f32 %v8715_v0, %v7142_v59  ;;  %v8718_v33 = vmax.f32 %v8717_v28, %v7006_v34  ;;  %v8719_v52 = vld [vmem:[#allocation42_spill] sm:$0xff]  ;;  %v8721_v32 = vld [vmem:[#allocation15_spill] sm:$0xff] }
 0x129   :  { %3612 = vrot.lane.b32.xlu1 %v3457_v44, %s5157_s20  ;;  %v8720_v59 = vmax.f32 %v8719_v52, %v7147_v24  ;;  %v4445_v24 = vld [vmem:[%s8439_s0 + $0x8b8] sm:$0xff]  ;;  %v8723_v61 = vmax.f32 %v7236_v9, %v7255_v4  ;;  %v4448_v4 = vld [vmem:[%s8439_s0 + $0x8d0] sm:$0xff]  ;;  %v3122_v16 = vpack.c.bf16 %v4444_v40, %v4442_v30 }
 0x12a   :  { %v2676_v21 = vmax.f32 %v8716_v14, %v7949_v56  ;;  %3618 = vrot.lane.b32.xlu0 %v3460_v5, %s5157_s20  ;;  %v2675_v50 = vmax.f32 %v8718_v33, %v7805_v48  ;;  %v3068_v31 = vmax.f32 %v2673_v1, %v7810_v8  ;;  %v3461_v48 = vmax.f32 %v3066_v45, %v4441_v60  ;;  %v4443_v8 = vld [vmem:[%s8439_s0 + $0x8a8] sm:$0xff]  ;;  %v8729_v42 = vld [vmem:[#allocation43_spill] sm:$0xff]  ;;  %v8730_v1 = vld [vmem:[#allocation45_spill] sm:$0xff] }
 0x12b   :  { %1425 = vmatmul.mubr.bf16.gmra.mrb[28].mxu1 %v1151_v46  ;;  %v2678_v56 = vmax.f32 %v8720_v59, %v7954_v27  ;;  %v3464_v27 = vmax.f32 %v3069_v54, %v4444_v40  ;;  %v8722_v60 = vmax.f32 %v8721_v32, %v7097_v19  ;;  %v3115_v45 = vpack.c.bf16 %v7760_v51, %v7678_v39  ;;  %v8724_v19 = vld [vmem:[#allocation40_spill] sm:$0xff]  ;;  %v8736_v59 = vld [vmem:[#allocation39_spill] sm:$0xff] }
 0x12c   :  { %3005 = vmatmul.mubr.bf16.gmra.mrb[28].mxu0 %v2731_v2  ;;  %4506 = vmatprep.mubr.msk.bf16.mxu1 %vm282_vm0, %v3121_v6  ;;  %v3071_v34 = vmax.f32 %v2676_v21, %v7959_v20  ;;  %v3070_v47 = vmax.f32 %v2675_v50, %v7815_v43  ;;  %v3120_v20 = vpack.c.bf16 %v4440_v10, %v8018_v35  ;;  %v4446_v43 = vld [vmem:[%s8439_s0 + $0x8c0] sm:$0xff]  ;;  %v8732_v6 = vld [vmem:[#allocation11_spill] sm:$0xff]  ;;  %v4453_v52 = vld [vmem:[%s8439_s0 + $0x8f8] sm:$0xff] }
 0x12d   :  { %4502 = vmatprep.mubr.msk.bf16.mxu0 %vm282_vm0, %v3113_v15  ;;  %3616 = vrot.lane.b32.xlu1 %v3459_v17, %s5157_s20  ;;  %v2677_v5 = vmax.f32 %v8722_v60, %v7883_v58  ;;  %v3073_v44 = vmax.f32 %v2678_v56, %v7972_v12  ;;  %v3123_v46 = vpack.c.bf16 %v4445_v24, %v4443_v8  ;;  %v4450_v21 = vld [vmem:[%s8439_s0 + $0x8e0] sm:$0xff]  ;;  %v8737_v56 = vld [vmem:[#allocation26_spill] sm:$0xff] }
 0x12e   :  { %3622 = vrot.lane.b32.xlu0 %v3462_v37, %s5157_s20  ;;  %v2680_v3 = vmax.f32 %v8723_v61, %v4010_v11  ;;  %v3463_v35 = vmax.f32 %v3068_v31, %v4443_v8  ;;  %v3466_v10 = vmax.f32 %v3071_v34, %v4446_v43  ;;  %v8725_v39 = vmax.f32 %v8724_v19, %v7114_v53  ;;  %v4447_v53 = vld [vmem:[%s8439_s0 + $0x8c8] sm:$0xff] }
 0x12f   :  { %v3072_v58 = vmax.f32 %v2677_v5, %v7893_v29  ;;  %v8726_v12 = vmax.f32 %v7242_v49, %v7260_v62  ;;  %v3465_v2 = vmax.f32 %v3070_v47, %v4445_v24  ;;  %v4449_v49 = vld [vmem:[%s8439_s0 + $0x8d8] sm:$0xff]  ;;  %v3468_v62 = vmax.f32 %v3073_v44, %v4448_v4  ;;  %v8728_v29 = vld [vmem:[#allocation37_spill] sm:$0xff]  ;;  %v4451_v31 = vld [vmem:[%s8439_s0 + $0x8e8] sm:$0xff] }
 0x130   :  { %v2679_v51 = vmax.f32 %v8725_v39, %v7888_v57  ;;  %v3075_v11 = vmax.f32 %v2680_v3, %v8044_v63  ;;  %v8727_v57 = vld [vmem:[#allocation9_spill] sm:$0xff]  ;;  %v8731_v54 = vmax.f32 %v8729_v42, %v8730_v1  ;;  %v3117_v0 = vpack.c.bf16 %v7935_v18, %v8732_v6  ;;  %v8738_v47 = vld [vmem:[#allocation22_spill] sm:$0xff] }
 0x131   :  { %3620 = vrot.lane.b32.xlu1 %v3461_v48, %s5157_s20  ;;  %v2682_v9 = vmax.f32 %v8726_v12, %v4012_v41  ;;  %v3114_v41 = vpack.c.bf16 %v8728_v29, %v8727_v57  ;;  %v3125_v14 = vpack.c.bf16 %v4449_v49, %v4447_v53  ;;  %v3467_v37 = vmax.f32 %v3072_v58, %v4447_v53 }
 0x132   :  { %3626 = vrot.lane.b32.xlu0 %v3464_v27, %s5157_s20  ;;  %v3074_v63 = vmax.f32 %v2679_v51, %v7898_v36  ;;  %v2681_v15 = vmax.f32 %v8731_v54, %v7977_v22  ;;  %v3470_v28 = vmax.f32 %v3075_v11, %v4450_v21  ;;  %v8733_v36 = vld [vmem:[#allocation44_spill] sm:$0xff]  ;;  %v8734_v22 = vld [vmem:[#allocation46_spill] sm:$0xff]  ;;  %v3116_v40 = vpack.c.bf16 %v8737_v56, %v8736_v59 }
 0x133   :  { %3370 = vmatmul.mubr.bf16.vlgmr.msra.gmra.mrb[32].mxu1 %v3120_v20  ;;  %v3077_v17 = vmax.f32 %v2682_v9, %v8056_v7  ;;  %v8735_v30 = vmax.f32 %v8733_v36, %v8734_v22  ;;  %v4452_v7 = vld [vmem:[%s8439_s0 + $0x8f0] sm:$0xff]  ;;  %v3124_v34 = vpack.c.bf16 %v4448_v4, %v4446_v43  ;;  %v3127_v48 = vpack.c.bf16 %v4453_v52, %v4451_v31 }
 0x134   :  { %3330 = vmatmul.mubr.bf16.vlgmr.msra.gmra.mrb[0].mxu0 %v3112_v25  ;;  %4507 = vmatprep.mubr.msk.bf16.mxu1 %vm282_vm0, %v3123_v46  ;;  %v3076_v33 = vmax.f32 %v2681_v15, %v7989_v38  ;;  %v3469_v50 = vmax.f32 %v3074_v63, %v4449_v49  ;;  %v3119_v38 = vpack.c.bf16 %v8064_v23, %v8023_v13  ;;  %v8739_v25 = vld [vmem:[#allocation10_spill] sm:$0xff] }
 0x135   :  { %4503 = vmatprep.mubr.msk.bf16.mxu0 %vm282_vm0, %v3115_v45  ;;  %3624 = vrot.lane.b32.xlu1 %v3463_v35, %s5157_s20  ;;  %v2683_v18 = vmax.f32 %v8735_v30, %v7982_v55  ;;  %v3472_v55 = vmax.f32 %v3077_v17, %v4452_v7  ;;  %v3118_v13 = vpack.c.bf16 %v8739_v25, %v8738_v47 }
 0x136   :  { %3630 = vrot.lane.b32.xlu0 %v3466_v10, %s5157_s20  ;;  %v3471_v24 = vmax.f32 %v3076_v33, %v4451_v31  ;;  %v3126_v23 = vpack.c.bf16 %v4452_v7, %v4450_v21 }
 0x137   :  { %v3078_v8 = vmax.f32 %v2683_v18, %v7994_v26 }
 0x139   :  { %3628 = vrot.lane.b32.xlu1 %v3465_v2, %s5157_s20  ;;  %v3473_v27 = vmax.f32 %v3078_v8, %v4453_v52 }
 0x13a   :  { %3634 = vrot.lane.b32.xlu0 %v3468_v62, %s5157_s20 }
 0x13b   :  { %3380 = vmatmul.mubr.bf16.gmra.mrb[36].mxu1 %v3122_v16 }
 0x13c   :  { %3340 = vmatmul.mubr.bf16.gmra.mrb[4].mxu0 %v3114_v41  ;;  %4508 = vmatprep.mubr.msk.bf16.mxu1 %vm282_vm0, %v3125_v14 }
 0x13d   :  { %4504 = vmatprep.mubr.msk.bf16.mxu0 %vm282_vm0, %v3117_v0  ;;  %3632 = vrot.lane.b32.xlu1 %v3467_v37, %s5157_s20 }
 0x13e   :  { %3638 = vrot.lane.b32.xlu0 %v3470_v28, %s5157_s20 }
 0x141   :  { %3636 = vrot.lane.b32.xlu1 %v3469_v50, %s5157_s20 }
 0x142   :  { %3642 = vrot.lane.b32.xlu0 %v3472_v55, %s5157_s20 }
 0x143   :  { %3390 = vmatmul.mubr.bf16.gmra.mrb[40].mxu1 %v3124_v34 }
 0x144   :  { %3350 = vmatmul.mubr.bf16.gmra.mrb[8].mxu0 %v3116_v40  ;;  %4509 = vmatprep.mubr.msk.bf16.mxu1 %vm282_vm0, %v3127_v48 }
 0x145   :  { %4505 = vmatprep.mubr.msk.bf16.mxu0 %vm282_vm0, %v3119_v38  ;;  %3640 = vrot.lane.b32.xlu1 %v3471_v24, %s5157_s20 }
 0x149   :  { %3644 = vrot.lane.b32.xlu1 %v3473_v27, %s5157_s20 }
 0x14b   :  { %3400 = vmatmul.mubr.bf16.gmra.mrb[44].mxu1 %v3126_v23 }
 0x14c   :  { %3360 = vmatmul.mubr.bf16.gmra.mrb[12].mxu0 %v3118_v13 }
 0x157   :  { %v8205_v26 = vpop.permute.xlu0 %3582 }
 0x15b   :  { %v3585_v32 = vpop.permute.xlu0 %3584 }
 0x15c   :  { %v3646_v60 = vsel %vm282_vm0, %v8205_v26, %v3585_v32 }
 0x15d   :  { %3712 = vst [vmem:[#allocation2 + $0x10] sm:$0xff] %v3646_v60 }
 0x163   :  { %v8213_v45 = vpop.permute.xlu0 %3590 }
 0x165   :  { %v8207_v20 = vpop.permute.xlu1 %3586 }
 0x16a   :  { %v3589_v5 = vpop.permute.xlu1 %3588 }
 0x16b   :  { %v3647_v44 = vsel %vm282_vm0, %v8207_v20, %v3589_v5 }
 0x16c   :  { %3715 = vst [vmem:[#allocation2 + $0x28] sm:$0xff] %v3647_v44 }
 0x16d   :  { %v8215_v43 = vpop.permute.xlu0 %3594 }
 0x175   :  { %v3593_v46 = vpop.permute.xlu1 %3592 }
 0x176   :  { %v3648_v61 = vsel %vm282_vm0, %v8213_v45, %v3593_v46 }
 0x177   :  { %3718 = vst [vmem:[#allocation2 + $0x40] sm:$0xff] %v3648_v61 }
 0x179   :  { %v8219_v3 = vpop.permute.xlu0 %3598 }
 0x181   :  { %v3597_v35 = vpop.permute.xlu1 %3596 }
 0x182   :  { %v3649_v10 = vsel %vm282_vm0, %v8215_v43, %v3597_v35  ;;  %v8223_v19 = vpop.permute.xlu0 %3602 }
 0x183   :  { %3721 = vst [vmem:[#allocation2 + $0x58] sm:$0xff] %v3649_v10 }
 0x189   :  { %v3601_v39 = vpop.permute.xlu1 %3600 }
 0x18a   :  { %v3650_v51 = vsel %vm282_vm0, %v8219_v3, %v3601_v39  ;;  %v8227_v58 = vpop.permute.xlu0 %3606 }
 0x18b   :  { %3724 = vst [vmem:[#allocation2 + $0x70] sm:$0xff] %v3650_v51 }
 0x192   :  { %v3605_v12 = vpop.permute.xlu1 %3604  ;;  %v8229_v9 = vpop.permute.xlu0 %3610 }
 0x193   :  { %8740 = vst [vmem:[#allocation8_spill] sm:$0xff] %v8229_v9  ;;  %v3651_v4 = vsel %vm282_vm0, %v8223_v19, %v3605_v12 }
 0x194   :  { %3727 = vst [vmem:[#allocation2 + $0x88] sm:$0xff] %v3651_v4 }
 0x197   :  { %v3609_v11 = vpop.permute.xlu1 %3608 }
 0x198   :  { %v8233_v2 = vpop.permute.xlu0 %3614  ;;  %v3652_v53 = vsel %vm282_vm0, %v8227_v58, %v3609_v11 }
 0x199   :  { %3730 = vst [vmem:[#allocation2 + $0xa0] sm:$0xff] %v3652_v53 }
 0x19b   :  { %v3613_v49 = vpop.permute.xlu1 %3612 }
 0x19c   :  { %v8237_v62 = vpop.permute.xlu0 %3618  ;;  %v3653_v57 = vsel %vm282_vm0, %v8229_v9, %v3613_v49 }
 0x19d   :  { %3733 = vst [vmem:[#allocation2 + $0xb8] sm:$0xff] %v3653_v57 }
 0x19f   :  { %v3617_v29 = vpop.permute.xlu1 %3616 }
 0x1a0   :  { %v8241_v41 = vpop.permute.xlu0 %3622  ;;  %v3654_v16 = vsel %vm282_vm0, %v8233_v2, %v3617_v29 }
 0x1a1   :  { %3736 = vst [vmem:[#allocation2 + $0xd0] sm:$0xff] %v3654_v16 }
 0x1a3   :  { %v3621_v63 = vpop.permute.xlu1 %3620 }
 0x1a4   :  { %v8245_v42 = vpop.permute.xlu0 %3626  ;;  %v3655_v1 = vsel %vm282_vm0, %v8237_v62, %v3621_v63 }
 0x1a5   :  { %3739 = vst [vmem:[#allocation2 + $0xe8] sm:$0xff] %v3655_v1 }
 0x1a7   :  { %v3625_v54 = vpop.permute.xlu1 %3624 }
 0x1a8   :  { %v8249_v15 = vpop.permute.xlu0 %3630  ;;  %v3656_v6 = vsel %vm282_vm0, %v8241_v41, %v3625_v54 }
 0x1a9   :  { %3742 = vst [vmem:[#allocation2 + $0x100] sm:$0xff] %v3656_v6 }
 0x1ab   :  { %v3629_v0 = vpop.permute.xlu1 %3628 }
 0x1ac   :  { %v3657_v14 = vsel %vm282_vm0, %v8245_v42, %v3629_v0  ;;  %v8255_v21 = vpop.permute.xlu0 %3634 }
 0x1ad   :  { %3745 = vst [vmem:[#allocation2 + $0x118] sm:$0xff] %v3657_v14 }
 0x1af   :  { %v3633_v17 = vpop.permute.xlu1 %3632 }
 0x1b0   :  { %v3658_v37 = vsel %vm282_vm0, %v8249_v15, %v3633_v17  ;;  %v8259_v36 = vpop.permute.xlu0 %3638 }
 0x1b1   :  { %3748 = vst [vmem:[#allocation2 + $0x130] sm:$0xff] %v3658_v37  ;;  %8741 = vst [vmem:[#allocation35_spill] sm:$0xff] %v8259_v36 }
 0x1b3   :  { %v3637_v28 = vpop.permute.xlu1 %3636 }
 0x1b4   :  { %v3659_v22 = vsel %vm282_vm0, %v8255_v21, %v3637_v28  ;;  %v8265_v7 = vpop.permute.xlu0 %3642 }
 0x1b5   :  { %3751 = vst [vmem:[#allocation2 + $0x148] sm:$0xff] %v3659_v22  ;;  %8742 = vst [vmem:[#allocation28_spill] sm:$0xff] %v8265_v7 }
 0x1b7   :  { %v3641_v30 = vpop.permute.xlu1 %3640 }
 0x1b8   :  { %v3660_v18 = vsel %vm282_vm0, %v8259_v36, %v3641_v30 }
 0x1b9   :  { %3754 = vst [vmem:[#allocation2 + $0x160] sm:$0xff] %v3660_v18 }
 0x1bb   :  { %v3645_v33 = vpop.permute.xlu1 %3644 }
 0x1bc   :  { %v3661_v50 = vsel %vm282_vm0, %v8265_v7, %v3645_v33 }
 0x1bd   :  { %3757 = vst [vmem:[#allocation2 + $0x178] sm:$0xff] %v3661_v50 }
 0x1c6   :  { %v8269_v31 = vpop.f32.mrb[0].mxu1 }
 0x1c7   :  { %v8271_v52 = vpop.f32.mrb[1].mxu1 }
 0x1c8   :  { %v8273_v55 = vpop.f32.mrb[2].mxu1 }
 0x1c9   :  { %v8275_v59 = vpop.f32.mrb[3].mxu1 }
 0x1ce   :  { %v8277_v56 = vpop.f32.mrb[4].mxu1 }
 0x1cf   :  { %v8279_v40 = vpop.f32.mrb[5].mxu1 }
 0x1d0   :  { %v8281_v34 = vpop.f32.mrb[6].mxu1 }
 0x1d1   :  { %v8283_v38 = vpop.f32.mrb[7].mxu1 }
 0x1d6   :  { %v8285_v48 = vpop.f32.mrb[8].mxu1 }
 0x1d7   :  { %v8287_v8 = vpop.f32.mrb[9].mxu1 }
 0x1d8   :  { %v8289_v24 = vpop.f32.mrb[10].mxu1 }
 0x1d9   :  { %v8291_v27 = vpop.f32.mrb[11].mxu1 }
 0x1de   :  { %v8293_v47 = vpop.f32.mrb[12].mxu1 }
 0x1df   :  { %v8295_v25 = vpop.f32.mrb[13].mxu1 }
 0x1e0   :  { %v8297_v13 = vpop.f32.mrb[14].mxu1 }
 0x1e1   :  { %v8299_v23 = vpop.f32.mrb[15].mxu1 }
 0x1e6   :  { %v1396_v32 = vpop.f32.mrb[16].mxu1 }
 0x1e7   :  { %v2976_v60 = vpop.f32.mrb[16].mxu0  ;;  %v1398_v44 = vpop.f32.mrb[17].mxu1 }
 0x1e8   :  { %v4550_v5 = vadd.f32 %v2976_v60, %v1396_v32  ;;  %v2978_v46 = vpop.f32.mrb[17].mxu0  ;;  %v1400_v10 = vpop.f32.mrb[18].mxu1 }
 0x1e9   :  { %v4552_v61 = vadd.f32 %v2978_v46, %v1398_v44  ;;  %v2980_v35 = vpop.f32.mrb[18].mxu0  ;;  %v1402_v51 = vpop.f32.mrb[19].mxu1  ;;  %v3476_v46 = vlaneseq }
 0x1ea   :  { %v4554_v39 = vadd.f32 %v2980_v35, %v1400_v10  ;;  %v2982_v12 = vpop.f32.mrb[19].mxu0 }
 0x1eb   :  { %v8301_v4 = vadd.f32 %v2982_v12, %v1402_v51  ;;  %v3477_v10 = vshrl.u32 %v3476_v46, 7 }
 0x1ee   :  { %v1406_v11 = vpop.f32.mrb[20].mxu1 }
 0x1ef   :  { %v2986_v53 = vpop.f32.mrb[20].mxu0  ;;  %v1408_v57 = vpop.f32.mrb[21].mxu1 }
 0x1f0   :  { %v8303_v49 = vadd.f32 %v2986_v53, %v1406_v11  ;;  %v2988_v29 = vpop.f32.mrb[21].mxu0  ;;  %v1410_v63 = vpop.f32.mrb[22].mxu1 }
 0x1f1   :  { %v8305_v16 = vadd.f32 %v2988_v29, %v1408_v57  ;;  %v2990_v1 = vpop.f32.mrb[22].mxu0  ;;  %v1412_v6 = vpop.f32.mrb[23].mxu1 }
 0x1f2   :  { %v8307_v54 = vadd.f32 %v2990_v1, %v1410_v63  ;;  %v2992_v0 = vpop.f32.mrb[23].mxu0 }
 0x1f3   :  { %v8309_v14 = vadd.f32 %v2992_v0, %v1412_v6 }
 0x1f6   :  { %v1416_v17 = vpop.f32.mrb[24].mxu1 }
 0x1f7   :  { %v2996_v37 = vpop.f32.mrb[24].mxu0  ;;  %v1418_v30 = vpop.f32.mrb[25].mxu1 }
 0x1f8   :  { %v8311_v28 = vadd.f32 %v2996_v37, %v1416_v17  ;;  %v2998_v22 = vpop.f32.mrb[25].mxu0  ;;  %v1420_v50 = vpop.f32.mrb[26].mxu1  ;;  %v3478_v37 = vsub.s32 0, %v3477_v10 }
 0x1f9   :  { %v8313_v18 = vadd.f32 %v2998_v22, %v1418_v30  ;;  %v3000_v33 = vpop.f32.mrb[26].mxu0  ;;  %v1422_v60 = vpop.f32.mrb[27].mxu1  ;;  %v3474_v30 = vld [vmem:[%s8441_s2] sm:$0x3]  ;;  %s5158_s2 = smov [#allocation2]  }
 0x1fa   :  { %v8315_v32 = vadd.f32 %v3000_v33, %v1420_v50  ;;  %v3002_v44 = vpop.f32.mrb[27].mxu0  ;;  %v3482_v33 = vsub.s32 1, %v3477_v10  ;;  %v8330_v50 = vrot.slane %v3474_v30, %v3478_v37  ;;  %s3763_s4 = sshll.u32 %s5158_s2, 4  ;;  %s3764_s4 = int_to_ptr.vmem [resolvable:$true] %s3763_s4 }
 0x1fb   :  { %v8317_v35 = vadd.f32 %v3002_v44, %v1422_v60  ;;  %s5133_s5 = scalar_lea.vmem %s3764_s4, 6144  ;;  %p5138_p1 = scmp.lt.s32.totalorder %s3764_s4, %s3764_s4 }
 0x1fc   :  { %v8332_v46 = vrot.slane %v3474_v30, %v3482_v33  ;;  %p5134_p0 = scmp.ne.s32.totalorder %s3764_s4, %s5133_s5  ;;  %p5139_p2 = scmp.lt.s32.totalorder %s5133_s5, %s5133_s5 }
 0x1fe   :  { %v1426_v51 = vpop.f32.mrb[28].mxu1  ;;  %p5140_p3 = por %p5139_p2, %p5138_p1 }
 0x1ff   :  { %v3006_v12 = vpop.f32.mrb[28].mxu0  ;;  %v1428_v57 = vpop.f32.mrb[29].mxu1 }
 0x200   :  { %v8319_v11 = vadd.f32 %v3006_v12, %v1426_v51  ;;  %v3008_v53 = vpop.f32.mrb[29].mxu0  ;;  %v1430_v1 = vpop.f32.mrb[30].mxu1  ;;  %p5141_p4 = pnand %p5140_p3, %p5134_p0 }
 0x201   :  { %v8321_v29 = vadd.f32 %v3008_v53, %v1428_v57  ;;  %v3010_v63 = vpop.f32.mrb[30].mxu0  ;;  %v1432_v0 = vpop.f32.mrb[31].mxu1 }
 0x202   :  { %v8323_v6 = vadd.f32 %v3010_v63, %v1430_v1  ;;  %v3012_v17 = vpop.f32.mrb[31].mxu0 }
 0x203   :  { %v8325_v22 = vadd.f32 %v3012_v17, %v1432_v0 }
 0x206   :  { %v3371_v44 = vpop.f32.mrb[32].mxu1 }
 0x207   :  { %v3331_v60 = vpop.f32.mrb[0].mxu0  ;;  %v4551_v12 = vadd.f32 %v4550_v5, %v3371_v44  ;;  %v3373_v57 = vpop.f32.mrb[33].mxu1 }
 0x208   :  { %v4534_v51 = vadd.f32 %v3331_v60, %v8269_v31  ;;  %v3333_v53 = vpop.f32.mrb[1].mxu0  ;;  %v4553_v1 = vadd.f32 %v4552_v61, %v3373_v57  ;;  %v3375_v17 = vpop.f32.mrb[34].mxu1 }
 0x209   :  { %v4535_v63 = vadd.f32 %v3333_v53, %v8271_v52  ;;  %v3335_v0 = vpop.f32.mrb[2].mxu0  ;;  %v3502_v10 = vadd.f32 %v4551_v12, %v8330_v50  ;;  %v4555_v9 = vadd.f32 %v4554_v39, %v3375_v17  ;;  %v3377_v30 = vpop.f32.mrb[35].mxu1 }
 0x20a   :  { %v3486_v7 = vadd.f32 %v4534_v51, %v8330_v50  ;;  %v4536_v37 = vadd.f32 %v3335_v0, %v8273_v55  ;;  %v3337_v36 = vpop.f32.mrb[3].mxu0  ;;  %v3503_v31 = vadd.f32 %v4553_v1, %v8332_v46  ;;  %v4557_v52 = vadd.f32 %v8301_v4, %v3377_v30 }
 0x20b   :  { %v3487_v33 = vadd.f32 %v4535_v63, %v8332_v46  ;;  %v4537_v5 = vadd.f32 %v3337_v36, %v8275_v59  ;;  %v3534_v60 = vmax.f32 %v3502_v10, 0.0  ;;  %v3504_v51 = vadd.f32 %v4555_v9, %v8330_v50 }
 0x20c   :  { %v3518_v61 = vmax.f32 %v3486_v7, 0.0  ;;  %v3488_v44 = vadd.f32 %v4536_v37, %v8330_v50  ;;  %v3535_v53 = vmax.f32 %v3503_v31, 0.0  ;;  %v3505_v39 = vadd.f32 %v4557_v52, %v8332_v46 }
 0x20d   :  { %v3519_v12 = vmax.f32 %v3487_v33, 0.0  ;;  %v3489_v55 = vadd.f32 %v4537_v5, %v8332_v46  ;;  %3734 = vst [vmem:[#allocation2 + $0xc0] sm:$0xff] %v3534_v60  ;;  %v3536_v63 = vmax.f32 %v3504_v51, 0.0 }
 0x20e   :  { %3710 = vst [vmem:[#allocation2] sm:$0xff] %v3518_v61  ;;  %v3520_v57 = vmax.f32 %v3488_v44, 0.0  ;;  %v3537_v7 = vmax.f32 %v3505_v39, 0.0  ;;  %v3702_v4 = vsel %vm282_vm0, %v3535_v53, %v8233_v2  ;;  %v3381_v9 = vpop.f32.mrb[36].mxu1 }
 0x20f   :  { %v3694_v36 = vsel %vm282_vm0, %v3519_v12, %v8205_v26  ;;  %v3521_v59 = vmax.f32 %v3489_v55, 0.0  ;;  %v3341_v1 = vpop.f32.mrb[4].mxu0  ;;  %3737 = vst [vmem:[#allocation2 + $0xd8] sm:$0xff] %v3536_v63  ;;  %3735 = vst [vmem:[#allocation2 + $0xc8] sm:$0xff] %v3702_v4  ;;  %v4559_v17 = vadd.f32 %v8303_v49, %v3381_v9  ;;  %v3383_v37 = vpop.f32.mrb[37].mxu1 }
 0x210   :  { %3711 = vst [vmem:[#allocation2 + $0x8] sm:$0xff] %v3694_v36  ;;  %3713 = vst [vmem:[#allocation2 + $0x18] sm:$0xff] %v3520_v57  ;;  %v4538_v0 = vadd.f32 %v3341_v1, %v8277_v56  ;;  %v3343_v10 = vpop.f32.mrb[5].mxu0  ;;  %v3703_v2 = vsel %vm282_vm0, %v3537_v7, %v8237_v62  ;;  %v4561_v33 = vadd.f32 %v8305_v16, %v3383_v37  ;;  %v3385_v5 = vpop.f32.mrb[38].mxu1 }
 0x211   :  { %v3695_v26 = vsel %vm282_vm0, %v3521_v59, %v8207_v20  ;;  %v4539_v30 = vadd.f32 %v3343_v10, %v8279_v40  ;;  %v3345_v31 = vpop.f32.mrb[6].mxu0  ;;  %v3506_v56 = vadd.f32 %v4559_v17, %v8330_v50  ;;  %3738 = vst [vmem:[#allocation2 + $0xe0] sm:$0xff] %v3703_v2  ;;  %v4563_v61 = vadd.f32 %v8307_v54, %v3385_v5  ;;  %v3387_v60 = vpop.f32.mrb[39].mxu1 }
 0x212   :  { %3714 = vst [vmem:[#allocation2 + $0x20] sm:$0xff] %v3695_v26  ;;  %v3490_v52 = vadd.f32 %v4538_v0, %v8330_v50  ;;  %v4540_v49 = vadd.f32 %v3345_v31, %v8281_v34  ;;  %v3347_v20 = vpop.f32.mrb[7].mxu0  ;;  %v3507_v62 = vadd.f32 %v4561_v33, %v8332_v46  ;;  %v4565_v44 = vadd.f32 %v8309_v14, %v3387_v60 }
 0x213   :  { %v3491_v40 = vadd.f32 %v4539_v30, %v8332_v46  ;;  %v4541_v16 = vadd.f32 %v3347_v20, %v8283_v38  ;;  %v3538_v12 = vmax.f32 %v3506_v56, 0.0  ;;  %v3508_v55 = vadd.f32 %v4563_v61, %v8330_v50 }
 0x214   :  { %v3522_v51 = vmax.f32 %v3490_v52, 0.0  ;;  %v3492_v53 = vadd.f32 %v4540_v49, %v8330_v50  ;;  %v3539_v34 = vmax.f32 %v3507_v62, 0.0  ;;  %v3509_v57 = vadd.f32 %v4565_v44, %v8332_v46 }
 0x215   :  { %v3523_v39 = vmax.f32 %v3491_v40, 0.0  ;;  %v3493_v54 = vadd.f32 %v4541_v16, %v8332_v46  ;;  %3740 = vst [vmem:[#allocation2 + $0xf0] sm:$0xff] %v3538_v12  ;;  %v3540_v36 = vmax.f32 %v3508_v55, 0.0 }
 0x216   :  { %3716 = vst [vmem:[#allocation2 + $0x30] sm:$0xff] %v3522_v51  ;;  %v3524_v63 = vmax.f32 %v3492_v53, 0.0  ;;  %v3541_v59 = vmax.f32 %v3509_v57, 0.0  ;;  %v3704_v7 = vsel %vm282_vm0, %v3539_v34, %v8241_v41  ;;  %v3391_v1 = vpop.f32.mrb[40].mxu1 }
 0x217   :  { %v3696_v38 = vsel %vm282_vm0, %v3523_v39, %v8213_v45  ;;  %v3525_v14 = vmax.f32 %v3493_v54, 0.0  ;;  %v3351_v4 = vpop.f32.mrb[8].mxu0  ;;  %3743 = vst [vmem:[#allocation2 + $0x108] sm:$0xff] %v3540_v36  ;;  %3741 = vst [vmem:[#allocation2 + $0xf8] sm:$0xff] %v3704_v7  ;;  %v4567_v0 = vadd.f32 %v8311_v28, %v3391_v1  ;;  %v3393_v10 = vpop.f32.mrb[41].mxu1 }
 0x218   :  { %3717 = vst [vmem:[#allocation2 + $0x38] sm:$0xff] %v3696_v38  ;;  %3719 = vst [vmem:[#allocation2 + $0x48] sm:$0xff] %v3524_v63  ;;  %v4542_v9 = vadd.f32 %v3351_v4, %v8285_v48  ;;  %v3353_v17 = vpop.f32.mrb[9].mxu0  ;;  %v3705_v41 = vsel %vm282_vm0, %v3541_v59, %v8245_v42  ;;  %v4569_v26 = vadd.f32 %v8313_v18, %v3393_v10  ;;  %v3395_v2 = vpop.f32.mrb[42].mxu1 }
 0x219   :  { %v3697_v45 = vsel %vm282_vm0, %v3525_v14, %v8215_v43  ;;  %v4543_v37 = vadd.f32 %v3353_v17, %v8287_v8  ;;  %v3355_v30 = vpop.f32.mrb[10].mxu0  ;;  %v3510_v48 = vadd.f32 %v4567_v0, %v8330_v50  ;;  %3744 = vst [vmem:[#allocation2 + $0x110] sm:$0xff] %v3705_v41  ;;  %v4571_v31 = vadd.f32 %v8315_v32, %v3395_v2  ;;  %v3397_v5 = vpop.f32.mrb[43].mxu1  ;;  %v8744_v2 = vld [vmem:[#allocation8_spill] sm:$0xff] }
 0x21a   :  { %3720 = vst [vmem:[#allocation2 + $0x50] sm:$0xff] %v3697_v45  ;;  %v3494_v33 = vadd.f32 %v4542_v9, %v8330_v50  ;;  %v4544_v28 = vadd.f32 %v3355_v30, %v8289_v24  ;;  %v3357_v43 = vpop.f32.mrb[11].mxu0  ;;  %v3511_v42 = vadd.f32 %v4569_v26, %v8332_v46  ;;  %v4573_v52 = vadd.f32 %v8317_v35, %v3397_v5  ;;  %v8743_v30 = vld [vmem:[#allocation35_spill] sm:$0xff] }
 0x21b   :  { %v3495_v8 = vadd.f32 %v4543_v37, %v8332_v46  ;;  %v4545_v18 = vadd.f32 %v3357_v43, %v8291_v27  ;;  %v3542_v49 = vmax.f32 %v3510_v48, 0.0  ;;  %v3512_v20 = vadd.f32 %v4571_v31, %v8330_v50 }
 0x21c   :  { %v3526_v56 = vmax.f32 %v3494_v33, 0.0  ;;  %v3496_v61 = vadd.f32 %v4544_v28, %v8330_v50  ;;  %v3543_v24 = vmax.f32 %v3511_v42, 0.0  ;;  %v3513_v40 = vadd.f32 %v4573_v52, %v8332_v46  ;;  %v8745_v33 = vld [vmem:[#allocation28_spill] sm:$0xff] }
 0x21d   :  { %v3527_v60 = vmax.f32 %v3495_v8, 0.0  ;;  %v3497_v32 = vadd.f32 %v4545_v18, %v8332_v46  ;;  %3746 = vst [vmem:[#allocation2 + $0x120] sm:$0xff] %v3542_v49  ;;  %v3544_v16 = vmax.f32 %v3512_v20, 0.0 }
 0x21e   :  { %3722 = vst [vmem:[#allocation2 + $0x60] sm:$0xff] %v3526_v56  ;;  %v3528_v62 = vmax.f32 %v3496_v61, 0.0  ;;  %v3545_v44 = vmax.f32 %v3513_v40, 0.0  ;;  %v3706_v51 = vsel %vm282_vm0, %v3543_v24, %v8249_v15  ;;  %v3401_v53 = vpop.f32.mrb[44].mxu1 }
 0x21f   :  { %v3698_v27 = vsel %vm282_vm0, %v3527_v60, %v8219_v3  ;;  %v3529_v35 = vmax.f32 %v3497_v32, 0.0  ;;  %v3361_v12 = vpop.f32.mrb[12].mxu0  ;;  %3749 = vst [vmem:[#allocation2 + $0x138] sm:$0xff] %v3544_v16  ;;  %3747 = vst [vmem:[#allocation2 + $0x128] sm:$0xff] %v3706_v51  ;;  %v4575_v39 = vadd.f32 %v8319_v11, %v3401_v53  ;;  %v3403_v54 = vpop.f32.mrb[45].mxu1 }
 0x220   :  { %3723 = vst [vmem:[#allocation2 + $0x68] sm:$0xff] %v3698_v27  ;;  %3725 = vst [vmem:[#allocation2 + $0x78] sm:$0xff] %v3528_v62  ;;  %v4546_v55 = vadd.f32 %v3361_v12, %v8293_v47  ;;  %v3363_v34 = vpop.f32.mrb[13].mxu0  ;;  %v3707_v15 = vsel %vm282_vm0, %v3545_v44, %v8255_v21  ;;  %v4577_v63 = vadd.f32 %v8321_v29, %v3403_v54  ;;  %v3405_v38 = vpop.f32.mrb[46].mxu1 }
 0x221   :  { %v3699_v3 = vsel %vm282_vm0, %v3529_v35, %v8223_v19  ;;  %v4547_v57 = vadd.f32 %v3363_v34, %v8295_v25  ;;  %v3365_v36 = vpop.f32.mrb[14].mxu0  ;;  %v3514_v47 = vadd.f32 %v4575_v39, %v8330_v50  ;;  %3750 = vst [vmem:[#allocation2 + $0x140] sm:$0xff] %v3707_v15  ;;  %v4579_v59 = vadd.f32 %v8323_v6, %v3405_v38  ;;  %v3407_v7 = vpop.f32.mrb[47].mxu1 }
 0x222   :  { %3726 = vst [vmem:[#allocation2 + $0x80] sm:$0xff] %v3699_v3  ;;  %v3498_v14 = vadd.f32 %v4546_v55, %v8330_v50  ;;  %v4548_v11 = vadd.f32 %v3365_v36, %v8297_v13  ;;  %v3367_v19 = vpop.f32.mrb[15].mxu0  ;;  %v3515_v21 = vadd.f32 %v4577_v63, %v8332_v46  ;;  %v4581_v4 = vadd.f32 %v8325_v22, %v3407_v7 }
 0x223   :  { %v3499_v25 = vadd.f32 %v4547_v57, %v8332_v46  ;;  %v4549_v29 = vadd.f32 %v3367_v19, %v8299_v23  ;;  %v3546_v9 = vmax.f32 %v3514_v47, 0.0  ;;  %v3516_v17 = vadd.f32 %v4579_v59, %v8330_v50 }
 0x224   :  { %v3530_v1 = vmax.f32 %v3498_v14, 0.0  ;;  %v3500_v0 = vadd.f32 %v4548_v11, %v8330_v50  ;;  %v3547_v6 = vmax.f32 %v3515_v21, 0.0  ;;  %v3517_v45 = vadd.f32 %v4581_v4, %v8332_v46 }
 0x225   :  { %v3531_v13 = vmax.f32 %v3499_v25, 0.0  ;;  %v3501_v10 = vadd.f32 %v4549_v29, %v8332_v46  ;;  %3752 = vst [vmem:[#allocation2 + $0x150] sm:$0xff] %v3546_v9  ;;  %v3548_v23 = vmax.f32 %v3516_v17, 0.0 }
 0x226   :  { %3728 = vst [vmem:[#allocation2 + $0x90] sm:$0xff] %v3530_v1  ;;  %v3532_v37 = vmax.f32 %v3500_v0, 0.0  ;;  %v3549_v26 = vmax.f32 %v3517_v45, 0.0  ;;  %v3708_v50 = vsel %vm282_vm0, %v3547_v6, %v8743_v30 }
 0x227   :  { %v3700_v22 = vsel %vm282_vm0, %v3531_v13, %v8227_v58  ;;  %v3533_v41 = vmax.f32 %v3501_v10, 0.0  ;;  %3755 = vst [vmem:[#allocation2 + $0x168] sm:$0xff] %v3548_v23  ;;  %3753 = vst [vmem:[#allocation2 + $0x158] sm:$0xff] %v3708_v50 }
 0x228   :  { %3729 = vst [vmem:[#allocation2 + $0x98] sm:$0xff] %v3700_v22  ;;  %3731 = vst [vmem:[#allocation2 + $0xa8] sm:$0xff] %v3532_v37  ;;  %v3709_v48 = vsel %vm282_vm0, %v3549_v26, %v8745_v33 }
 0x229   :  { %v3701_v46 = vsel %vm282_vm0, %v3533_v41, %v8744_v2  ;;  %3756 = vst [vmem:[#allocation2 + $0x170] sm:$0xff] %v3709_v48 }
 0x22a   :  { %3732 = vst [vmem:[#allocation2 + $0xb0] sm:$0xff] %v3701_v46 }
 0x22b   :  { %5144 = shalt.err (!%p5141_p4)
}
 0x22c   :  { %s5145_s8 = scalar_lea.hbm %s8442_s3, 6144 }
 0x22d   :  { %p5146_p5 = scmp.ne.s32.totalorder %s8442_s3, %s5145_s8  ;;  %p5149_p6 = scmp.lt.u32.totalorder %s5145_s8, %s8442_s3 }
 0x22f   :  { %p5151_p7 = pnand %p5149_p6, %p5146_p5 }
 0x231   :  { %5154 = shalt.err (!%p5151_p7)
}
 0x232   :  { %s5159_s13 = smov 384   ;;  %s5160_s1 = smov 24  }
 0x233   :  { %3769 = dma.vmem_to_hbm [thread:$0]  %s3764_s4, 6144, %s8442_s3, [#allocation3], %s5159_s13, %s5159_s13, %s5160_s1  }
 0x234   :  { %5155 = dma.done.wait [#allocation3], 6144  }
 0x235   :  { %5156 = vsyncadd [#allocation3], 4294961152 }
 0x236   :  { %3773 = vsyncpa [#allocation3], 1 }

</bundles_post_ra>
